<compile_context>
chip_gen: v7x
topology: tpu7x:2x2x1
jax: 0.10.0
libtpu: 0.0.40
codegen_flags: <defaults>
</compile_context>

<pallas_src>
import functools

import jax
import jax.numpy as jnp
from jax.experimental import pallas as pl
from jax.experimental.pallas import tpu as pltpu


# ----------------------------- kernels --------------------------------------


def encoder_kernel(
    x_ref,                         # (tile_n, D) f32
    w1_ref, b1_ref,                # Linear(D, 64) with BatchNorm1d(64) folded in (f32)
    w2_ref, b2_ref,                # Linear(64, 64)    (bf16 weight, f32 bias)
    w3_ref, b3_ref,                # Linear(64, 128)   (bf16 weight, f32 bias)
    w4_ref, b4_ref,                # Linear(128, 1024) (bf16 weight, f32 bias)
    enc_ref,                       # (tile_n, 1024) f32 per-point encodings
    pool_ref,                      # (1, 1024) f32 resident running-max accumulator
    *, n_valid,
):
    tile_n, d = x_ref.shape
    n_idx = pl.program_id(1)

    # ---- layer 1: K = in_dim (3) -> do it on the VPU, not the MXU -----------
    x = x_ref[...]                                   # f32
    w1 = w1_ref[...]                                 # (D, 64) f32, BN folded
    h = jnp.broadcast_to(b1_ref[...], (tile_n, w1.shape[1]))
    for k in range(d):                               # static unroll, D is tiny
        h = h + x[:, k:k + 1] * w1[k:k + 1, :]
    h = jnp.maximum(h, 0.0).astype(jnp.bfloat16)     # ReLU, bf16 for the MXU

    # ---- layers 2-4: bf16 operands, f32 accumulation -------------------------
    h = jnp.dot(h, w2_ref[...], preferred_element_type=jnp.float32) + b2_ref[...]
    h = jnp.maximum(h, 0.0).astype(jnp.bfloat16)
    h = jnp.dot(h, w3_ref[...], preferred_element_type=jnp.float32) + b3_ref[...]
    h = jnp.maximum(h, 0.0).astype(jnp.bfloat16)
    enc = jnp.dot(h, w4_ref[...], preferred_element_type=jnp.float32) + b4_ref[...]
    enc_ref[...] = enc

    # ---- fused global max-pool over the points axis --------------------------
    @pl.when(n_idx == 0)
    def _():
        pool_ref[...] = jnp.full(pool_ref.shape, -jnp.inf, dtype=pool_ref.dtype)

    row = jax.lax.broadcasted_iota(jnp.int32, (tile_n, 1), 0) + n_idx * tile_n
    enc_masked = jnp.where(row < n_valid, enc, -jnp.inf)   # mask padded rows
    pool_ref[...] = jnp.maximum(pool_ref[...],
                                enc_masked.max(axis=0, keepdims=True))


def classifier_kernel(
    g_ref,                         # (B, 1024) f32 pooled global features
    w5_ref, b5_ref,                # Linear(1024, 512) with BN(512) folded (bf16 / f32)
    w6_ref, b6_ref,                # Linear(512, 256)  with BN(256) folded (bf16 / f32)
    w7_ref, b7_ref,                # Linear(256, classes) (bf16 / f32)
    out_ref,
):
    h = g_ref[...].astype(jnp.bfloat16)
    h = jnp.dot(h, w5_ref[...], preferred_element_type=jnp.float32) + b5_ref[...]
    h = jnp.maximum(h, 0.0).astype(jnp.bfloat16)
    h = jnp.dot(h, w6_ref[...], preferred_element_type=jnp.float32) + b6_ref[...]
    h = jnp.maximum(h, 0.0).astype(jnp.bfloat16)
    out_ref[...] = (
        jnp.dot(h, w7_ref[...], preferred_element_type=jnp.float32) + b7_ref[...]
    )


# ----------------------------- wrapper ---------------------------------------


@functools.partial(jax.jit, static_argnames=("tile_n",))
def pointnet_forward(x, params, tile_n=256):
    """
    Args:
      x: (B, N, in_dim) float32 point clouds.
      params: folded kernel params (see fold_params).
    Returns:
      (class_outputs (B, classes) f32, encodings (B, N, 1024) f32)
    """
    B, N, D = x.shape
    H4 = params["w4"].shape[1]           # 1024
    classes = params["w7"].shape[1]
    assert tile_n % 8 == 0

    n_tiles = -(-N // tile_n)
    n_pad = n_tiles * tile_n
    x_in = jnp.pad(x, ((0, 0), (0, n_pad - N), (0, 0))) if n_pad != N else x

    enc_ws = (
        params["w1"], params["b1"],
        params["w2"], params["b2"],
        params["w3"], params["b3"],
        params["w4"], params["b4"],
    )

    def _const2(shape):
        zeros = (0,) * len(shape)
        return pl.BlockSpec(shape, lambda b, n, _z=zeros: _z)

    enc_in_specs = (
        [pl.BlockSpec((None, tile_n, D), lambda b, n: (b, n, 0))]
        + [_const2(w.shape) for w in enc_ws]
    )

    enc_pad, pooled3 = pl.pallas_call(
        functools.partial(encoder_kernel, n_valid=N),
        out_shape=(
            jax.ShapeDtypeStruct((B, n_pad, H4), jnp.float32),
            jax.ShapeDtypeStruct((B, 1, H4), jnp.float32),
        ),
        grid=(B, n_tiles),
        in_specs=enc_in_specs,
        out_specs=(
            pl.BlockSpec((None, tile_n, H4), lambda b, n: (b, n, 0)),
            pl.BlockSpec((None, 1, H4), lambda b, n: (b, 0, 0)),   # resident over n
        ),
        compiler_params=pltpu.CompilerParams(
            dimension_semantics=("parallel", "arbitrary")
        ),
    )(x_in, *enc_ws)

    encodings = enc_pad[:, :N, :] if n_pad != N else enc_pad
    pooled = pooled3.reshape(B, H4)

    # ---- classifier on the pooled (B, 1024) features -------------------------
    cls_ws = (
        params["w5"], params["b5"],
        params["w6"], params["b6"],
        params["w7"], params["b7"],
    )

    def _const1(shape):
        zeros = (0,) * len(shape)
        return pl.BlockSpec(shape, lambda i, _z=zeros: _z)

    class_outputs = pl.pallas_call(
        classifier_kernel,
        out_shape=jax.ShapeDtypeStruct((B, classes), jnp.float32),
        grid=(1,),
        in_specs=[_const1((B, H4))] + [_const1(w.shape) for w in cls_ws],
        out_specs=pl.BlockSpec((B, classes), lambda i: (0, 0)),
    )(pooled, *cls_ws)

    return class_outputs, encodings


# ----------------------------- parameters -----------------------------------


def init_params(key, in_dim=3, classes=10):
    """Raw synthetic parameters mirroring the PyTorch module.

    Linear weights are stored (in_features, out_features) so the forward is
    `x @ W + b` (== PyTorch's `x @ W_pt.T + b`). BatchNorm1d params are the
    eval-mode (gamma, beta, running_mean, running_var).
    """
    keys = iter(jax.random.split(key, 40))

    p = {}

    def linear(name, fi, fo):
        p[f"w{name}"] = (
            jax.random.normal(next(keys), (fi, fo), jnp.float32)
            / jnp.sqrt(jnp.float32(fi))
        )
        p[f"b{name}"] = 0.01 * jax.random.normal(next(keys), (1, fo), jnp.float32)

    def bn(name, dim):
        p[f"g{name}"] = 1.0 + 0.1 * jax.random.normal(next(keys), (1, dim), jnp.float32)
        p[f"be{name}"] = 0.1 * jax.random.normal(next(keys), (1, dim), jnp.float32)
        p[f"mu{name}"] = 0.1 * jax.random.normal(next(keys), (1, dim), jnp.float32)
        p[f"v{name}"] = 1.0 + 0.1 * jnp.abs(
            jax.random.normal(next(keys), (1, dim), jnp.float32)
        )

    # encoder: 3 -> 64 (BN) -> 64 -> 128 -> 1024
    linear(1, in_dim, 64); bn(1, 64)
    linear(2, 64, 64)
    linear(3, 64, 128)
    linear(4, 128, 1024)
    # classifier: 1024 -> 512 (BN) -> 256 (BN) -> classes
    linear(5, 1024, 512); bn(5, 512)
    linear(6, 512, 256); bn(6, 256)
    linear(7, 256, classes)
    return p


def fold_params(p, eps=1e-5):
    """Fold eval-mode BatchNorm into the preceding Linear; cast MXU weights to bf16."""

    def fold(w, b, g, be, mu, v):
        s = g / jnp.sqrt(v + eps)          # (1, C) per-channel scale
        return w * s, b * s + (be - mu * s)

    k = {}
    w1, b1 = fold(p["w1"], p["b1"], p["g1"], p["be1"], p["mu1"], p["v1"])
    k["w1"], k["b1"] = w1, b1                                   # f32 (VPU path, K=3)
    k["w2"], k["b2"] = p["w2"].astype(jnp.bfloat16), p["b2"]
    k["w3"], k["b3"] = p["w3"].astype(jnp.bfloat16), p["b3"]
    k["w4"], k["b4"] = p["w4"].astype(jnp.bfloat16), p["b4"]
    w5, b5 = fold(p["w5"], p["b5"], p["g5"], p["be5"], p["mu5"], p["v5"])
    w6, b6 = fold(p["w6"], p["b6"], p["g6"], p["be6"], p["mu6"], p["v6"])
    k["w5"], k["b5"] = w5.astype(jnp.bfloat16), b5
    k["w6"], k["b6"] = w6.astype(jnp.bfloat16), b6
    k["w7"], k["b7"] = p["w7"].astype(jnp.bfloat16), p["b7"]
    return k


def pointnet_reference(x, p, eps=1e-5):
    """Plain-JAX f32 reference of the same forward pass (eval-mode BN)."""
    B, N, D = x.shape

    def bn(h, i):
        s = p[f"g{i}"] / jnp.sqrt(p[f"v{i}"] + eps)
        return (h - p[f"mu{i}"]) * s + p[f"be{i}"]

    h = x.reshape(B * N, D)
    h = jnp.maximum(bn(h @ p["w1"] + p["b1"], 1), 0.0)
    h = jnp.maximum(h @ p["w2"] + p["b2"], 0.0)
    h = jnp.maximum(h @ p["w3"] + p["b3"], 0.0)
    enc = (h @ p["w4"] + p["b4"]).reshape(B, N, -1)
    g = jnp.max(enc, axis=1)
    h = jnp.maximum(bn(g @ p["w5"] + p["b5"], 5), 0.0)
    h = jnp.maximum(bn(h @ p["w6"] + p["b6"], 6), 0.0)
    out = h @ p["w7"] + p["b7"]
    return out, enc


# ----------------------------- main ------------------------------------------


if __name__ == "__main__":
    key = jax.random.PRNGKey(0)
    k_x, k_p = jax.random.split(key)

    B, N, IN_DIM, CLASSES = 2, 200, 3, 10   # pts_per_obj=200, in_dim=3 (defaults)
    x = jax.random.normal(k_x, (B, N, IN_DIM), jnp.float32)
    raw_params = init_params(k_p, in_dim=IN_DIM, classes=CLASSES)
    params = fold_params(raw_params)

    class_outputs, encodings = pointnet_forward(x, params, tile_n=256)
    class_outputs = jax.block_until_ready(class_outputs)
    encodings = jax.block_until_ready(encodings)

    assert class_outputs.shape == (B, CLASSES)
    assert encodings.shape == (B, N, 1024)

    ref_out, ref_enc = pointnet_reference(x, raw_params)
    assert jnp.allclose(encodings, ref_enc, rtol=5e-2, atol=5e-2)
    assert jnp.allclose(class_outputs, ref_out, rtol=5e-2, atol=5e-2)

    print("KERNEL_OK")
</pallas_src>

<mosaic_0001>
module attributes {stable_mosaic.version = 11 : i64} {
  func.func @encoder_kernel(%arg0: i32, %arg1: i32, %arg2: memref<1x256x3xf32, #tpu.memory_space<vmem>>, %arg3: memref<3x64xf32, #tpu.memory_space<vmem>>, %arg4: memref<1x64xf32, #tpu.memory_space<vmem>>, %arg5: memref<64x64xbf16, #tpu.memory_space<vmem>>, %arg6: memref<1x64xf32, #tpu.memory_space<vmem>>, %arg7: memref<64x128xbf16, #tpu.memory_space<vmem>>, %arg8: memref<1x128xf32, #tpu.memory_space<vmem>>, %arg9: memref<128x1024xbf16, #tpu.memory_space<vmem>>, %arg10: memref<1x1024xf32, #tpu.memory_space<vmem>>, %arg11: memref<1x256x1024xf32, #tpu.memory_space<vmem>>, %arg12: memref<1x1x1024xf32, #tpu.memory_space<vmem>>) attributes {dimension_semantics = [#tpu.dimension_semantics<parallel>, #tpu.dimension_semantics<arbitrary>], iteration_bounds = array<i64: 2, 1>, scalar_prefetch = 0 : i64, scratch_operands = 0 : i64, tpu.core_type = #tpu.core_type<tc>, window_params = [{transform_indices = @transform_0, window_bounds = array<i64: 1, 256, 3>}, {pipeline_mode = #tpu.pipeline_mode<synchronous>, transform_indices = @transform_1, window_bounds = array<i64: 3, 64>}, {pipeline_mode = #tpu.pipeline_mode<synchronous>, transform_indices = @transform_2, window_bounds = array<i64: 1, 64>}, {pipeline_mode = #tpu.pipeline_mode<synchronous>, transform_indices = @transform_3, window_bounds = array<i64: 64, 64>}, {pipeline_mode = #tpu.pipeline_mode<synchronous>, transform_indices = @transform_4, window_bounds = array<i64: 1, 64>}, {pipeline_mode = #tpu.pipeline_mode<synchronous>, transform_indices = @transform_5, window_bounds = array<i64: 64, 128>}, {pipeline_mode = #tpu.pipeline_mode<synchronous>, transform_indices = @transform_6, window_bounds = array<i64: 1, 128>}, {pipeline_mode = #tpu.pipeline_mode<synchronous>, transform_indices = @transform_7, window_bounds = array<i64: 128, 1024>}, {pipeline_mode = #tpu.pipeline_mode<synchronous>, transform_indices = @transform_8, window_bounds = array<i64: 1, 1024>}, {transform_indices = @transform_9, window_bounds = array<i64: 1, 256, 1024>}, {transform_indices = @transform_10, window_bounds = array<i64: 1, 1, 1024>}]} {
    %c0 = arith.constant 0 : index
    %c0_0 = arith.constant 0 : index
    %c0_1 = arith.constant 0 : index
    %0 = vector.load %arg2[%c0, %c0_0, %c0_1] : memref<1x256x3xf32, #tpu.memory_space<vmem>>, vector<1x256x3xf32>
    %1 = vector.shape_cast %0 : vector<1x256x3xf32> to vector<256x3xf32>
    %c0_2 = arith.constant 0 : index
    %c0_3 = arith.constant 0 : index
    %2 = vector.load %arg3[%c0_2, %c0_3] : memref<3x64xf32, #tpu.memory_space<vmem>>, vector<3x64xf32>
    %c0_4 = arith.constant 0 : index
    %c0_5 = arith.constant 0 : index
    %3 = vector.load %arg4[%c0_4, %c0_5] : memref<1x64xf32, #tpu.memory_space<vmem>>, vector<1x64xf32>
    %4 = vector.shape_cast %3 : vector<1x64xf32> to vector<1x64xf32>
    %5 = vector.broadcast %4 : vector<1x64xf32> to vector<256x64xf32>
    %6 = vector.extract_strided_slice %1 {offsets = [0, 0], sizes = [256, 1], strides = [1, 1]} : vector<256x3xf32> to vector<256x1xf32>
    %7 = vector.extract_strided_slice %2 {offsets = [0, 0], sizes = [1, 64], strides = [1, 1]} : vector<3x64xf32> to vector<1x64xf32>
    %8 = vector.broadcast %6 : vector<256x1xf32> to vector<256x64xf32>
    %9 = vector.broadcast %7 : vector<1x64xf32> to vector<256x64xf32>
    %10 = arith.mulf %8, %9 : vector<256x64xf32>
    %11 = arith.addf %5, %10 : vector<256x64xf32>
    %12 = vector.extract_strided_slice %1 {offsets = [0, 1], sizes = [256, 1], strides = [1, 1]} : vector<256x3xf32> to vector<256x1xf32>
    %13 = vector.extract_strided_slice %2 {offsets = [1, 0], sizes = [1, 64], strides = [1, 1]} : vector<3x64xf32> to vector<1x64xf32>
    %14 = vector.broadcast %12 : vector<256x1xf32> to vector<256x64xf32>
    %15 = vector.broadcast %13 : vector<1x64xf32> to vector<256x64xf32>
    %16 = arith.mulf %14, %15 : vector<256x64xf32>
    %17 = arith.addf %11, %16 : vector<256x64xf32>
    %18 = vector.extract_strided_slice %1 {offsets = [0, 2], sizes = [256, 1], strides = [1, 1]} : vector<256x3xf32> to vector<256x1xf32>
    %19 = vector.extract_strided_slice %2 {offsets = [2, 0], sizes = [1, 64], strides = [1, 1]} : vector<3x64xf32> to vector<1x64xf32>
    %20 = vector.broadcast %18 : vector<256x1xf32> to vector<256x64xf32>
    %21 = vector.broadcast %19 : vector<1x64xf32> to vector<256x64xf32>
    %22 = arith.mulf %20, %21 : vector<256x64xf32>
    %23 = arith.addf %17, %22 : vector<256x64xf32>
    %cst = arith.constant 0.000000e+00 : f32
    %24 = vector.broadcast %cst : f32 to vector<256x64xf32>
    %25 = arith.maximumf %23, %24 : vector<256x64xf32>
    %26 = arith.truncf %25 : vector<256x64xf32> to vector<256x64xbf16>
    %c0_6 = arith.constant 0 : index
    %c0_7 = arith.constant 0 : index
    %27 = vector.load %arg5[%c0_6, %c0_7] : memref<64x64xbf16, #tpu.memory_space<vmem>>, vector<64x64xbf16>
    %cst_8 = arith.constant dense<0.000000e+00> : vector<256x64xf32>
    %28 = tpu.matmul %26, %27, %cst_8 {dimension_numbers = #tpu.dot_dimension_numbers<[1], [0], [0], [1], [0, 0, 1, 1], [], []>} : vector<256x64xbf16>, vector<64x64xbf16>, vector<256x64xf32> -> vector<256x64xf32>
    %c0_9 = arith.constant 0 : index
    %c0_10 = arith.constant 0 : index
    %29 = vector.load %arg6[%c0_9, %c0_10] : memref<1x64xf32, #tpu.memory_space<vmem>>, vector<1x64xf32>
    %30 = vector.broadcast %29 : vector<1x64xf32> to vector<256x64xf32>
    %31 = arith.addf %28, %30 : vector<256x64xf32>
    %cst_11 = arith.constant 0.000000e+00 : f32
    %32 = vector.broadcast %cst_11 : f32 to vector<256x64xf32>
    %33 = arith.maximumf %31, %32 : vector<256x64xf32>
    %34 = arith.truncf %33 : vector<256x64xf32> to vector<256x64xbf16>
    %c0_12 = arith.constant 0 : index
    %c0_13 = arith.constant 0 : index
    %35 = vector.load %arg7[%c0_12, %c0_13] : memref<64x128xbf16, #tpu.memory_space<vmem>>, vector<64x128xbf16>
    %cst_14 = arith.constant dense<0.000000e+00> : vector<256x128xf32>
    %36 = tpu.matmul %34, %35, %cst_14 {dimension_numbers = #tpu.dot_dimension_numbers<[1], [0], [0], [1], [0, 0, 1, 1], [], []>} : vector<256x64xbf16>, vector<64x128xbf16>, vector<256x128xf32> -> vector<256x128xf32>
    %c0_15 = arith.constant 0 : index
    %c0_16 = arith.constant 0 : index
    %37 = vector.load %arg8[%c0_15, %c0_16] : memref<1x128xf32, #tpu.memory_space<vmem>>, vector<1x128xf32>
    %38 = vector.broadcast %37 : vector<1x128xf32> to vector<256x128xf32>
    %39 = arith.addf %36, %38 : vector<256x128xf32>
    %cst_17 = arith.constant 0.000000e+00 : f32
    %40 = vector.broadcast %cst_17 : f32 to vector<256x128xf32>
    %41 = arith.maximumf %39, %40 : vector<256x128xf32>
    %42 = arith.truncf %41 : vector<256x128xf32> to vector<256x128xbf16>
    %c0_18 = arith.constant 0 : index
    %c0_19 = arith.constant 0 : index
    %43 = vector.load %arg9[%c0_18, %c0_19] : memref<128x1024xbf16, #tpu.memory_space<vmem>>, vector<128x1024xbf16>
    %cst_20 = arith.constant dense<0.000000e+00> : vector<256x1024xf32>
    %44 = tpu.matmul %42, %43, %cst_20 {dimension_numbers = #tpu.dot_dimension_numbers<[1], [0], [0], [1], [0, 0, 1, 1], [], []>} : vector<256x128xbf16>, vector<128x1024xbf16>, vector<256x1024xf32> -> vector<256x1024xf32>
    %c0_21 = arith.constant 0 : index
    %c0_22 = arith.constant 0 : index
    %45 = vector.load %arg10[%c0_21, %c0_22] : memref<1x1024xf32, #tpu.memory_space<vmem>>, vector<1x1024xf32>
    %46 = vector.broadcast %45 : vector<1x1024xf32> to vector<256x1024xf32>
    %47 = arith.addf %44, %46 : vector<256x1024xf32>
    %c0_23 = arith.constant 0 : index
    %c0_24 = arith.constant 0 : index
    %c0_25 = arith.constant 0 : index
    %48 = vector.load %arg11[%c0_23, %c0_24, %c0_25] : memref<1x256x1024xf32, #tpu.memory_space<vmem>>, vector<1x256x1024xf32>
    %49 = vector.shape_cast %48 : vector<1x256x1024xf32> to vector<256x1024xf32>
    %50 = vector.shape_cast %47 : vector<256x1024xf32> to vector<1x256x1024xf32>
    tpu.vector_store %arg11[%c0_23, %c0_24, %c0_25], %50 {strides = array<i32>} : memref<1x256x1024xf32, #tpu.memory_space<vmem>>, vector<1x256x1024xf32>,
    %c0_i32 = arith.constant 0 : i32
    %51 = arith.cmpi eq, %arg1, %c0_i32 : i32
    %52 = arith.extui %51 : i1 to i32
    %c0_i32_26 = arith.constant 0 : i32
    %53 = arith.cmpi ne, %52, %c0_i32_26 : i32
    scf.if %53 {
      %cst_35 = arith.constant 0xFF800000 : f32
      %72 = vector.broadcast %cst_35 : f32 to vector<1x1024xf32>
      %c0_36 = arith.constant 0 : index
      %c0_37 = arith.constant 0 : index
      %c0_38 = arith.constant 0 : index
      %73 = vector.load %arg12[%c0_36, %c0_37, %c0_38] : memref<1x1x1024xf32, #tpu.memory_space<vmem>>, vector<1x1x1024xf32>
      %74 = vector.shape_cast %73 : vector<1x1x1024xf32> to vector<1x1024xf32>
      %75 = vector.shape_cast %72 : vector<1x1024xf32> to vector<1x1x1024xf32>
      tpu.vector_store %arg12[%c0_36, %c0_37, %c0_38], %75 {strides = array<i32>} : memref<1x1x1024xf32, #tpu.memory_space<vmem>>, vector<1x1x1024xf32>,
    } else {
    }
    %54 = tpu.iota {dimensions = array<i32: 0>} : vector<256x1xi32>
    %c256_i32 = arith.constant 256 : i32
    %55 = arith.muli %arg1, %c256_i32 : i32
    %56 = vector.broadcast %55 : i32 to vector<256x1xi32>
    %57 = arith.addi %54, %56 : vector<256x1xi32>
    %c200_i32 = arith.constant 200 : i32
    %58 = vector.broadcast %c200_i32 : i32 to vector<256x1xi32>
    %59 = arith.cmpi slt, %57, %58 : vector<256x1xi32>
    %cst_27 = arith.constant 0xFF800000 : f32
    %60 = vector.shape_cast %59 : vector<256x1xi1> to vector<256x1xi1>
    %61 = vector.broadcast %60 : vector<256x1xi1> to vector<256x1024xi1>
    %62 = vector.broadcast %cst_27 : f32 to vector<256x1024xf32>
    %63 = arith.select %61, %47, %62 : vector<256x1024xi1>, vector<256x1024xf32>
    %c0_28 = arith.constant 0 : index
    %c0_29 = arith.constant 0 : index
    %c0_30 = arith.constant 0 : index
    %64 = vector.load %arg12[%c0_28, %c0_29, %c0_30] : memref<1x1x1024xf32, #tpu.memory_space<vmem>>, vector<1x1x1024xf32>
    %65 = vector.shape_cast %64 : vector<1x1x1024xf32> to vector<1x1024xf32>
    %cst_31 = arith.constant dense<0xFF800000> : vector<1024xf32>
    %66 = vector.multi_reduction <maximumf>, %63, %cst_31 [0] : vector<256x1024xf32> to vector<1024xf32>
    %67 = vector.shape_cast %66 : vector<1024xf32> to vector<1x1024xf32>
    %68 = arith.maximumf %65, %67 : vector<1x1024xf32>
    %c0_32 = arith.constant 0 : index
    %c0_33 = arith.constant 0 : index
    %c0_34 = arith.constant 0 : index
    %69 = vector.load %arg12[%c0_32, %c0_33, %c0_34] : memref<1x1x1024xf32, #tpu.memory_space<vmem>>, vector<1x1x1024xf32>
    %70 = vector.shape_cast %69 : vector<1x1x1024xf32> to vector<1x1024xf32>
    %71 = vector.shape_cast %68 : vector<1x1024xf32> to vector<1x1x1024xf32>
    tpu.vector_store %arg12[%c0_32, %c0_33, %c0_34], %71 {strides = array<i32>} : memref<1x1x1024xf32, #tpu.memory_space<vmem>>, vector<1x1x1024xf32>,
    return
  }
  func.func @transform_0(%arg0: i32, %arg1: i32) -> (i32, i32, i32) {
    %c0_i32 = arith.constant 0 : i32
    %c0_i32_0 = arith.constant 0 : i32
    return %arg0, %arg1, %c0_i32 : i32, i32, i32
  }
  func.func @transform_1(%arg0: i32, %arg1: i32) -> (i32, i32) {
    %c0_i32 = arith.constant 0 : i32
    %c0_i32_0 = arith.constant 0 : i32
    %c0_i32_1 = arith.constant 0 : i32
    return %c0_i32, %c0_i32_0 : i32, i32
  }
  func.func @transform_2(%arg0: i32, %arg1: i32) -> (i32, i32) {
    %c0_i32 = arith.constant 0 : i32
    %c0_i32_0 = arith.constant 0 : i32
    %c0_i32_1 = arith.constant 0 : i32
    return %c0_i32, %c0_i32_0 : i32, i32
  }
  func.func @transform_3(%arg0: i32, %arg1: i32) -> (i32, i32) {
    %c0_i32 = arith.constant 0 : i32
    %c0_i32_0 = arith.constant 0 : i32
    %c0_i32_1 = arith.constant 0 : i32
    return %c0_i32, %c0_i32_0 : i32, i32
  }
  func.func @transform_4(%arg0: i32, %arg1: i32) -> (i32, i32) {
    %c0_i32 = arith.constant 0 : i32
    %c0_i32_0 = arith.constant 0 : i32
    %c0_i32_1 = arith.constant 0 : i32
    return %c0_i32, %c0_i32_0 : i32, i32
  }
  func.func @transform_5(%arg0: i32, %arg1: i32) -> (i32, i32) {
    %c0_i32 = arith.constant 0 : i32
    %c0_i32_0 = arith.constant 0 : i32
    %c0_i32_1 = arith.constant 0 : i32
    return %c0_i32, %c0_i32_0 : i32, i32
  }
  func.func @transform_6(%arg0: i32, %arg1: i32) -> (i32, i32) {
    %c0_i32 = arith.constant 0 : i32
    %c0_i32_0 = arith.constant 0 : i32
    %c0_i32_1 = arith.constant 0 : i32
    return %c0_i32, %c0_i32_0 : i32, i32
  }
  func.func @transform_7(%arg0: i32, %arg1: i32) -> (i32, i32) {
    %c0_i32 = arith.constant 0 : i32
    %c0_i32_0 = arith.constant 0 : i32
    %c0_i32_1 = arith.constant 0 : i32
    return %c0_i32, %c0_i32_0 : i32, i32
  }
  func.func @transform_8(%arg0: i32, %arg1: i32) -> (i32, i32) {
    %c0_i32 = arith.constant 0 : i32
    %c0_i32_0 = arith.constant 0 : i32
    %c0_i32_1 = arith.constant 0 : i32
    return %c0_i32, %c0_i32_0 : i32, i32
  }
  func.func @transform_9(%arg0: i32, %arg1: i32) -> (i32, i32, i32) {
    %c0_i32 = arith.constant 0 : i32
    %c0_i32_0 = arith.constant 0 : i32
    return %arg0, %arg1, %c0_i32 : i32, i32, i32
  }
  func.func @transform_10(%arg0: i32, %arg1: i32) -> (i32, i32, i32) {
    %c0_i32 = arith.constant 0 : i32
    %c0_i32_0 = arith.constant 0 : i32
    %c0_i32_1 = arith.constant 0 : i32
    return %arg0, %c0_i32, %c0_i32_0 : i32, i32, i32
  }
}

module attributes {stable_mosaic.version = 11 : i64} {
  func.func @classifier_kernel(%arg0: i32, %arg1: memref<2x1024xf32, #tpu.memory_space<vmem>>, %arg2: memref<1024x512xbf16, #tpu.memory_space<vmem>>, %arg3: memref<1x512xf32, #tpu.memory_space<vmem>>, %arg4: memref<512x256xbf16, #tpu.memory_space<vmem>>, %arg5: memref<1x256xf32, #tpu.memory_space<vmem>>, %arg6: memref<256x10xbf16, #tpu.memory_space<vmem>>, %arg7: memref<1x10xf32, #tpu.memory_space<vmem>>, %arg8: memref<2x10xf32, #tpu.memory_space<vmem>>) attributes {dimension_semantics = [#tpu.dimension_semantics<arbitrary>], iteration_bounds = array<i64: 1>, scalar_prefetch = 0 : i64, scratch_operands = 0 : i64, tpu.core_type = #tpu.core_type<tc>, window_params = [{pipeline_mode = #tpu.pipeline_mode<synchronous>, transform_indices = @transform_0, window_bounds = array<i64: 2, 1024>}, {pipeline_mode = #tpu.pipeline_mode<synchronous>, transform_indices = @transform_1, window_bounds = array<i64: 1024, 512>}, {pipeline_mode = #tpu.pipeline_mode<synchronous>, transform_indices = @transform_2, window_bounds = array<i64: 1, 512>}, {pipeline_mode = #tpu.pipeline_mode<synchronous>, transform_indices = @transform_3, window_bounds = array<i64: 512, 256>}, {pipeline_mode = #tpu.pipeline_mode<synchronous>, transform_indices = @transform_4, window_bounds = array<i64: 1, 256>}, {pipeline_mode = #tpu.pipeline_mode<synchronous>, transform_indices = @transform_5, window_bounds = array<i64: 256, 10>}, {pipeline_mode = #tpu.pipeline_mode<synchronous>, transform_indices = @transform_6, window_bounds = array<i64: 1, 10>}, {pipeline_mode = #tpu.pipeline_mode<synchronous>, transform_indices = @transform_7, window_bounds = array<i64: 2, 10>}]} {
    %c0 = arith.constant 0 : index
    %c0_0 = arith.constant 0 : index
    %0 = vector.load %arg1[%c0, %c0_0] : memref<2x1024xf32, #tpu.memory_space<vmem>>, vector<2x1024xf32>
    %1 = arith.truncf %0 : vector<2x1024xf32> to vector<2x1024xbf16>
    %c0_1 = arith.constant 0 : index
    %c0_2 = arith.constant 0 : index
    %2 = vector.load %arg2[%c0_1, %c0_2] : memref<1024x512xbf16, #tpu.memory_space<vmem>>, vector<1024x512xbf16>
    %cst = arith.constant dense<0.000000e+00> : vector<2x512xf32>
    %3 = tpu.matmul %1, %2, %cst {dimension_numbers = #tpu.dot_dimension_numbers<[1], [0], [0], [1], [0, 0, 1, 1], [], []>} : vector<2x1024xbf16>, vector<1024x512xbf16>, vector<2x512xf32> -> vector<2x512xf32>
    %c0_3 = arith.constant 0 : index
    %c0_4 = arith.constant 0 : index
    %4 = vector.load %arg3[%c0_3, %c0_4] : memref<1x512xf32, #tpu.memory_space<vmem>>, vector<1x512xf32>
    %5 = vector.broadcast %4 : vector<1x512xf32> to vector<2x512xf32>
    %6 = arith.addf %3, %5 : vector<2x512xf32>
    %cst_5 = arith.constant 0.000000e+00 : f32
    %7 = vector.broadcast %cst_5 : f32 to vector<2x512xf32>
    %8 = arith.maximumf %6, %7 : vector<2x512xf32>
    %9 = arith.truncf %8 : vector<2x512xf32> to vector<2x512xbf16>
    %c0_6 = arith.constant 0 : index
    %c0_7 = arith.constant 0 : index
    %10 = vector.load %arg4[%c0_6, %c0_7] : memref<512x256xbf16, #tpu.memory_space<vmem>>, vector<512x256xbf16>
    %cst_8 = arith.constant dense<0.000000e+00> : vector<2x256xf32>
    %11 = tpu.matmul %9, %10, %cst_8 {dimension_numbers = #tpu.dot_dimension_numbers<[1], [0], [0], [1], [0, 0, 1, 1], [], []>} : vector<2x512xbf16>, vector<512x256xbf16>, vector<2x256xf32> -> vector<2x256xf32>
    %c0_9 = arith.constant 0 : index
    %c0_10 = arith.constant 0 : index
    %12 = vector.load %arg5[%c0_9, %c0_10] : memref<1x256xf32, #tpu.memory_space<vmem>>, vector<1x256xf32>
    %13 = vector.broadcast %12 : vector<1x256xf32> to vector<2x256xf32>
    %14 = arith.addf %11, %13 : vector<2x256xf32>
    %cst_11 = arith.constant 0.000000e+00 : f32
    %15 = vector.broadcast %cst_11 : f32 to vector<2x256xf32>
    %16 = arith.maximumf %14, %15 : vector<2x256xf32>
    %17 = arith.truncf %16 : vector<2x256xf32> to vector<2x256xbf16>
    %c0_12 = arith.constant 0 : index
    %c0_13 = arith.constant 0 : index
    %18 = vector.load %arg6[%c0_12, %c0_13] : memref<256x10xbf16, #tpu.memory_space<vmem>>, vector<256x10xbf16>
    %cst_14 = arith.constant dense<0.000000e+00> : vector<2x10xf32>
    %19 = tpu.matmul %17, %18, %cst_14 {dimension_numbers = #tpu.dot_dimension_numbers<[1], [0], [0], [1], [0, 0, 1, 1], [], []>} : vector<2x256xbf16>, vector<256x10xbf16>, vector<2x10xf32> -> vector<2x10xf32>
    %c0_15 = arith.constant 0 : index
    %c0_16 = arith.constant 0 : index
    %20 = vector.load %arg7[%c0_15, %c0_16] : memref<1x10xf32, #tpu.memory_space<vmem>>, vector<1x10xf32>
    %21 = vector.broadcast %20 : vector<1x10xf32> to vector<2x10xf32>
    %22 = arith.addf %19, %21 : vector<2x10xf32>
    %c0_17 = arith.constant 0 : index
    %c0_18 = arith.constant 0 : index
    %23 = vector.load %arg8[%c0_17, %c0_18] : memref<2x10xf32, #tpu.memory_space<vmem>>, vector<2x10xf32>
    tpu.vector_store %arg8[%c0_17, %c0_18], %22 {strides = array<i32>} : memref<2x10xf32, #tpu.memory_space<vmem>>, vector<2x10xf32>,
    return
  }
  func.func @transform_0(%arg0: i32) -> (i32, i32) {
    %c0_i32 = arith.constant 0 : i32
    %c0_i32_0 = arith.constant 0 : i32
    %c0_i32_1 = arith.constant 0 : i32
    return %c0_i32, %c0_i32_0 : i32, i32
  }
  func.func @transform_1(%arg0: i32) -> (i32, i32) {
    %c0_i32 = arith.constant 0 : i32
    %c0_i32_0 = arith.constant 0 : i32
    %c0_i32_1 = arith.constant 0 : i32
    return %c0_i32, %c0_i32_0 : i32, i32
  }
  func.func @transform_2(%arg0: i32) -> (i32, i32) {
    %c0_i32 = arith.constant 0 : i32
    %c0_i32_0 = arith.constant 0 : i32
    %c0_i32_1 = arith.constant 0 : i32
    return %c0_i32, %c0_i32_0 : i32, i32
  }
  func.func @transform_3(%arg0: i32) -> (i32, i32) {
    %c0_i32 = arith.constant 0 : i32
    %c0_i32_0 = arith.constant 0 : i32
    %c0_i32_1 = arith.constant 0 : i32
    return %c0_i32, %c0_i32_0 : i32, i32
  }
  func.func @transform_4(%arg0: i32) -> (i32, i32) {
    %c0_i32 = arith.constant 0 : i32
    %c0_i32_0 = arith.constant 0 : i32
    %c0_i32_1 = arith.constant 0 : i32
    return %c0_i32, %c0_i32_0 : i32, i32
  }
  func.func @transform_5(%arg0: i32) -> (i32, i32) {
    %c0_i32 = arith.constant 0 : i32
    %c0_i32_0 = arith.constant 0 : i32
    %c0_i32_1 = arith.constant 0 : i32
    return %c0_i32, %c0_i32_0 : i32, i32
  }
  func.func @transform_6(%arg0: i32) -> (i32, i32) {
    %c0_i32 = arith.constant 0 : i32
    %c0_i32_0 = arith.constant 0 : i32
    %c0_i32_1 = arith.constant 0 : i32
    return %c0_i32, %c0_i32_0 : i32, i32
  }
  func.func @transform_7(%arg0: i32) -> (i32, i32) {
    %c0_i32 = arith.constant 0 : i32
    %c0_i32_0 = arith.constant 0 : i32
    %c0_i32_1 = arith.constant 0 : i32
    return %c0_i32, %c0_i32_0 : i32, i32
  }
}

</mosaic_0001>

<bundles_post_ra>
// kernel: pointnet_forward.3
= control target key start
LH: loop header
LB: loop body
LE: loop exit
PB: predicated region body
PF: predicated region fallthrough
CT: control target
= control target key end

     0   :  { %12 = vsyncpa [#allocation3], 0  ;;  %s4003_s0 = inlined_call_operand.vmem [shape: f32[2,1024], index: 0, kind: input, shape index: {}]   ;;  %s4004_s1 = inlined_call_operand.hbm [shape: bf16[1024,512], index: 1, kind: input, shape index: {}]   ;;  %s4005_s2 = inlined_call_operand.hbm [shape: f32[1,512], index: 2, kind: input, shape index: {}]   ;;  %s4006_s3 = inlined_call_operand.hbm [shape: bf16[512,256], index: 3, kind: input, shape index: {}]   ;;  %s4007_s4 = inlined_call_operand.hbm [shape: f32[1,256], index: 4, kind: input, shape index: {}]   ;;  %s4008_s5 = inlined_call_operand.vmem [shape: bf16[256,10], index: 5, kind: input, shape index: {}]   ;;  %s4009_s6 = inlined_call_operand.hbm [shape: f32[1,10], index: 6, kind: input, shape index: {}]   ;;  %s4010_s7 = inlined_call_operand.hbm [shape: f32[2,10], index: 7, kind: output, shape index: {}]  }
   0x1   :  { %13 = vsyncpa [#allocation6], 0 }
   0x2   :  { %14 = vsyncpa [#allocation9], 0 }
   0x3   :  { %15 = vsyncpa [#allocation4], 0  ;;  %s3754_s24 = smov [#allocation5]   ;;  %s3755_s26 = smov [#allocation8]  }
   0x4   :  { %s36_s25 = sshll.u32 %s3754_s24, 4  ;;  %s58_s27 = sshll.u32 %s3755_s26, 4  ;;  %s37_s25 = int_to_ptr.vmem [resolvable:$true] %s36_s25  ;;  %s59_s27 = int_to_ptr.vmem [resolvable:$true] %s58_s27 }
   0x5   :  { %s3614_s30 = scalar_lea.hbm %s4005_s2, 64 }
   0x6   :  { %p3615_p0 = scmp.ne.s32.totalorder %s4005_s2, %s3614_s30  ;;  %p3618_p1 = scmp.lt.u32.totalorder %s3614_s30, %s4005_s2 }
   0x8   :  { %p3620_p2 = pnand %p3618_p1, %p3615_p0 }
   0xa   :  { %3623 = shalt.err (!%p3620_p2)
}
   0xb   :  { %s3624_s12 = scalar_lea.vmem %s37_s25, 64  ;;  %p3629_p4 = scmp.lt.s32.totalorder %s37_s25, %s37_s25 }
   0xc   :  { %p3625_p3 = scmp.ne.s32.totalorder %s37_s25, %s3624_s12  ;;  %p3630_p5 = scmp.lt.s32.totalorder %s3624_s12, %s3624_s12 }
   0xe   :  { %p3631_p6 = por %p3630_p5, %p3629_p4 }
  0x10   :  { %p3632_p7 = pnand %p3631_p6, %p3625_p3 }
  0x12   :  { %3635 = shalt.err (!%p3632_p7)
}
  0x13   :  { %39 = dma.hbm_to_vmem [thread:$0]  %s4005_s2, 64, %s37_s25, [#allocation6]  }
  0x14   :  { %s3636_s17 = scalar_lea.hbm %s4007_s4, 32 }
  0x15   :  { %p3637_p8 = scmp.ne.s32.totalorder %s4007_s4, %s3636_s17  ;;  %p3640_p9 = scmp.lt.u32.totalorder %s3636_s17, %s4007_s4 }
  0x17   :  { %p3642_p10 = pnand %p3640_p9, %p3637_p8 }
  0x19   :  { %3645 = shalt.err (!%p3642_p10)
}
  0x1a   :  { %s3646_s22 = scalar_lea.vmem %s59_s27, 32  ;;  %p3651_p12 = scmp.lt.s32.totalorder %s59_s27, %s59_s27 }
  0x1b   :  { %p3647_p11 = scmp.ne.s32.totalorder %s59_s27, %s3646_s22  ;;  %p3652_p13 = scmp.lt.s32.totalorder %s3646_s22, %s3646_s22 }
  0x1d   :  { %p3653_p0 = por %p3652_p13, %p3651_p12 }
  0x1f   :  { %p3654_p1 = pnand %p3653_p0, %p3647_p11 }
  0x21   :  { %3657 = shalt.err (!%p3654_p1)
}
  0x22   :  { %61 = dma.hbm_to_vmem [thread:$0]  %s4007_s4, 32, %s59_s27, [#allocation9]  }
  0x23   :  { %s3756_s24 = smov [#allocation2]   ;;  %s3658_s29 = scalar_lea.hbm %s4004_s1, 32768 }
  0x24   :  { %s23_s25 = sshll.u32 %s3756_s24, 4  ;;  %p3659_p2 = scmp.ne.s32.totalorder %s4004_s1, %s3658_s29  ;;  %s24_s25 = int_to_ptr.vmem [resolvable:$true] %s23_s25 }
  0x25   :  { %p3662_p3 = scmp.lt.u32.totalorder %s3658_s29, %s4004_s1 }
  0x27   :  { %p3664_p4 = pnand %p3662_p3, %p3659_p2 }
  0x29   :  { %3667 = shalt.err (!%p3664_p4)
}
  0x2a   :  { %s3668_s11 = scalar_lea.vmem %s24_s25, 32768  ;;  %p3673_p6 = scmp.lt.s32.totalorder %s24_s25, %s24_s25 }
  0x2b   :  { %p3669_p5 = scmp.ne.s32.totalorder %s24_s25, %s3668_s11  ;;  %p3674_p7 = scmp.lt.s32.totalorder %s3668_s11, %s3668_s11 }
  0x2d   :  { %p3675_p8 = por %p3674_p7, %p3673_p6 }
  0x2f   :  { %p3676_p9 = pnand %p3675_p8, %p3669_p5 }
  0x31   :  { %3679 = shalt.err (!%p3676_p9)
}
  0x32   :  { %s3757_s4 = smov 256   ;;  %s3758_s27 = smov 16  }
  0x33   :  { %29 = dma.hbm_to_vmem [thread:$0]  %s4004_s1, 32768, %s24_s25, [#allocation3], %s3757_s4, %s3757_s4, %s3758_s27  }
  0x34   :  { %s3759_s14 = smov [#allocation7]   ;;  %s3680_s18 = scalar_lea.hbm %s4006_s3, 8192 }
  0x35   :  { %s45_s15 = sshll.u32 %s3759_s14, 4  ;;  %p3681_p10 = scmp.ne.s32.totalorder %s4006_s3, %s3680_s18  ;;  %s46_s15 = int_to_ptr.vmem [resolvable:$true] %s45_s15 }
  0x36   :  { %p3684_p11 = scmp.lt.u32.totalorder %s3680_s18, %s4006_s3 }
  0x38   :  { %p3686_p12 = pnand %p3684_p11, %p3681_p10 }
  0x3a   :  { %3689 = shalt.err (!%p3686_p12)
}
  0x3b   :  { %s3690_s2 = scalar_lea.vmem %s46_s15, 8192  ;;  %p3695_p0 = scmp.lt.s32.totalorder %s46_s15, %s46_s15 }
  0x3c   :  { %p3691_p13 = scmp.ne.s32.totalorder %s46_s15, %s3690_s2  ;;  %p3696_p1 = scmp.lt.s32.totalorder %s3690_s2, %s3690_s2 }
  0x3e   :  { %p3697_p2 = por %p3696_p1, %p3695_p0 }
  0x40   :  { %p3698_p3 = pnand %p3697_p2, %p3691_p13 }
  0x42   :  { %3701 = shalt.err (!%p3698_p3)
}
  0x43   :  { %s3760_s1 = smov 128   ;;  %s3761_s23 = smov 8  }
  0x44   :  { %51 = dma.hbm_to_vmem [thread:$0]  %s4006_s3, 8192, %s46_s15, [#allocation6], %s3760_s1, %s3760_s1, %s3761_s23  }
  0x45   :  { %s3762_s26 = smov [#allocation10]   ;;  %s3702_s8 = scalar_lea.hbm %s4009_s6, 16 }
  0x46   :  { %s70_s28 = sshll.u32 %s3762_s26, 4  ;;  %p3703_p4 = scmp.ne.s32.totalorder %s4009_s6, %s3702_s8  ;;  %s71_s28 = int_to_ptr.vmem [resolvable:$true] %s70_s28 }
  0x47   :  { %p3706_p5 = scmp.lt.u32.totalorder %s3702_s8, %s4009_s6 }
  0x49   :  { %p3708_p6 = pnand %p3706_p5, %p3703_p4 }
  0x4b   :  { %3711 = shalt.err (!%p3708_p6)
}
  0x4c   :  { %s3712_s27 = scalar_lea.vmem %s71_s28, 16  ;;  %s3716_s3 = scalar_lea.vmem %s71_s28, 32 }
  0x4d   :  { %p3713_p7 = scmp.ne.s32.totalorder %s71_s28, %s3712_s27  ;;  %p3717_p8 = scmp.lt.s32.totalorder %s71_s28, %s71_s28 }
  0x4e   :  { %p3718_p9 = scmp.lt.s32.totalorder %s3716_s3, %s3712_s27 }
  0x50   :  { %p3719_p10 = por %p3718_p9, %p3717_p8 }
  0x52   :  { %p3720_p11 = pnand %p3719_p10, %p3713_p7 }
  0x54   :  { %3723 = shalt.err (!%p3720_p11)
}
  0x55   :  { %73 = dma.hbm_to_vmem [thread:$0]  %s4009_s6, 16, %s71_s28, [#allocation9]  }
  0x56   :  { %3746 = dma.done.wait [#allocation3], 32768  }
  0x57   :  { %3747 = vsyncadd [#allocation3], 4294934528 }
  0x58   :  { %3748 = dma.done.wait [#allocation6], 8256  }
  0x59   :  { %3749 = vsyncadd [#allocation6], 4294959040 }
  0x5a   :  { %3750 = dma.done.wait [#allocation9], 48  }
  0x5b   :  { %3751 = vsyncadd [#allocation9], 4294967248  ;;  %v3116_v0 = vld [vmem:[#allocation2 + $0x4] ss:$16 sps:$4 sm:$0xff]   ;;  %v3120_v2 = vld [vmem:[#allocation2] ss:$16 sps:$4 sm:$0xff]   ;;  %v98_v38 = vlaneseq }
  0x5c   :  { %v3118_v1 = vld [vmem:[#allocation2 + $0x204] ss:$16 sps:$4 sm:$0xff]   ;;  %1702 = vmatprep.subr.bf16.mxu1 %v3116_v0  ;;  %v3121_v3 = vld [vmem:[#allocation2 + $0x200] ss:$16 sps:$4 sm:$0xff]   ;;  %v3763_v36 = vmov 1983009808  }
  0x5d   :  { %1743 = vmatprep.subr.bf16.mxu0 %v3118_v1  ;;  %v3122_v4 = vld [vmem:[#allocation2 + $0x24] ss:$16 sps:$4 sm:$0xff]   ;;  %1703 = vmatpush1.bf16.msra.mxu1 %v3120_v2  ;;  %v3126_v6 = vld [vmem:[#allocation2 + $0x20] ss:$16 sps:$4 sm:$0xff]   ;;  %v96_v37 = vunpack.c.l.s4 %v3763_v36  ;;  %v3865_v43 = vshrl.u32 %v98_v38, 7  ;;  %vm2695_vm0 = vcmask 74752  }
  0x5e   :  { %1744 = vmatpush1.bf16.msra.mxu0 %v3121_v3  ;;  %v3124_v5 = vld [vmem:[#allocation2 + $0x224] ss:$16 sps:$4 sm:$0xff]   ;;  %1704 = vmatprep.subr.bf16.mxu1 %v3122_v4  ;;  %v3127_v7 = vld [vmem:[#allocation2 + $0x220] ss:$16 sps:$4 sm:$0xff]  }
  0x5f   :  { %1745 = vmatprep.subr.bf16.mxu0 %v3124_v5  ;;  %v3128_v8 = vld [vmem:[#allocation2 + $0x44] ss:$16 sps:$4 sm:$0xff]   ;;  %v3132_v10 = vld [vmem:[#allocation2 + $0x40] ss:$16 sps:$4 sm:$0xff]   ;;  %v97_v42 = vunpack.c.0.s8 %v96_v37  ;;  %v3248_v37 = vld [vmem:[#allocation2 + $0xac] ss:$16 sps:$4 sm:$0xff]  }
  0x60   :  { %v3130_v9 = vld [vmem:[#allocation2 + $0x244] ss:$16 sps:$4 sm:$0xff]   ;;  %v3133_v11 = vld [vmem:[#allocation2 + $0x240] ss:$16 sps:$4 sm:$0xff]  }
  0x61   :  { %1705 = vmatpush1.bf16.msra.mxu1 %v3126_v6  ;;  %v3134_v12 = vld [vmem:[#allocation2 + $0x64] ss:$16 sps:$4 sm:$0xff]   ;;  %v3138_v14 = vld [vmem:[#allocation2 + $0x60] ss:$16 sps:$4 sm:$0xff]   ;;  %v3868_v49 = vsub.s32 %v97_v42, %v3865_v43  ;;  %v3887_v42 = vld [vmem:[%s4003_s0 + $0x8] sm:$0xff] }
  0x62   :  { %1746 = vmatpush1.bf16.msra.mxu0 %v3127_v7  ;;  %1706 = vmatprep.subr.bf16.mxu1 %v3128_v8  ;;  %v3136_v13 = vld [vmem:[#allocation2 + $0x264] ss:$16 sps:$4 sm:$0xff]   ;;  %v3139_v15 = vld [vmem:[#allocation2 + $0x260] ss:$16 sps:$4 sm:$0xff]  }
  0x63   :  { %1747 = vmatprep.subr.bf16.mxu0 %v3130_v9  ;;  %v3140_v16 = vld [vmem:[#allocation2 + $0x84] ss:$16 sps:$4 sm:$0xff]   ;;  %v3144_v18 = vld [vmem:[#allocation2 + $0x80] ss:$16 sps:$4 sm:$0xff]  }
  0x64   :  { %v3142_v17 = vld [vmem:[#allocation2 + $0x284] ss:$16 sps:$4 sm:$0xff]   ;;  %v3145_v19 = vld [vmem:[#allocation2 + $0x280] ss:$16 sps:$4 sm:$0xff]  }
  0x65   :  { %1707 = vmatpush1.bf16.msra.mxu1 %v3132_v10  ;;  %v3146_v20 = vld [vmem:[#allocation2 + $0xa4] ss:$16 sps:$4 sm:$0xff]   ;;  %v3150_v22 = vld [vmem:[#allocation2 + $0xa0] ss:$16 sps:$4 sm:$0xff]  }
  0x66   :  { %1748 = vmatpush1.bf16.msra.mxu0 %v3133_v11  ;;  %1708 = vmatprep.subr.bf16.mxu1 %v3134_v12  ;;  %v3148_v21 = vld [vmem:[#allocation2 + $0x2a4] ss:$16 sps:$4 sm:$0xff]   ;;  %v3151_v23 = vld [vmem:[#allocation2 + $0x2a0] ss:$16 sps:$4 sm:$0xff]  }
  0x67   :  { %1749 = vmatprep.subr.bf16.mxu0 %v3136_v13  ;;  %v3152_v24 = vld [vmem:[#allocation2 + $0xc4] ss:$16 sps:$4 sm:$0xff]   ;;  %v3156_v26 = vld [vmem:[#allocation2 + $0xc0] ss:$16 sps:$4 sm:$0xff]  }
  0x68   :  { %v3154_v25 = vld [vmem:[#allocation2 + $0x2c4] ss:$16 sps:$4 sm:$0xff]   ;;  %v3157_v27 = vld [vmem:[#allocation2 + $0x2c0] ss:$16 sps:$4 sm:$0xff]  }
  0x69   :  { %1709 = vmatpush1.bf16.msra.mxu1 %v3138_v14  ;;  %v3158_v28 = vld [vmem:[#allocation2 + $0xe4] ss:$16 sps:$4 sm:$0xff]   ;;  %v3162_v30 = vld [vmem:[#allocation2 + $0xe0] ss:$16 sps:$4 sm:$0xff]  }
  0x6a   :  { %1750 = vmatpush1.bf16.msra.mxu0 %v3139_v15  ;;  %1710 = vmatprep.subr.bf16.mxu1 %v3140_v16  ;;  %v3160_v29 = vld [vmem:[#allocation2 + $0x2e4] ss:$16 sps:$4 sm:$0xff]   ;;  %v3163_v31 = vld [vmem:[#allocation2 + $0x2e0] ss:$16 sps:$4 sm:$0xff]   ;;  %v3218_v15 = vld [vmem:[#allocation2 + $0xc] ss:$16 sps:$4 sm:$0xff]  }
  0x6b   :  { %1751 = vmatprep.subr.bf16.mxu0 %v3142_v17  ;;  %v3164_v32 = vld [vmem:[#allocation2 + $0x104] ss:$16 sps:$4 sm:$0xff]   ;;  %v3168_v34 = vld [vmem:[#allocation2 + $0x100] ss:$16 sps:$4 sm:$0xff]  }
  0x6c   :  { %v3166_v33 = vld [vmem:[#allocation2 + $0x304] ss:$16 sps:$4 sm:$0xff]   ;;  %v3169_v35 = vld [vmem:[#allocation2 + $0x300] ss:$16 sps:$4 sm:$0xff]  }
  0x6d   :  { %1711 = vmatpush1.bf16.msra.mxu1 %v3144_v18  ;;  %v3170_v39 = vld [vmem:[#allocation2 + $0x124] ss:$16 sps:$4 sm:$0xff]   ;;  %v3174_v41 = vld [vmem:[#allocation2 + $0x120] ss:$16 sps:$4 sm:$0xff]  }
  0x6e   :  { %1752 = vmatpush1.bf16.msra.mxu0 %v3145_v19  ;;  %1712 = vmatprep.subr.bf16.mxu1 %v3146_v20  ;;  %v3172_v40 = vld [vmem:[#allocation2 + $0x324] ss:$16 sps:$4 sm:$0xff]   ;;  %v3175_v44 = vld [vmem:[#allocation2 + $0x320] ss:$16 sps:$4 sm:$0xff]   ;;  %v3216_v19 = vld [vmem:[#allocation2 + $0x8] ss:$16 sps:$4 sm:$0xff]  }
  0x6f   :  { %1753 = vmatprep.subr.bf16.mxu0 %v3148_v21  ;;  %v3176_v45 = vld [vmem:[#allocation2 + $0x144] ss:$16 sps:$4 sm:$0xff]   ;;  %v3180_v47 = vld [vmem:[#allocation2 + $0x140] ss:$16 sps:$4 sm:$0xff]   ;;  %v3224_v21 = vld [vmem:[#allocation2 + $0x2c] ss:$16 sps:$4 sm:$0xff]  }
  0x70   :  { %v3178_v46 = vld [vmem:[#allocation2 + $0x344] ss:$16 sps:$4 sm:$0xff]   ;;  %v3181_v48 = vld [vmem:[#allocation2 + $0x340] ss:$16 sps:$4 sm:$0xff]  }
  0x71   :  { %1713 = vmatpush1.bf16.msra.mxu1 %v3150_v22  ;;  %v3182_v50 = vld [vmem:[#allocation2 + $0x164] ss:$16 sps:$4 sm:$0xff]   ;;  %v3186_v53 = vld [vmem:[#allocation2 + $0x160] ss:$16 sps:$4 sm:$0xff]  }
  0x72   :  { %1754 = vmatpush1.bf16.msra.mxu0 %v3151_v23  ;;  %1714 = vmatprep.subr.bf16.mxu1 %v3152_v24  ;;  %v3184_v51 = vld [vmem:[#allocation2 + $0x364] ss:$16 sps:$4 sm:$0xff]   ;;  %v3187_v56 = vld [vmem:[#allocation2 + $0x360] ss:$16 sps:$4 sm:$0xff]   ;;  %v3222_v23 = vld [vmem:[#allocation2 + $0x28] ss:$16 sps:$4 sm:$0xff]  }
  0x73   :  { %1755 = vmatprep.subr.bf16.mxu0 %v3154_v25  ;;  %v90_v52 = vld [vmem:[%s4003_s0] sm:$0xff]  ;;  %v3230_v25 = vld [vmem:[#allocation2 + $0x4c] ss:$16 sps:$4 sm:$0xff]  }
  0x74   :  { %v101_v54 = vrot.slane %v90_v52, %v3868_v49  ;;  %v94_v55 = vcombine.high %v90_v52, %v90_v52  ;;  %v3188_v57 = vld [vmem:[#allocation2 + $0x184] ss:$16 sps:$4 sm:$0xff]   ;;  %v3192_v61 = vld [vmem:[#allocation2 + $0x180] ss:$16 sps:$4 sm:$0xff]  }
  0x75   :  { %1715 = vmatpush1.bf16.msra.mxu1 %v3156_v26  ;;  %v3190_v58 = vld [vmem:[#allocation2 + $0x384] ss:$16 sps:$4 sm:$0xff]   ;;  %v3193_v0 = vld [vmem:[#allocation2 + $0x380] ss:$16 sps:$4 sm:$0xff]  }
  0x76   :  { %1756 = vmatpush1.bf16.msra.mxu0 %v3157_v27  ;;  %1716 = vmatprep.subr.bf16.mxu1 %v3158_v28  ;;  %v109_v59 = vcombine.high %v101_v54, %v101_v54  ;;  %v108_v60 = vrot.slane %v94_v55, %v3868_v49  ;;  %v3194_v1 = vld [vmem:[#allocation2 + $0x1a4] ss:$16 sps:$4 sm:$0xff]   ;;  %v3198_v4 = vld [vmem:[#allocation2 + $0x1a0] ss:$16 sps:$4 sm:$0xff]   ;;  %v3878_v16 = vpack.c.bf16 %v101_v54, %v101_v54  ;;  %v3228_v27 = vld [vmem:[#allocation2 + $0x48] ss:$16 sps:$4 sm:$0xff]  }
  0x77   :  { %1757 = vmatprep.subr.bf16.mxu0 %v3160_v29  ;;  %v3196_v2 = vld [vmem:[#allocation2 + $0x3a4] ss:$16 sps:$4 sm:$0xff]   ;;  %v3199_v5 = vld [vmem:[#allocation2 + $0x3a0] ss:$16 sps:$4 sm:$0xff]   ;;  %v3236_v29 = vld [vmem:[#allocation2 + $0x6c] ss:$16 sps:$4 sm:$0xff]  }
  0x78   :  { %v137_v62 = vpack.c.bf16 %v109_v59, %v109_v59  ;;  %v110_v63 = vcombine.high %v108_v60, %v108_v60  ;;  %v3200_v6 = vld [vmem:[#allocation2 + $0x1c4] ss:$16 sps:$4 sm:$0xff]   ;;  %v3204_v8 = vld [vmem:[#allocation2 + $0x1c0] ss:$16 sps:$4 sm:$0xff]   ;;  %v3880_v18 = vpack.c.bf16 %v108_v60, %v108_v60  ;;  %v3266_v55 = vld [vmem:[#allocation2 + $0x10c] ss:$16 sps:$4 sm:$0xff]  }
  0x79   :  { %1717 = vmatpush1.bf16.msra.mxu1 %v3162_v30  ;;  %v3202_v7 = vld [vmem:[#allocation2 + $0x3c4] ss:$16 sps:$4 sm:$0xff]   ;;  %v3205_v9 = vld [vmem:[#allocation2 + $0x3c0] ss:$16 sps:$4 sm:$0xff]   ;;  %v3272_v59 = vld [vmem:[#allocation2 + $0x12c] ss:$16 sps:$4 sm:$0xff]  }
  0x7a   :  { %1758 = vmatpush1.bf16.msra.mxu0 %v3163_v31  ;;  %1718 = vmatprep.subr.bf16.mxu1 %v3164_v32  ;;  %v3875_v3 = vpack.c.bf16 %v110_v63, %v110_v63  ;;  %v3206_v10 = vld [vmem:[#allocation2 + $0x1e4] ss:$16 sps:$4 sm:$0xff]   ;;  %v3210_v12 = vld [vmem:[#allocation2 + $0x1e0] ss:$16 sps:$4 sm:$0xff]   ;;  %v3234_v31 = vld [vmem:[#allocation2 + $0x68] ss:$16 sps:$4 sm:$0xff]  }
  0x7b   :  { %1759 = vmatprep.subr.bf16.mxu0 %v3166_v33  ;;  %1734 = vmatprep.mubr.bf16.mxu1 %v137_v62  ;;  %v3208_v11 = vld [vmem:[#allocation2 + $0x3e4] ss:$16 sps:$4 sm:$0xff]   ;;  %v3211_v13 = vld [vmem:[#allocation2 + $0x3e0] ss:$16 sps:$4 sm:$0xff]   ;;  %v3242_v33 = vld [vmem:[#allocation2 + $0x8c] ss:$16 sps:$4 sm:$0xff]  }
  0x7c   :  { %1775 = vmatprep.mubr.bf16.mxu0 %v3875_v3  ;;  %v3215_v14 = vld [vmem:[#allocation2 + $0x404] ss:$16 sps:$4 sm:$0xff]   ;;  %v3213_v17 = vld [vmem:[#allocation2 + $0x400] ss:$16 sps:$4 sm:$0xff]   ;;  %v3278_v63 = vld [vmem:[#allocation2 + $0x14c] ss:$16 sps:$4 sm:$0xff]  }
  0x7d   :  { %1719 = vmatpush1.bf16.msra.mxu1 %v3168_v34  ;;  %v3221_v20 = vld [vmem:[#allocation2 + $0x424] ss:$16 sps:$4 sm:$0xff]   ;;  %v3219_v22 = vld [vmem:[#allocation2 + $0x420] ss:$16 sps:$4 sm:$0xff]  }
  0x7e   :  { %1760 = vmatpush1.bf16.msra.mxu0 %v3169_v35  ;;  %1720 = vmatprep.subr.bf16.mxu1 %v3170_v39  ;;  %v3227_v24 = vld [vmem:[#allocation2 + $0x444] ss:$16 sps:$4 sm:$0xff]   ;;  %v3225_v26 = vld [vmem:[#allocation2 + $0x440] ss:$16 sps:$4 sm:$0xff]   ;;  %v3240_v35 = vld [vmem:[#allocation2 + $0x88] ss:$16 sps:$4 sm:$0xff]  }
  0x7f   :  { %1761 = vmatprep.subr.bf16.mxu0 %v3172_v40  ;;  %v3233_v28 = vld [vmem:[#allocation2 + $0x464] ss:$16 sps:$4 sm:$0xff]   ;;  %v3231_v30 = vld [vmem:[#allocation2 + $0x460] ss:$16 sps:$4 sm:$0xff]   ;;  %v3246_v39 = vld [vmem:[#allocation2 + $0xa8] ss:$16 sps:$4 sm:$0xff]  }
  0x80   :  { %v3239_v32 = vld [vmem:[#allocation2 + $0x484] ss:$16 sps:$4 sm:$0xff]   ;;  %v3237_v34 = vld [vmem:[#allocation2 + $0x480] ss:$16 sps:$4 sm:$0xff]  }
  0x81   :  { %1721 = vmatpush1.bf16.msra.mxu1 %v3174_v41  ;;  %v3245_v36 = vld [vmem:[#allocation2 + $0x4a4] ss:$16 sps:$4 sm:$0xff]   ;;  %v3243_v38 = vld [vmem:[#allocation2 + $0x4a0] ss:$16 sps:$4 sm:$0xff]   ;;  %v3254_v41 = vld [vmem:[#allocation2 + $0xcc] ss:$16 sps:$4 sm:$0xff]  }
  0x82   :  { %1762 = vmatpush1.bf16.msra.mxu0 %v3175_v44  ;;  %1722 = vmatprep.subr.bf16.mxu1 %v3176_v45  ;;  %v3251_v40 = vld [vmem:[#allocation2 + $0x4c4] ss:$16 sps:$4 sm:$0xff]   ;;  %v3891_v44 = vrot.slane %v3887_v42, %v3868_v49  ;;  %v3249_v45 = vld [vmem:[#allocation2 + $0x4c0] ss:$16 sps:$4 sm:$0xff]  }
  0x83   :  { %1763 = vmatprep.subr.bf16.mxu0 %v3178_v46  ;;  %v3252_v46 = vld [vmem:[#allocation2 + $0xc8] ss:$16 sps:$4 sm:$0xff]   ;;  %v3255_v52 = vld [vmem:[#allocation2 + $0x4e0] ss:$16 sps:$4 sm:$0xff]   ;;  %v3263_v54 = vld [vmem:[#allocation2 + $0x504] ss:$16 sps:$4 sm:$0xff]  }
  0x84   :  { %v3267_v60 = vld [vmem:[#allocation2 + $0x520] ss:$16 sps:$4 sm:$0xff]  }
  0x85   :  { %1723 = vmatpush1.bf16.msra.mxu1 %v3180_v47  ;;  %v126_v47 = vcombine.high %v3891_v44, %v3891_v44 }
  0x86   :  { %1764 = vmatpush1.bf16.msra.mxu0 %v3181_v48  ;;  %1724 = vmatprep.subr.bf16.mxu1 %v3182_v50  ;;  %v3257_v48 = vld [vmem:[#allocation2 + $0x4e4] ss:$16 sps:$4 sm:$0xff]   ;;  %v3260_v50 = vld [vmem:[#allocation2 + $0xec] ss:$16 sps:$4 sm:$0xff]  }
  0x87   :  { %1765 = vmatprep.subr.bf16.mxu0 %v3184_v51  ;;  %v3895_v51 = vpack.c.bf16 %v126_v47, %v126_v47  ;;  %v3333_v47 = vld [vmem:[#allocation2 + $0x680] ss:$16 sps:$4 sm:$0xff]  }
  0x89   :  { %1725 = vmatpush1.bf16.msra.mxu1 %v3186_v53  ;;  %v3258_v53 = vld [vmem:[#allocation2 + $0xe8] ss:$16 sps:$4 sm:$0xff]  }
  0x8a   :  { %1766 = vmatpush1.bf16.msra.mxu0 %v3187_v56  ;;  %1726 = vmatprep.subr.bf16.mxu1 %v3188_v57  ;;  %v3261_v56 = vld [vmem:[#allocation2 + $0x500] ss:$16 sps:$4 sm:$0xff]   ;;  %v3264_v57 = vld [vmem:[#allocation2 + $0x108] ss:$16 sps:$4 sm:$0xff]  }
  0x8b   :  { %1767 = vmatprep.subr.bf16.mxu0 %v3190_v58  ;;  %v3269_v58 = vld [vmem:[#allocation2 + $0x524] ss:$16 sps:$4 sm:$0xff]  }
  0x8d   :  { %1727 = vmatpush1.bf16.msra.mxu1 %v3192_v61  ;;  %v3270_v61 = vld [vmem:[#allocation2 + $0x128] ss:$16 sps:$4 sm:$0xff]  }
  0x8e   :  { %1768 = vmatpush1.bf16.msra.mxu0 %v3193_v0  ;;  %1728 = vmatprep.subr.bf16.mxu1 %v3194_v1  ;;  %v3273_v0 = vld [vmem:[#allocation2 + $0x540] ss:$16 sps:$4 sm:$0xff]   ;;  %v3276_v1 = vld [vmem:[#allocation2 + $0x148] ss:$16 sps:$4 sm:$0xff]  }
  0x8f   :  { %1769 = vmatprep.subr.bf16.mxu0 %v3196_v2  ;;  %v3281_v2 = vld [vmem:[#allocation2 + $0x564] ss:$16 sps:$4 sm:$0xff]  }
  0x91   :  { %1729 = vmatpush1.bf16.msra.mxu1 %v3198_v4  ;;  %v3284_v4 = vld [vmem:[#allocation2 + $0x16c] ss:$16 sps:$4 sm:$0xff]  }
  0x92   :  { %1770 = vmatpush1.bf16.msra.mxu0 %v3199_v5  ;;  %1730 = vmatprep.subr.bf16.mxu1 %v3200_v6  ;;  %v3279_v5 = vld [vmem:[#allocation2 + $0x560] ss:$16 sps:$4 sm:$0xff]   ;;  %v3282_v6 = vld [vmem:[#allocation2 + $0x168] ss:$16 sps:$4 sm:$0xff]  }
  0x93   :  { %1771 = vmatprep.subr.bf16.mxu0 %v3202_v7  ;;  %v3287_v7 = vld [vmem:[#allocation2 + $0x584] ss:$16 sps:$4 sm:$0xff]  }
  0x95   :  { %1731 = vmatpush1.bf16.msra.mxu1 %v3204_v8  ;;  %v3290_v8 = vld [vmem:[#allocation2 + $0x18c] ss:$16 sps:$4 sm:$0xff]  }
  0x96   :  { %1772 = vmatpush1.bf16.msra.mxu0 %v3205_v9  ;;  %1732 = vmatprep.subr.bf16.mxu1 %v3206_v10  ;;  %v3285_v9 = vld [vmem:[#allocation2 + $0x580] ss:$16 sps:$4 sm:$0xff]   ;;  %v3288_v10 = vld [vmem:[#allocation2 + $0x188] ss:$16 sps:$4 sm:$0xff]  }
  0x97   :  { %1773 = vmatprep.subr.bf16.mxu0 %v3208_v11  ;;  %v3293_v11 = vld [vmem:[#allocation2 + $0x5a4] ss:$16 sps:$4 sm:$0xff]  }
  0x99   :  { %1733 = vmatpush1.bf16.msra.mxu1 %v3210_v12  ;;  %v3296_v12 = vld [vmem:[#allocation2 + $0x1ac] ss:$16 sps:$4 sm:$0xff]  }
  0x9a   :  { %1774 = vmatpush1.bf16.msra.mxu0 %v3211_v13  ;;  %1866 = vmatprep.subr.bf16.mxu1 %v3218_v15  ;;  %v3291_v13 = vld [vmem:[#allocation2 + $0x5a0] ss:$16 sps:$4 sm:$0xff]   ;;  %v3299_v15 = vld [vmem:[#allocation2 + $0x5c4] ss:$16 sps:$4 sm:$0xff]  }
  0x9b   :  { %1784 = vmatprep.subr.bf16.mxu0 %v3215_v14  ;;  %v3294_v14 = vld [vmem:[#allocation2 + $0x1a8] ss:$16 sps:$4 sm:$0xff]  }
  0x9c   :  { %1735 = vmatmul.mubr.bf16.vlgmr.msra.gmra.mrb[0].mxu1 %v3878_v16 }
  0x9d   :  { %1776 = vmatmul.mubr.bf16.vlgmr.msra.gmra.mrb[0].mxu0 %v3880_v18  ;;  %1867 = vmatpush1.bf16.msra.mxu1 %v3216_v19  ;;  %v111_v19 = vcombine.high %v3887_v42, %v3887_v42  ;;  %v3327_v42 = vld [vmem:[#allocation2 + $0x660] ss:$16 sps:$4 sm:$0xff]  }
  0x9e   :  { %1785 = vmatpush1.bf16.msra.mxu0 %v3213_v17  ;;  %1868 = vmatprep.subr.bf16.mxu1 %v3224_v21  ;;  %v3302_v17 = vld [vmem:[#allocation2 + $0x1cc] ss:$16 sps:$4 sm:$0xff]   ;;  %v3300_v21 = vld [vmem:[#allocation2 + $0x1c8] ss:$16 sps:$4 sm:$0xff]  }
  0x9f   :  { %1786 = vmatprep.subr.bf16.mxu0 %v3221_v20  ;;  %1898 = vmatprep.mubr.bf16.mxu1 %v137_v62  ;;  %v3275_v62 = vld [vmem:[#allocation2 + $0x544] ss:$16 sps:$4 sm:$0xff]   ;;  %v3297_v20 = vld [vmem:[#allocation2 + $0x5c0] ss:$16 sps:$4 sm:$0xff]  }
  0xa0   :  { %1816 = vmatprep.mubr.bf16.mxu0 %v3895_v51 }
  0xa1   :  { %1869 = vmatpush1.bf16.msra.mxu1 %v3222_v23  ;;  %v3308_v23 = vld [vmem:[#allocation2 + $0x1ec] ss:$16 sps:$4 sm:$0xff]  }
  0xa2   :  { %1787 = vmatpush1.bf16.msra.mxu0 %v3219_v22  ;;  %1870 = vmatprep.subr.bf16.mxu1 %v3230_v25  ;;  %v3305_v22 = vld [vmem:[#allocation2 + $0x5e4] ss:$16 sps:$4 sm:$0xff]   ;;  %v3303_v25 = vld [vmem:[#allocation2 + $0x5e0] ss:$16 sps:$4 sm:$0xff]  }
  0xa3   :  { %1788 = vmatprep.subr.bf16.mxu0 %v3227_v24  ;;  %v3901_v24 = vrot.slane %v111_v19, %v3868_v49  ;;  %v3312_v49 = vld [vmem:[#allocation2 + $0x208] ss:$16 sps:$4 sm:$0xff]   ;;  %v3381_v19 = vld [vmem:[#allocation2 + $0x780] ss:$16 sps:$4 sm:$0xff]  }
  0xa5   :  { %1871 = vmatpush1.bf16.msra.mxu1 %v3228_v27  ;;  %v3311_v27 = vld [vmem:[#allocation2 + $0x604] ss:$16 sps:$4 sm:$0xff]  }
  0xa6   :  { %1789 = vmatpush1.bf16.msra.mxu0 %v3225_v26  ;;  %1872 = vmatprep.subr.bf16.mxu1 %v3236_v29  ;;  %v3306_v26 = vld [vmem:[#allocation2 + $0x1e8] ss:$16 sps:$4 sm:$0xff]   ;;  %v127_v29 = vcombine.high %v3901_v24, %v3901_v24 }
  0xa7   :  { %1790 = vmatprep.subr.bf16.mxu0 %v3233_v28  ;;  %v3314_v28 = vld [vmem:[#allocation2 + $0x20c] ss:$16 sps:$4 sm:$0xff]  }
  0xa9   :  { %1873 = vmatpush1.bf16.msra.mxu1 %v3234_v31  ;;  %v3309_v31 = vld [vmem:[#allocation2 + $0x600] ss:$16 sps:$4 sm:$0xff]  }
  0xaa   :  { %1791 = vmatpush1.bf16.msra.mxu0 %v3231_v30  ;;  %1874 = vmatprep.subr.bf16.mxu1 %v3242_v33  ;;  %v3907_v30 = vpack.c.bf16 %v3891_v44, %v3891_v44  ;;  %v3320_v33 = vld [vmem:[#allocation2 + $0x22c] ss:$16 sps:$4 sm:$0xff]   ;;  %v3330_v44 = vld [vmem:[#allocation2 + $0x268] ss:$16 sps:$4 sm:$0xff]  }
  0xab   :  { %1792 = vmatprep.subr.bf16.mxu0 %v3239_v32  ;;  %v3317_v32 = vld [vmem:[#allocation2 + $0x624] ss:$16 sps:$4 sm:$0xff]  }
  0xad   :  { %1875 = vmatpush1.bf16.msra.mxu1 %v3240_v35  ;;  %v3315_v35 = vld [vmem:[#allocation2 + $0x620] ss:$16 sps:$4 sm:$0xff]  }
  0xae   :  { %1793 = vmatpush1.bf16.msra.mxu0 %v3237_v34  ;;  %1876 = vmatprep.subr.bf16.mxu1 %v3248_v37  ;;  %v3909_v34 = vpack.c.bf16 %v127_v29, %v127_v29  ;;  %v3323_v37 = vld [vmem:[#allocation2 + $0x644] ss:$16 sps:$4 sm:$0xff]   ;;  %v3396_v29 = vld [vmem:[#allocation2 + $0x3c8] ss:$16 sps:$4 sm:$0xff]  }
  0xaf   :  { %1794 = vmatprep.subr.bf16.mxu0 %v3245_v36  ;;  %v3318_v36 = vld [vmem:[#allocation2 + $0x228] ss:$16 sps:$4 sm:$0xff]  }
  0xb1   :  { %1877 = vmatpush1.bf16.msra.mxu1 %v3246_v39  ;;  %v3321_v39 = vld [vmem:[#allocation2 + $0x640] ss:$16 sps:$4 sm:$0xff]  }
  0xb2   :  { %1795 = vmatpush1.bf16.msra.mxu0 %v3243_v38  ;;  %1878 = vmatprep.subr.bf16.mxu1 %v3254_v41  ;;  %v3326_v38 = vld [vmem:[#allocation2 + $0x24c] ss:$16 sps:$4 sm:$0xff]   ;;  %v3329_v41 = vld [vmem:[#allocation2 + $0x664] ss:$16 sps:$4 sm:$0xff]  }
  0xb3   :  { %1796 = vmatprep.subr.bf16.mxu0 %v3251_v40  ;;  %v3324_v40 = vld [vmem:[#allocation2 + $0x248] ss:$16 sps:$4 sm:$0xff]  }
  0xb5   :  { %1879 = vmatpush1.bf16.msra.mxu1 %v3252_v46  ;;  %v3338_v46 = vld [vmem:[#allocation2 + $0x28c] ss:$16 sps:$4 sm:$0xff]  }
  0xb6   :  { %1797 = vmatpush1.bf16.msra.mxu0 %v3249_v45  ;;  %1880 = vmatprep.subr.bf16.mxu1 %v3260_v50  ;;  %v3335_v45 = vld [vmem:[#allocation2 + $0x684] ss:$16 sps:$4 sm:$0xff]   ;;  %v3344_v50 = vld [vmem:[#allocation2 + $0x2ac] ss:$16 sps:$4 sm:$0xff]  }
  0xb7   :  { %1798 = vmatprep.subr.bf16.mxu0 %v3257_v48  ;;  %v3341_v48 = vld [vmem:[#allocation2 + $0x6a4] ss:$16 sps:$4 sm:$0xff]  }
  0xb9   :  { %1881 = vmatpush1.bf16.msra.mxu1 %v3258_v53  ;;  %v3342_v53 = vld [vmem:[#allocation2 + $0x2a8] ss:$16 sps:$4 sm:$0xff]  }
  0xba   :  { %1799 = vmatpush1.bf16.msra.mxu0 %v3255_v52  ;;  %1882 = vmatprep.subr.bf16.mxu1 %v3266_v55  ;;  %v3339_v52 = vld [vmem:[#allocation2 + $0x6a0] ss:$16 sps:$4 sm:$0xff]   ;;  %v3350_v55 = vld [vmem:[#allocation2 + $0x2cc] ss:$16 sps:$4 sm:$0xff]  }
  0xbb   :  { %1800 = vmatprep.subr.bf16.mxu0 %v3263_v54  ;;  %v3347_v54 = vld [vmem:[#allocation2 + $0x6c4] ss:$16 sps:$4 sm:$0xff]  }
  0xbd   :  { %1883 = vmatpush1.bf16.msra.mxu1 %v3264_v57  ;;  %v3348_v57 = vld [vmem:[#allocation2 + $0x2c8] ss:$16 sps:$4 sm:$0xff]  }
  0xbe   :  { %1801 = vmatpush1.bf16.msra.mxu0 %v3261_v56  ;;  %1884 = vmatprep.subr.bf16.mxu1 %v3272_v59  ;;  %v3345_v56 = vld [vmem:[#allocation2 + $0x6c0] ss:$16 sps:$4 sm:$0xff]   ;;  %v3356_v59 = vld [vmem:[#allocation2 + $0x2ec] ss:$16 sps:$4 sm:$0xff]  }
  0xbf   :  { %1802 = vmatprep.subr.bf16.mxu0 %v3269_v58  ;;  %v3353_v58 = vld [vmem:[#allocation2 + $0x6e4] ss:$16 sps:$4 sm:$0xff]  }
  0xc1   :  { %1885 = vmatpush1.bf16.msra.mxu1 %v3270_v61  ;;  %v3354_v61 = vld [vmem:[#allocation2 + $0x2e8] ss:$16 sps:$4 sm:$0xff]  }
  0xc2   :  { %1803 = vmatpush1.bf16.msra.mxu0 %v3267_v60  ;;  %1886 = vmatprep.subr.bf16.mxu1 %v3278_v63  ;;  %v3351_v60 = vld [vmem:[#allocation2 + $0x6e0] ss:$16 sps:$4 sm:$0xff]   ;;  %v3362_v63 = vld [vmem:[#allocation2 + $0x30c] ss:$16 sps:$4 sm:$0xff]  }
  0xc3   :  { %1804 = vmatprep.subr.bf16.mxu0 %v3275_v62  ;;  %v3359_v62 = vld [vmem:[#allocation2 + $0x704] ss:$16 sps:$4 sm:$0xff]  }
  0xc5   :  { %1887 = vmatpush1.bf16.msra.mxu1 %v3276_v1  ;;  %v3360_v1 = vld [vmem:[#allocation2 + $0x308] ss:$16 sps:$4 sm:$0xff]  }
  0xc6   :  { %1805 = vmatpush1.bf16.msra.mxu0 %v3273_v0  ;;  %1888 = vmatprep.subr.bf16.mxu1 %v3284_v4  ;;  %v3357_v0 = vld [vmem:[#allocation2 + $0x700] ss:$16 sps:$4 sm:$0xff]   ;;  %v3368_v4 = vld [vmem:[#allocation2 + $0x32c] ss:$16 sps:$4 sm:$0xff]  }
  0xc7   :  { %1806 = vmatprep.subr.bf16.mxu0 %v3281_v2  ;;  %v3365_v2 = vld [vmem:[#allocation2 + $0x724] ss:$16 sps:$4 sm:$0xff]  }
  0xc9   :  { %1889 = vmatpush1.bf16.msra.mxu1 %v3282_v6  ;;  %v3366_v6 = vld [vmem:[#allocation2 + $0x328] ss:$16 sps:$4 sm:$0xff]  }
  0xca   :  { %1807 = vmatpush1.bf16.msra.mxu0 %v3279_v5  ;;  %1890 = vmatprep.subr.bf16.mxu1 %v3290_v8  ;;  %v3363_v5 = vld [vmem:[#allocation2 + $0x720] ss:$16 sps:$4 sm:$0xff]   ;;  %v3374_v8 = vld [vmem:[#allocation2 + $0x34c] ss:$16 sps:$4 sm:$0xff]  }
  0xcb   :  { %1808 = vmatprep.subr.bf16.mxu0 %v3287_v7  ;;  %v3371_v7 = vld [vmem:[#allocation2 + $0x744] ss:$16 sps:$4 sm:$0xff]  }
  0xcd   :  { %1891 = vmatpush1.bf16.msra.mxu1 %v3288_v10  ;;  %v3372_v10 = vld [vmem:[#allocation2 + $0x348] ss:$16 sps:$4 sm:$0xff]  }
  0xce   :  { %1809 = vmatpush1.bf16.msra.mxu0 %v3285_v9  ;;  %1892 = vmatprep.subr.bf16.mxu1 %v3296_v12  ;;  %v3369_v9 = vld [vmem:[#allocation2 + $0x740] ss:$16 sps:$4 sm:$0xff]   ;;  %v3380_v12 = vld [vmem:[#allocation2 + $0x36c] ss:$16 sps:$4 sm:$0xff]  }
  0xcf   :  { %1810 = vmatprep.subr.bf16.mxu0 %v3293_v11  ;;  %v3377_v11 = vld [vmem:[#allocation2 + $0x764] ss:$16 sps:$4 sm:$0xff]  }
  0xd1   :  { %1893 = vmatpush1.bf16.msra.mxu1 %v3294_v14  ;;  %v3378_v14 = vld [vmem:[#allocation2 + $0x368] ss:$16 sps:$4 sm:$0xff]  }
  0xd2   :  { %1811 = vmatpush1.bf16.msra.mxu0 %v3291_v13  ;;  %1894 = vmatprep.subr.bf16.mxu1 %v3302_v17  ;;  %v3375_v13 = vld [vmem:[#allocation2 + $0x760] ss:$16 sps:$4 sm:$0xff]   ;;  %v3386_v17 = vld [vmem:[#allocation2 + $0x38c] ss:$16 sps:$4 sm:$0xff]  }
  0xd3   :  { %1812 = vmatprep.subr.bf16.mxu0 %v3299_v15  ;;  %v3383_v15 = vld [vmem:[#allocation2 + $0x784] ss:$16 sps:$4 sm:$0xff]  }
  0xd5   :  { %1895 = vmatpush1.bf16.msra.mxu1 %v3300_v21  ;;  %v3389_v21 = vld [vmem:[#allocation2 + $0x7a4] ss:$16 sps:$4 sm:$0xff]  }
  0xd6   :  { %1813 = vmatpush1.bf16.msra.mxu0 %v3297_v20  ;;  %1896 = vmatprep.subr.bf16.mxu1 %v3308_v23  ;;  %v3384_v20 = vld [vmem:[#allocation2 + $0x388] ss:$16 sps:$4 sm:$0xff]   ;;  %v3387_v23 = vld [vmem:[#allocation2 + $0x7a0] ss:$16 sps:$4 sm:$0xff]  }
  0xd7   :  { %1814 = vmatprep.subr.bf16.mxu0 %v3305_v22  ;;  %v3392_v22 = vld [vmem:[#allocation2 + $0x3ac] ss:$16 sps:$4 sm:$0xff]  }
  0xd9   :  { %1897 = vmatpush1.bf16.msra.mxu1 %v3306_v26  ;;  %v3395_v26 = vld [vmem:[#allocation2 + $0x7c4] ss:$16 sps:$4 sm:$0xff]  }
  0xda   :  { %1815 = vmatpush1.bf16.msra.mxu0 %v3303_v25  ;;  %1907 = vmatprep.subr.bf16.mxu1 %v3314_v28  ;;  %v3390_v25 = vld [vmem:[#allocation2 + $0x3a8] ss:$16 sps:$4 sm:$0xff]   ;;  %v3393_v28 = vld [vmem:[#allocation2 + $0x7c0] ss:$16 sps:$4 sm:$0xff]  }
  0xdb   :  { %1825 = vmatprep.subr.bf16.mxu0 %v3311_v27  ;;  %v3398_v27 = vld [vmem:[#allocation2 + $0x3cc] ss:$16 sps:$4 sm:$0xff]  }
  0xdc   :  { %1899 = vmatmul.mubr.bf16.vlgmr.msra.gmra.mrb[4].mxu1 %v3878_v16  ;;  %v3332_v16 = vld [vmem:[#allocation2 + $0x26c] ss:$16 sps:$4 sm:$0xff]  }
  0xdd   :  { %1817 = vmatmul.mubr.bf16.vlgmr.msra.gmra.mrb[0].mxu0 %v3907_v30  ;;  %1908 = vmatpush1.bf16.msra.mxu1 %v3312_v49  ;;  %v3404_v49 = vld [vmem:[#allocation2 + $0x3ec] ss:$16 sps:$4 sm:$0xff]  }
  0xde   :  { %1826 = vmatpush1.bf16.msra.mxu0 %v3309_v31  ;;  %1909 = vmatprep.subr.bf16.mxu1 %v3320_v33  ;;  %v3401_v31 = vld [vmem:[#allocation2 + $0x7e4] ss:$16 sps:$4 sm:$0xff]   ;;  %v3402_v33 = vld [vmem:[#allocation2 + $0x3e8] ss:$16 sps:$4 sm:$0xff]  }
  0xdf   :  { %1827 = vmatprep.subr.bf16.mxu0 %v3317_v32  ;;  %1857 = vmatprep.mubr.bf16.mxu0 %v3909_v34  ;;  %v3399_v32 = vld [vmem:[#allocation2 + $0x7e0] ss:$16 sps:$4 sm:$0xff]  }
  0xe0   :  { %1939 = vmatprep.mubr.bf16.mxu1 %v3875_v3  ;;  %v3336_v3 = vld [vmem:[#allocation2 + $0x288] ss:$16 sps:$4 sm:$0xff]  }
  0xe1   :  { %1910 = vmatpush1.bf16.msra.mxu1 %v3318_v36  ;;  %v3406_v36 = vld [vmem:[#allocation2 + $0x408] ss:$16 sps:$4 sm:$0xff]  }
  0xe2   :  { %1828 = vmatpush1.bf16.msra.mxu0 %v3315_v35  ;;  %1911 = vmatprep.subr.bf16.mxu1 %v3326_v38  ;;  %v3408_v35 = vld [vmem:[#allocation2 + $0x40c] ss:$16 sps:$4 sm:$0xff]  }
  0xe3   :  { %1829 = vmatprep.subr.bf16.mxu0 %v3323_v37  ;;  %v3917_v37 = vpack.c.bf16 %v3901_v24, %v3901_v24  ;;  %v3411_v38 = vld [vmem:[#allocation2 + $0x42c] ss:$16 sps:$4 sm:$0xff]  }
  0xe4   :  { %v3505_v24 = vld [vmem:[#allocation7 + $0x10] ss:$8 sps:$4 sm:$0xff]  }
  0xe5   :  { %1912 = vmatpush1.bf16.msra.mxu1 %v3324_v40  ;;  %v3504_v40 = vld [vmem:[#allocation7 + $0x4] ss:$8 sps:$4 sm:$0xff]  }
  0xe6   :  { %1830 = vmatpush1.bf16.msra.mxu0 %v3321_v39  ;;  %1913 = vmatprep.subr.bf16.mxu1 %v3332_v16  ;;  %v3502_v39 = vld [vmem:[#allocation7] ss:$8 sps:$4 sm:$0xff]   ;;  %v3507_v16 = vld [vmem:[#allocation7 + $0x14] ss:$8 sps:$4 sm:$0xff]  }
  0xe7   :  { %1831 = vmatprep.subr.bf16.mxu0 %v3329_v41  ;;  %v3409_v41 = vld [vmem:[#allocation2 + $0x428] ss:$16 sps:$4 sm:$0xff]  }
  0xe9   :  { %1914 = vmatpush1.bf16.msra.mxu1 %v3330_v44  ;;  %v3510_v44 = vld [vmem:[#allocation7 + $0x24] ss:$8 sps:$4 sm:$0xff]  }
  0xea   :  { %1832 = vmatpush1.bf16.msra.mxu0 %v3327_v42  ;;  %1915 = vmatprep.subr.bf16.mxu1 %v3338_v46  ;;  %v3414_v42 = vld [vmem:[#allocation2 + $0x44c] ss:$16 sps:$4 sm:$0xff]  }
  0xeb   :  { %1833 = vmatprep.subr.bf16.mxu0 %v3335_v45  ;;  %v3412_v45 = vld [vmem:[#allocation2 + $0x448] ss:$16 sps:$4 sm:$0xff]   ;;  %v3417_v46 = vld [vmem:[#allocation2 + $0x46c] ss:$16 sps:$4 sm:$0xff]  }
  0xed   :  { %1916 = vmatpush1.bf16.msra.mxu1 %v3336_v3  ;;  %v3420_v3 = vld [vmem:[#allocation2 + $0x48c] ss:$16 sps:$4 sm:$0xff]  }
  0xee   :  { %1834 = vmatpush1.bf16.msra.mxu0 %v3333_v47  ;;  %1917 = vmatprep.subr.bf16.mxu1 %v3344_v50  ;;  %v3415_v47 = vld [vmem:[#allocation2 + $0x468] ss:$16 sps:$4 sm:$0xff]  }
  0xef   :  { %1835 = vmatprep.subr.bf16.mxu0 %v3341_v48  ;;  %v3513_v48 = vld [vmem:[#allocation7 + $0x34] ss:$8 sps:$4 sm:$0xff]   ;;  %v3516_v50 = vld [vmem:[#allocation7 + $0x44] ss:$8 sps:$4 sm:$0xff]  }
  0xf1   :  { %1918 = vmatpush1.bf16.msra.mxu1 %v3342_v53  ;;  %v3423_v53 = vld [vmem:[#allocation2 + $0x4ac] ss:$16 sps:$4 sm:$0xff]  }
  0xf2   :  { %1836 = vmatpush1.bf16.msra.mxu0 %v3339_v52  ;;  %1919 = vmatprep.subr.bf16.mxu1 %v3350_v55  ;;  %v3418_v52 = vld [vmem:[#allocation2 + $0x488] ss:$16 sps:$4 sm:$0xff]  }
  0xf3   :  { %1837 = vmatprep.subr.bf16.mxu0 %v3347_v54  ;;  %v3514_v54 = vld [vmem:[#allocation7 + $0x40] ss:$8 sps:$4 sm:$0xff]   ;;  %v3519_v55 = vld [vmem:[#allocation7 + $0x54] ss:$8 sps:$4 sm:$0xff]  }
  0xf5   :  { %1920 = vmatpush1.bf16.msra.mxu1 %v3348_v57  ;;  %v3426_v57 = vld [vmem:[#allocation2 + $0x4cc] ss:$16 sps:$4 sm:$0xff]  }
  0xf6   :  { %1838 = vmatpush1.bf16.msra.mxu0 %v3345_v56  ;;  %1921 = vmatprep.subr.bf16.mxu1 %v3356_v59  ;;  %v3421_v56 = vld [vmem:[#allocation2 + $0x4a8] ss:$16 sps:$4 sm:$0xff]  }
  0xf7   :  { %1839 = vmatprep.subr.bf16.mxu0 %v3353_v58  ;;  %v3517_v58 = vld [vmem:[#allocation7 + $0x50] ss:$8 sps:$4 sm:$0xff]   ;;  %v3522_v59 = vld [vmem:[#allocation7 + $0x64] ss:$8 sps:$4 sm:$0xff]  }
  0xf9   :  { %1922 = vmatpush1.bf16.msra.mxu1 %v3354_v61  ;;  %v3429_v61 = vld [vmem:[#allocation2 + $0x4ec] ss:$16 sps:$4 sm:$0xff]  }
  0xfa   :  { %1840 = vmatpush1.bf16.msra.mxu0 %v3351_v60  ;;  %1923 = vmatprep.subr.bf16.mxu1 %v3362_v63  ;;  %v3424_v60 = vld [vmem:[#allocation2 + $0x4c8] ss:$16 sps:$4 sm:$0xff]  }
  0xfb   :  { %1841 = vmatprep.subr.bf16.mxu0 %v3359_v62  ;;  %v3520_v62 = vld [vmem:[#allocation7 + $0x60] ss:$8 sps:$4 sm:$0xff]   ;;  %v3525_v63 = vld [vmem:[#allocation7 + $0x74] ss:$8 sps:$4 sm:$0xff]  }
  0xfd   :  { %1924 = vmatpush1.bf16.msra.mxu1 %v3360_v1  ;;  %v3432_v1 = vld [vmem:[#allocation2 + $0x50c] ss:$16 sps:$4 sm:$0xff]  }
  0xfe   :  { %1842 = vmatpush1.bf16.msra.mxu0 %v3357_v0  ;;  %1925 = vmatprep.subr.bf16.mxu1 %v3368_v4  ;;  %v3427_v0 = vld [vmem:[#allocation2 + $0x4e8] ss:$16 sps:$4 sm:$0xff]  }
  0xff   :  { %1843 = vmatprep.subr.bf16.mxu0 %v3365_v2  ;;  %v3523_v2 = vld [vmem:[#allocation7 + $0x70] ss:$8 sps:$4 sm:$0xff]   ;;  %v3528_v4 = vld [vmem:[#allocation7 + $0x84] ss:$8 sps:$4 sm:$0xff]  }
 0x101   :  { %1926 = vmatpush1.bf16.msra.mxu1 %v3366_v6  ;;  %v3435_v6 = vld [vmem:[#allocation2 + $0x52c] ss:$16 sps:$4 sm:$0xff]  }
 0x102   :  { %1844 = vmatpush1.bf16.msra.mxu0 %v3363_v5  ;;  %1927 = vmatprep.subr.bf16.mxu1 %v3374_v8  ;;  %v3430_v5 = vld [vmem:[#allocation2 + $0x508] ss:$16 sps:$4 sm:$0xff]  }
 0x103   :  { %1845 = vmatprep.subr.bf16.mxu0 %v3371_v7  ;;  %v3526_v7 = vld [vmem:[#allocation7 + $0x80] ss:$8 sps:$4 sm:$0xff]   ;;  %v3531_v8 = vld [vmem:[#allocation7 + $0x94] ss:$8 sps:$4 sm:$0xff]  }
 0x105   :  { %1928 = vmatpush1.bf16.msra.mxu1 %v3372_v10  ;;  %v3438_v10 = vld [vmem:[#allocation2 + $0x54c] ss:$16 sps:$4 sm:$0xff]  }
 0x106   :  { %1846 = vmatpush1.bf16.msra.mxu0 %v3369_v9  ;;  %1929 = vmatprep.subr.bf16.mxu1 %v3380_v12  ;;  %v3433_v9 = vld [vmem:[#allocation2 + $0x528] ss:$16 sps:$4 sm:$0xff]  }
 0x107   :  { %1847 = vmatprep.subr.bf16.mxu0 %v3377_v11  ;;  %v3529_v11 = vld [vmem:[#allocation7 + $0x90] ss:$8 sps:$4 sm:$0xff]   ;;  %v3534_v12 = vld [vmem:[#allocation7 + $0xa4] ss:$8 sps:$4 sm:$0xff]  }
 0x109   :  { %1930 = vmatpush1.bf16.msra.mxu1 %v3378_v14  ;;  %v3441_v14 = vld [vmem:[#allocation2 + $0x56c] ss:$16 sps:$4 sm:$0xff]  }
 0x10a   :  { %1848 = vmatpush1.bf16.msra.mxu0 %v3375_v13  ;;  %1931 = vmatprep.subr.bf16.mxu1 %v3386_v17  ;;  %v3436_v13 = vld [vmem:[#allocation2 + $0x548] ss:$16 sps:$4 sm:$0xff]  }
 0x10b   :  { %1849 = vmatprep.subr.bf16.mxu0 %v3383_v15  ;;  %v3532_v15 = vld [vmem:[#allocation7 + $0xa0] ss:$8 sps:$4 sm:$0xff]   ;;  %v3537_v17 = vld [vmem:[#allocation7 + $0xb4] ss:$8 sps:$4 sm:$0xff]  }
 0x10d   :  { %1932 = vmatpush1.bf16.msra.mxu1 %v3384_v20  ;;  %v3444_v20 = vld [vmem:[#allocation2 + $0x58c] ss:$16 sps:$4 sm:$0xff]  }
 0x10e   :  { %1850 = vmatpush1.bf16.msra.mxu0 %v3381_v19  ;;  %1933 = vmatprep.subr.bf16.mxu1 %v3392_v22  ;;  %v3439_v19 = vld [vmem:[#allocation2 + $0x568] ss:$16 sps:$4 sm:$0xff]  }
 0x10f   :  { %1851 = vmatprep.subr.bf16.mxu0 %v3389_v21  ;;  %v3535_v21 = vld [vmem:[#allocation7 + $0xb0] ss:$8 sps:$4 sm:$0xff]   ;;  %v3540_v22 = vld [vmem:[#allocation7 + $0xc4] ss:$8 sps:$4 sm:$0xff]  }
 0x111   :  { %1934 = vmatpush1.bf16.msra.mxu1 %v3390_v25  ;;  %v3447_v25 = vld [vmem:[#allocation2 + $0x5ac] ss:$16 sps:$4 sm:$0xff]  }
 0x112   :  { %1852 = vmatpush1.bf16.msra.mxu0 %v3387_v23  ;;  %1935 = vmatprep.subr.bf16.mxu1 %v3398_v27  ;;  %v3442_v23 = vld [vmem:[#allocation2 + $0x588] ss:$16 sps:$4 sm:$0xff]  }
 0x113   :  { %1853 = vmatprep.subr.bf16.mxu0 %v3395_v26  ;;  %v3538_v26 = vld [vmem:[#allocation7 + $0xc0] ss:$8 sps:$4 sm:$0xff]   ;;  %v3543_v27 = vld [vmem:[#allocation7 + $0xd4] ss:$8 sps:$4 sm:$0xff]  }
 0x115   :  { %1936 = vmatpush1.bf16.msra.mxu1 %v3396_v29  ;;  %v3450_v29 = vld [vmem:[#allocation2 + $0x5cc] ss:$16 sps:$4 sm:$0xff]  }
 0x116   :  { %1854 = vmatpush1.bf16.msra.mxu0 %v3393_v28  ;;  %1937 = vmatprep.subr.bf16.mxu1 %v3404_v49  ;;  %v3445_v28 = vld [vmem:[#allocation2 + $0x5a8] ss:$16 sps:$4 sm:$0xff]  }
 0x117   :  { %1855 = vmatprep.subr.bf16.mxu0 %v3401_v31  ;;  %v3541_v31 = vld [vmem:[#allocation7 + $0xd0] ss:$8 sps:$4 sm:$0xff]   ;;  %v3448_v49 = vld [vmem:[#allocation2 + $0x5c8] ss:$16 sps:$4 sm:$0xff]  }
 0x119   :  { %1938 = vmatpush1.bf16.msra.mxu1 %v3402_v33  ;;  %v3451_v33 = vld [vmem:[#allocation2 + $0x5e8] ss:$16 sps:$4 sm:$0xff]  }
 0x11a   :  { %1856 = vmatpush1.bf16.msra.mxu0 %v3399_v32  ;;  %1948 = vmatprep.subr.bf16.mxu1 %v3408_v35  ;;  %v3453_v32 = vld [vmem:[#allocation2 + $0x5ec] ss:$16 sps:$4 sm:$0xff]  }
 0x11b   :  { %2434 = vmatprep.subr.bf16.mxu0 %v3504_v40  ;;  %v3456_v35 = vld [vmem:[#allocation2 + $0x60c] ss:$16 sps:$4 sm:$0xff]  }
 0x11c   :  { %1940 = vmatmul.mubr.bf16.vlgmr.msra.gmra.mrb[4].mxu1 %v3880_v18  ;;  %v3508_v18 = vld [vmem:[#allocation7 + $0x20] ss:$8 sps:$4 sm:$0xff]  }
 0x11d   :  { %1858 = vmatmul.mubr.bf16.vlgmr.msra.gmra.mrb[0].mxu0 %v3917_v37  ;;  %1949 = vmatpush1.bf16.msra.mxu1 %v3406_v36  ;;  %v3454_v36 = vld [vmem:[#allocation2 + $0x608] ss:$16 sps:$4 sm:$0xff]   ;;  %v3462_v40 = vld [vmem:[#allocation2 + $0x64c] ss:$16 sps:$4 sm:$0xff]  }
 0x11e   :  { %1980 = vmatprep.mubr.bf16.mxu1 %v3895_v51  ;;  %1950 = vmatprep.subr.bf16.mxu1 %v3411_v38  ;;  %v3511_v51 = vld [vmem:[#allocation7 + $0x30] ss:$8 sps:$4 sm:$0xff]  }
 0x11f   :  { %2435 = vmatpush1.bf16.msra.mxu0 %v3502_v39  ;;  %v3459_v38 = vld [vmem:[#allocation2 + $0x62c] ss:$16 sps:$4 sm:$0xff]   ;;  %v3457_v39 = vld [vmem:[#allocation2 + $0x628] ss:$16 sps:$4 sm:$0xff]  }
 0x120   :  { %2436 = vmatprep.subr.bf16.mxu0 %v3507_v16  ;;  %v3465_v16 = vld [vmem:[#allocation2 + $0x66c] ss:$16 sps:$4 sm:$0xff]  }
 0x121   :  { %1951 = vmatpush1.bf16.msra.mxu1 %v3409_v41  ;;  %v3460_v41 = vld [vmem:[#allocation2 + $0x648] ss:$16 sps:$4 sm:$0xff]  }
 0x122   :  { %1952 = vmatprep.subr.bf16.mxu1 %v3414_v42  ;;  %v3463_v42 = vld [vmem:[#allocation2 + $0x668] ss:$16 sps:$4 sm:$0xff]  }
 0x123   :  { %2437 = vmatpush1.bf16.msra.mxu0 %v3505_v24  ;;  %v3468_v24 = vld [vmem:[#allocation2 + $0x68c] ss:$16 sps:$4 sm:$0xff]  }
 0x124   :  { %2438 = vmatprep.subr.bf16.mxu0 %v3510_v44  ;;  %v3466_v44 = vld [vmem:[#allocation2 + $0x688] ss:$16 sps:$4 sm:$0xff]  }
 0x125   :  { %1953 = vmatpush1.bf16.msra.mxu1 %v3412_v45  ;;  %v3471_v45 = vld [vmem:[#allocation2 + $0x6ac] ss:$16 sps:$4 sm:$0xff]  }
 0x126   :  { %1954 = vmatprep.subr.bf16.mxu1 %v3417_v46  ;;  %v3474_v46 = vld [vmem:[#allocation2 + $0x6cc] ss:$16 sps:$4 sm:$0xff]  }
 0x127   :  { %2439 = vmatpush1.bf16.msra.mxu0 %v3508_v18  ;;  %v3546_v18 = vld [vmem:[#allocation7 + $0xe4] ss:$8 sps:$4 sm:$0xff]  }
 0x128   :  { %2440 = vmatprep.subr.bf16.mxu0 %v3513_v48 }
 0x129   :  { %1955 = vmatpush1.bf16.msra.mxu1 %v3415_v47  ;;  %v3544_v47 = vld [vmem:[#allocation7 + $0xe0] ss:$8 sps:$4 sm:$0xff]  }
 0x12a   :  { %1956 = vmatprep.subr.bf16.mxu1 %v3420_v3 }
 0x12b   :  { %2441 = vmatpush1.bf16.msra.mxu0 %v3511_v51  ;;  %v3472_v51 = vld [vmem:[#allocation2 + $0x6c8] ss:$16 sps:$4 sm:$0xff]  }
 0x12c   :  { %2442 = vmatprep.subr.bf16.mxu0 %v3516_v50 }
 0x12d   :  { %1957 = vmatpush1.bf16.msra.mxu1 %v3418_v52  ;;  %v3477_v52 = vld [vmem:[#allocation2 + $0x6ec] ss:$16 sps:$4 sm:$0xff]  }
 0x12e   :  { %1958 = vmatprep.subr.bf16.mxu1 %v3423_v53  ;;  %v3549_v53 = vld [vmem:[#allocation7 + $0xf4] ss:$8 sps:$4 sm:$0xff]  }
 0x12f   :  { %2443 = vmatpush1.bf16.msra.mxu0 %v3514_v54  ;;  %v3547_v54 = vld [vmem:[#allocation7 + $0xf0] ss:$8 sps:$4 sm:$0xff]  }
 0x130   :  { %2444 = vmatprep.subr.bf16.mxu0 %v3519_v55  ;;  %v3475_v55 = vld [vmem:[#allocation2 + $0x6e8] ss:$16 sps:$4 sm:$0xff]  }
 0x131   :  { %1959 = vmatpush1.bf16.msra.mxu1 %v3421_v56  ;;  %v3480_v56 = vld [vmem:[#allocation2 + $0x70c] ss:$16 sps:$4 sm:$0xff]  }
 0x132   :  { %1960 = vmatprep.subr.bf16.mxu1 %v3426_v57  ;;  %v3552_v57 = vld [vmem:[#allocation7 + $0x104] ss:$8 sps:$4 sm:$0xff]  }
 0x133   :  { %2445 = vmatpush1.bf16.msra.mxu0 %v3517_v58  ;;  %v3478_v58 = vld [vmem:[#allocation2 + $0x708] ss:$16 sps:$4 sm:$0xff]  }
 0x134   :  { %2446 = vmatprep.subr.bf16.mxu0 %v3522_v59  ;;  %v3483_v59 = vld [vmem:[#allocation2 + $0x72c] ss:$16 sps:$4 sm:$0xff]  }
 0x135   :  { %1961 = vmatpush1.bf16.msra.mxu1 %v3424_v60  ;;  %v3481_v60 = vld [vmem:[#allocation2 + $0x728] ss:$16 sps:$4 sm:$0xff]  }
 0x136   :  { %1962 = vmatprep.subr.bf16.mxu1 %v3429_v61  ;;  %v3486_v61 = vld [vmem:[#allocation2 + $0x74c] ss:$16 sps:$4 sm:$0xff]  }
 0x137   :  { %2447 = vmatpush1.bf16.msra.mxu0 %v3520_v62  ;;  %v3484_v62 = vld [vmem:[#allocation2 + $0x748] ss:$16 sps:$4 sm:$0xff]  }
 0x138   :  { %2448 = vmatprep.subr.bf16.mxu0 %v3525_v63  ;;  %v3489_v63 = vld [vmem:[#allocation2 + $0x76c] ss:$16 sps:$4 sm:$0xff]  }
 0x139   :  { %1963 = vmatpush1.bf16.msra.mxu1 %v3427_v0  ;;  %v3487_v0 = vld [vmem:[#allocation2 + $0x768] ss:$16 sps:$4 sm:$0xff]  }
 0x13a   :  { %1964 = vmatprep.subr.bf16.mxu1 %v3432_v1  ;;  %v3492_v1 = vld [vmem:[#allocation2 + $0x78c] ss:$16 sps:$4 sm:$0xff]  }
 0x13b   :  { %2449 = vmatpush1.bf16.msra.mxu0 %v3523_v2  ;;  %v3490_v2 = vld [vmem:[#allocation2 + $0x788] ss:$16 sps:$4 sm:$0xff]  }
 0x13c   :  { %2450 = vmatprep.subr.bf16.mxu0 %v3528_v4  ;;  %v3495_v4 = vld [vmem:[#allocation2 + $0x7ac] ss:$16 sps:$4 sm:$0xff]  }
 0x13d   :  { %1965 = vmatpush1.bf16.msra.mxu1 %v3430_v5  ;;  %v3493_v5 = vld [vmem:[#allocation2 + $0x7a8] ss:$16 sps:$4 sm:$0xff]  }
 0x13e   :  { %1966 = vmatprep.subr.bf16.mxu1 %v3435_v6  ;;  %v3498_v6 = vld [vmem:[#allocation2 + $0x7cc] ss:$16 sps:$4 sm:$0xff]  }
 0x13f   :  { %2451 = vmatpush1.bf16.msra.mxu0 %v3526_v7  ;;  %v3496_v7 = vld [vmem:[#allocation2 + $0x7c8] ss:$16 sps:$4 sm:$0xff]  }
 0x140   :  { %2452 = vmatprep.subr.bf16.mxu0 %v3531_v8  ;;  %v3501_v8 = vld [vmem:[#allocation2 + $0x7ec] ss:$16 sps:$4 sm:$0xff]  }
 0x141   :  { %1967 = vmatpush1.bf16.msra.mxu1 %v3433_v9  ;;  %v3499_v9 = vld [vmem:[#allocation2 + $0x7e8] ss:$16 sps:$4 sm:$0xff]  }
 0x142   :  { %1968 = vmatprep.subr.bf16.mxu1 %v3438_v10  ;;  %v404_v10 = vsub.s32 0, %v3865_v43 }
 0x143   :  { %2453 = vmatpush1.bf16.msra.mxu0 %v3529_v11  ;;  %v3926_v11 = vld [vmem:[#allocation5] sm:$0xf] }
 0x144   :  { %2454 = vmatprep.subr.bf16.mxu0 %v3534_v12  ;;  %v408_v12 = vsub.s32 1, %v3865_v43 }
 0x145   :  { %1969 = vmatpush1.bf16.msra.mxu1 %v3436_v13  ;;  %v405_v13 = vrot.slane %v3926_v11, %v404_v10 }
 0x146   :  { %1970 = vmatprep.subr.bf16.mxu1 %v3441_v14  ;;  %v409_v14 = vrot.slane %v3926_v11, %v408_v12 }
 0x147   :  { %2455 = vmatpush1.bf16.msra.mxu0 %v3532_v15 }
 0x148   :  { %2456 = vmatprep.subr.bf16.mxu0 %v3537_v17 }
 0x149   :  { %1971 = vmatpush1.bf16.msra.mxu1 %v3439_v19 }
 0x14a   :  { %1972 = vmatprep.subr.bf16.mxu1 %v3444_v20 }
 0x14b   :  { %2457 = vmatpush1.bf16.msra.mxu0 %v3535_v21 }
 0x14c   :  { %2458 = vmatprep.subr.bf16.mxu0 %v3540_v22 }
 0x14d   :  { %1973 = vmatpush1.bf16.msra.mxu1 %v3442_v23 }
 0x14e   :  { %1974 = vmatprep.subr.bf16.mxu1 %v3447_v25 }
 0x14f   :  { %2459 = vmatpush1.bf16.msra.mxu0 %v3538_v26 }
 0x150   :  { %2460 = vmatprep.subr.bf16.mxu0 %v3543_v27 }
 0x151   :  { %1975 = vmatpush1.bf16.msra.mxu1 %v3445_v28  ;;  %v3550_v28 = vld [vmem:[#allocation7 + $0x100] ss:$8 sps:$4 sm:$0xff]  }
 0x152   :  { %1976 = vmatprep.subr.bf16.mxu1 %v3450_v29 }
 0x153   :  { %2461 = vmatpush1.bf16.msra.mxu0 %v3541_v31  ;;  %v3555_v31 = vld [vmem:[#allocation7 + $0x114] ss:$8 sps:$4 sm:$0xff]  }
 0x154   :  { %2462 = vmatprep.subr.bf16.mxu0 %v3546_v18  ;;  %v3567_v18 = vld [vmem:[#allocation7 + $0x154] ss:$8 sps:$4 sm:$0xff]  }
 0x155   :  { %1977 = vmatpush1.bf16.msra.mxu1 %v3448_v49  ;;  %v3598_v49 = vld [vmem:[%s4008_s5 + $0x40] sm:$0xff]  }
 0x156   :  { %1978 = vmatprep.subr.bf16.mxu1 %v3453_v32  ;;  %v3599_v32 = vld [vmem:[%s4008_s5] sm:$0xff]  }
 0x157   :  { %2463 = vmatpush1.bf16.msra.mxu0 %v3544_v47  ;;  %v3608_v47 = vld [vmem:[%s4008_s5 + $0x68] sm:$0xff]  }
 0x158   :  { %2464 = vmatprep.subr.bf16.mxu0 %v3549_v53  ;;  %v3571_v53 = vld [vmem:[#allocation7 + $0x170] ss:$8 sps:$4 sm:$0xff]  }
 0x159   :  { %1979 = vmatpush1.bf16.msra.mxu1 %v3451_v33  ;;  %v3600_v33 = vld [vmem:[%s4008_s5 + $0x48] sm:$0xff]  }
 0x15a   :  { %1989 = vmatprep.subr.bf16.mxu1 %v3456_v35  ;;  %v3553_v35 = vld [vmem:[#allocation7 + $0x110] ss:$8 sps:$4 sm:$0xff]  }
 0x15b   :  { %2465 = vmatpush1.bf16.msra.mxu0 %v3547_v54  ;;  %v3576_v54 = vld [vmem:[#allocation7 + $0x184] ss:$8 sps:$4 sm:$0xff]  }
 0x15c   :  { %1981 = vmatmul.mubr.bf16.vlgmr.msra.gmra.mrb[4].mxu1 %v3907_v30  ;;  %v3469_v30 = vld [vmem:[#allocation2 + $0x6a8] ss:$16 sps:$4 sm:$0xff]   ;;  %2475 = vmatprep.subr.bf16.mxu0 %v3552_v57  ;;  %v3577_v57 = vld [vmem:[#allocation7 + $0x190] ss:$8 sps:$4 sm:$0xff]  }
 0x15d   :  { %1990 = vmatpush1.bf16.msra.mxu1 %v3454_v36  ;;  %2021 = vmatprep.mubr.bf16.mxu1 %v3909_v34  ;;  %v3558_v36 = vld [vmem:[#allocation7 + $0x124] ss:$8 sps:$4 sm:$0xff]  }
 0x15e   :  { %1991 = vmatprep.subr.bf16.mxu1 %v3459_v38  ;;  %v3601_v38 = vld [vmem:[%s4008_s5 + $0x8] sm:$0xff]  }
 0x161   :  { %1992 = vmatpush1.bf16.msra.mxu1 %v3457_v39  ;;  %v3602_v39 = vld [vmem:[%s4008_s5 + $0x50] sm:$0xff]  }
 0x162   :  { %1993 = vmatprep.subr.bf16.mxu1 %v3462_v40  ;;  %v3556_v40 = vld [vmem:[#allocation7 + $0x120] ss:$8 sps:$4 sm:$0xff]  }
 0x165   :  { %1994 = vmatpush1.bf16.msra.mxu1 %v3460_v41  ;;  %v3561_v41 = vld [vmem:[#allocation7 + $0x134] ss:$8 sps:$4 sm:$0xff]  }
 0x166   :  { %1995 = vmatprep.subr.bf16.mxu1 %v3465_v16  ;;  %v3603_v16 = vld [vmem:[%s4008_s5 + $0x10] sm:$0xff]  }
 0x169   :  { %1996 = vmatpush1.bf16.msra.mxu1 %v3463_v42  ;;  %v3604_v42 = vld [vmem:[%s4008_s5 + $0x58] sm:$0xff]  }
 0x16a   :  { %1997 = vmatprep.subr.bf16.mxu1 %v3468_v24  ;;  %v3559_v24 = vld [vmem:[#allocation7 + $0x130] ss:$8 sps:$4 sm:$0xff]  }
 0x16d   :  { %1998 = vmatpush1.bf16.msra.mxu1 %v3466_v44  ;;  %v3564_v44 = vld [vmem:[#allocation7 + $0x144] ss:$8 sps:$4 sm:$0xff]  }
 0x16e   :  { %1999 = vmatprep.subr.bf16.mxu1 %v3471_v45  ;;  %v3605_v45 = vld [vmem:[%s4008_s5 + $0x18] sm:$0xff]  }
 0x16f   :  { %v1736_v34 = vpop.f32.mrb[0].mxu1 }
 0x170   :  { %v1738_v3 = vpop.f32.mrb[1].mxu1  ;;  %v1737_v15 = vadd.f32 %v1736_v34, %v405_v13  ;;  %v3607_v34 = vld [vmem:[%s4008_s5 + $0x20] sm:$0xff]  }
 0x171   :  { %v1740_v48 = vpop.f32.mrb[2].mxu1  ;;  %2000 = vmatpush1.bf16.msra.mxu1 %v3469_v30  ;;  %v1739_v17 = vadd.f32 %v1738_v3, %v409_v14  ;;  %v3606_v30 = vld [vmem:[%s4008_s5 + $0x60] sm:$0xff]   ;;  %v3565_v3 = vld [vmem:[#allocation7 + $0x150] ss:$8 sps:$4 sm:$0xff]  }
 0x172   :  { %v1741_v50 = vpop.f32.mrb[3].mxu1  ;;  %2001 = vmatprep.subr.bf16.mxu1 %v3474_v46  ;;  %v3562_v46 = vld [vmem:[#allocation7 + $0x140] ss:$8 sps:$4 sm:$0xff]   ;;  %v3570_v48 = vld [vmem:[#allocation7 + $0x164] ss:$8 sps:$4 sm:$0xff]  }
 0x173   :  { %v3568_v50 = vld [vmem:[#allocation7 + $0x160] ss:$8 sps:$4 sm:$0xff]  }
 0x175   :  { %2002 = vmatpush1.bf16.msra.mxu1 %v3472_v51  ;;  %v3609_v51 = vld [vmem:[%s4008_s5 + $0x28] sm:$0xff]  }
 0x176   :  { %2003 = vmatprep.subr.bf16.mxu1 %v3477_v52  ;;  %v3573_v52 = vld [vmem:[#allocation7 + $0x174] ss:$8 sps:$4 sm:$0xff]  }
 0x179   :  { %2004 = vmatpush1.bf16.msra.mxu1 %v3475_v55  ;;  %v3574_v55 = vld [vmem:[#allocation7 + $0x180] ss:$8 sps:$4 sm:$0xff]  }
 0x17a   :  { %2005 = vmatprep.subr.bf16.mxu1 %v3480_v56  ;;  %v3579_v56 = vld [vmem:[#allocation7 + $0x194] ss:$8 sps:$4 sm:$0xff]  }
 0x17d   :  { %2006 = vmatpush1.bf16.msra.mxu1 %v3478_v58  ;;  %v3582_v58 = vld [vmem:[#allocation7 + $0x1a4] ss:$8 sps:$4 sm:$0xff]  }
 0x17e   :  { %2007 = vmatprep.subr.bf16.mxu1 %v3483_v59  ;;  %v3580_v59 = vld [vmem:[#allocation7 + $0x1a0] ss:$8 sps:$4 sm:$0xff]  }
 0x181   :  { %2008 = vmatpush1.bf16.msra.mxu1 %v3481_v60  ;;  %v3585_v60 = vld [vmem:[#allocation7 + $0x1b4] ss:$8 sps:$4 sm:$0xff]  }
 0x182   :  { %2009 = vmatprep.subr.bf16.mxu1 %v3486_v61  ;;  %v3583_v61 = vld [vmem:[#allocation7 + $0x1b0] ss:$8 sps:$4 sm:$0xff]  }
 0x185   :  { %2010 = vmatpush1.bf16.msra.mxu1 %v3484_v62  ;;  %v3588_v62 = vld [vmem:[#allocation7 + $0x1c4] ss:$8 sps:$4 sm:$0xff]  }
 0x186   :  { %2011 = vmatprep.subr.bf16.mxu1 %v3489_v63  ;;  %v3586_v63 = vld [vmem:[#allocation7 + $0x1c0] ss:$8 sps:$4 sm:$0xff]  }
 0x189   :  { %2012 = vmatpush1.bf16.msra.mxu1 %v3487_v0  ;;  %v3591_v0 = vld [vmem:[#allocation7 + $0x1d4] ss:$8 sps:$4 sm:$0xff]  }
 0x18a   :  { %2013 = vmatprep.subr.bf16.mxu1 %v3492_v1  ;;  %v3589_v1 = vld [vmem:[#allocation7 + $0x1d0] ss:$8 sps:$4 sm:$0xff]  }
 0x18d   :  { %2014 = vmatpush1.bf16.msra.mxu1 %v3490_v2  ;;  %v3594_v2 = vld [vmem:[#allocation7 + $0x1e4] ss:$8 sps:$4 sm:$0xff]  }
 0x18e   :  { %2015 = vmatprep.subr.bf16.mxu1 %v3495_v4  ;;  %v3592_v4 = vld [vmem:[#allocation7 + $0x1e0] ss:$8 sps:$4 sm:$0xff]  }
 0x191   :  { %2016 = vmatpush1.bf16.msra.mxu1 %v3493_v5  ;;  %v3597_v5 = vld [vmem:[#allocation7 + $0x1f4] ss:$8 sps:$4 sm:$0xff]  }
 0x192   :  { %2017 = vmatprep.subr.bf16.mxu1 %v3498_v6  ;;  %v3595_v6 = vld [vmem:[#allocation7 + $0x1f0] ss:$8 sps:$4 sm:$0xff]  }
 0x195   :  { %2018 = vmatpush1.bf16.msra.mxu1 %v3496_v7  ;;  %v412_v7 = vsub.s32 2, %v3865_v43 }
 0x196   :  { %2019 = vmatprep.subr.bf16.mxu1 %v3501_v8  ;;  %v416_v8 = vsub.s32 3, %v3865_v43 }
 0x198   :  { %v417_v13 = vrot.slane %v3926_v11, %v416_v8 }
 0x199   :  { %2020 = vmatpush1.bf16.msra.mxu1 %v3499_v9  ;;  %v413_v9 = vrot.slane %v3926_v11, %v412_v7  ;;  %v3611_v11 = vld [vmem:[%s4008_s5 + $0x30] sm:$0xff]  }
 0x19a   :  { %3051 = vmatprep.subr.bf16.mxu1 %v3598_v49 }
 0x19c   :  { %2022 = vmatmul.mubr.bf16.vlgmr.msra.gmra.mrb[4].mxu1 %v3917_v37 }
 0x19d   :  { %3052 = vmatpush3.bf16.msra.mxu1 %v3599_v32 }
 0x19e   :  { %3053 = vmatprep.subr.bf16.mxu1 %v3600_v33 }
 0x1a1   :  { %3054 = vmatpush3.bf16.msra.mxu1 %v3601_v38 }
 0x1a2   :  { %3055 = vmatprep.subr.bf16.mxu1 %v3602_v39 }
 0x1a5   :  { %3056 = vmatpush3.bf16.msra.mxu1 %v3603_v16 }
 0x1a6   :  { %3057 = vmatprep.subr.bf16.mxu1 %v3604_v42 }
 0x1a9   :  { %3058 = vmatpush3.bf16.msra.mxu1 %v3605_v45 }
 0x1aa   :  { %3059 = vmatprep.subr.bf16.mxu1 %v3606_v30 }
 0x1ad   :  { %3060 = vmatpush3.bf16.msra.mxu1 %v3607_v34 }
 0x1ae   :  { %3061 = vmatprep.subr.bf16.mxu1 %v3608_v47 }
 0x1b1   :  { %3062 = vmatpush3.bf16.msra.mxu1 %v3609_v51 }
 0x1f0   :  { %v1859_v19 = vpop.f32.mrb[0].mxu0 }
 0x1f1   :  { %v3074_v20 = vadd.f32 %v1859_v19, %v1737_v15  ;;  %v1861_v21 = vpop.f32.mrb[1].mxu0 }
 0x1f2   :  { %v3076_v37 = vadd.f32 %v1861_v21, %v1739_v17  ;;  %v1863_v22 = vpop.f32.mrb[2].mxu0 }
 0x1f3   :  { %v2030_v23 = vmax.f32 %v3074_v20, 0.0  ;;  %v1864_v25 = vpop.f32.mrb[3].mxu0 }
 0x1f4   :  { %v2031_v26 = vmax.f32 %v3076_v37, 0.0 }
 0x1f5   :  { %v2034_v29 = vpack.c.bf16 %v2030_v23, %v2030_v23 }
 0x1f6   :  { %v2035_v27 = vpack.c.bf16 %v2031_v26, %v2031_v26  ;;  %v3610_v26 = vld [vmem:[%s4008_s5 + $0x70] sm:$0xff]  }
 0x1f7   :  { %3063 = vmatprep.subr.bf16.mxu1 %v3610_v26 }
 0x1f8   :  { %2466 = vmatprep.mubr.bf16.mxu0 %v2035_v27  ;;  %3064 = vmatpush3.bf16.msra.mxu1 %v3611_v11  ;;  %v3612_v27 = vld [vmem:[%s4008_s5 + $0x78] sm:$0xff]  }
 0x1f9   :  { %2467 = vmatmul.mubr.bf16.vlgmr.msra.gmra.mrb[4].mxu0 %v2034_v29  ;;  %3065 = vmatprep.subr.bf16.mxu1 %v3612_v27  ;;  %v2102_v29 = vld [vmem:[#allocation8] sm:$0x3] }
 0x1fa   :  { %2476 = vmatpush1.bf16.msra.mxu0 %v3550_v28  ;;  %v3613_v28 = vld [vmem:[%s4008_s5 + $0x38] sm:$0xff]   ;;  %v2111_v49 = vrot.slane %v2102_v29, %v408_v12  ;;  %s3764_s5 = smov [#allocation11]  }
 0x1fb   :  { %2477 = vmatprep.subr.bf16.mxu0 %v3555_v31  ;;  %v2107_v31 = vrot.slane %v2102_v29, %v404_v10  ;;  %s2703_s19 = sshll.u32 %s3764_s5, 4  ;;  %s2704_s19 = int_to_ptr.vmem [resolvable:$true] %s2703_s19 }
 0x1fc   :  { %3066 = vmatpush3.bf16.msra.mxu1 %v3613_v28  ;;  %s3724_s20 = scalar_lea.vmem %s2704_s19, 32  ;;  %p3729_p13 = scmp.lt.s32.totalorder %s2704_s19, %s2704_s19 }
 0x1fd   :  { %p3725_p12 = scmp.ne.s32.totalorder %s2704_s19, %s3724_s20  ;;  %p3730_p0 = scmp.lt.s32.totalorder %s3724_s20, %s3724_s20 }
 0x1fe   :  { %2478 = vmatpush1.bf16.msra.mxu0 %v3553_v35 }
 0x1ff   :  { %2479 = vmatprep.subr.bf16.mxu0 %v3558_v36  ;;  %p3731_p1 = por %p3730_p0, %p3729_p13 }
 0x201   :  { %p3732_p2 = pnand %p3731_p1, %p3725_p12 }
 0x202   :  { %2480 = vmatpush1.bf16.msra.mxu0 %v3556_v40 }
 0x203   :  { %2481 = vmatprep.subr.bf16.mxu0 %v3561_v41 }
 0x206   :  { %2482 = vmatpush1.bf16.msra.mxu0 %v3559_v24 }
 0x207   :  { %2483 = vmatprep.subr.bf16.mxu0 %v3564_v44  ;;  %v3034_v44 = vld [vmem:[#allocation10] ss:$0 sm:$0xff] }
 0x20a   :  { %2484 = vmatpush1.bf16.msra.mxu0 %v3562_v46 }
 0x20b   :  { %2485 = vmatprep.subr.bf16.mxu0 %v3567_v18 }
 0x20e   :  { %2486 = vmatpush1.bf16.msra.mxu0 %v3565_v3 }
 0x20f   :  { %2487 = vmatprep.subr.bf16.mxu0 %v3570_v48 }
 0x212   :  { %2488 = vmatpush1.bf16.msra.mxu0 %v3568_v50 }
 0x213   :  { %2489 = vmatprep.subr.bf16.mxu0 %v3573_v52 }
 0x216   :  { %2490 = vmatpush1.bf16.msra.mxu0 %v3571_v53 }
 0x217   :  { %2491 = vmatprep.subr.bf16.mxu0 %v3576_v54 }
 0x21a   :  { %2492 = vmatpush1.bf16.msra.mxu0 %v3574_v55 }
 0x21b   :  { %2493 = vmatprep.subr.bf16.mxu0 %v3579_v56 }
 0x21e   :  { %2494 = vmatpush1.bf16.msra.mxu0 %v3577_v57 }
 0x21f   :  { %2495 = vmatprep.subr.bf16.mxu0 %v3582_v58 }
 0x222   :  { %2496 = vmatpush1.bf16.msra.mxu0 %v3580_v59 }
 0x223   :  { %2497 = vmatprep.subr.bf16.mxu0 %v3585_v60 }
 0x226   :  { %2498 = vmatpush1.bf16.msra.mxu0 %v3583_v61 }
 0x227   :  { %2499 = vmatprep.subr.bf16.mxu0 %v3588_v62 }
 0x22a   :  { %2500 = vmatpush1.bf16.msra.mxu0 %v3586_v63 }
 0x22b   :  { %2501 = vmatprep.subr.bf16.mxu0 %v3591_v0 }
 0x22e   :  { %2502 = vmatpush1.bf16.msra.mxu0 %v3589_v1 }
 0x22f   :  { %2503 = vmatprep.subr.bf16.mxu0 %v3594_v2 }
 0x232   :  { %2504 = vmatpush1.bf16.msra.mxu0 %v3592_v4 }
 0x233   :  { %2505 = vmatprep.subr.bf16.mxu0 %v3597_v5 }
 0x236   :  { %2506 = vmatpush1.bf16.msra.mxu0 %v3595_v6 }
 0x26f   :  { %v2023_v14 = vpop.f32.mrb[4].mxu1 }
 0x270   :  { %v3077_v15 = vadd.f32 %v2023_v14, %v413_v9  ;;  %v2025_v17 = vpop.f32.mrb[5].mxu1 }
 0x271   :  { %v3078_v19 = vadd.f32 %v2025_v17, %v417_v13  ;;  %v2027_v20 = vpop.f32.mrb[6].mxu1 }
 0x272   :  { %v2032_v21 = vmax.f32 %v3077_v15, 0.0  ;;  %v2028_v37 = vpop.f32.mrb[7].mxu1 }
 0x273   :  { %v2033_v22 = vmax.f32 %v3078_v19, 0.0 }
 0x274   :  { %v2036_v25 = vpack.c.bf16 %v2032_v21, %v2032_v21 }
 0x275   :  { %v2037_v23 = vpack.c.bf16 %v2033_v22, %v2033_v22 }
 0x277   :  { %2507 = vmatprep.mubr.bf16.mxu0 %v2037_v23 }
 0x278   :  { %2508 = vmatmul.mubr.bf16.vlgmr.msra.gmra.mrb[4].mxu0 %v2036_v25 }
 0x34b   :  { %v2509_v32 = vpop.f32.mrb[4].mxu0 }
 0x34c   :  { %v3079_v33 = vadd.f32 %v2509_v32, %v2107_v31  ;;  %v2511_v35 = vpop.f32.mrb[5].mxu0 }
 0x34d   :  { %v3080_v36 = vadd.f32 %v2511_v35, %v2111_v49  ;;  %v2513_v38 = vpop.f32.mrb[6].mxu0 }
 0x34e   :  { %v2516_v39 = vmax.f32 %v3079_v33, 0.0  ;;  %v2514_v40 = vpop.f32.mrb[7].mxu0 }
 0x34f   :  { %v2517_v41 = vmax.f32 %v3080_v36, 0.0 }
 0x350   :  { %v2518_v42 = vpack.c.bf16 %v2516_v39, %v2516_v39 }
 0x351   :  { %v2519_v16 = vpack.c.bf16 %v2517_v41, %v2517_v41 }
 0x353   :  { %2687 = vmatprep.mubr.bf16.mxu1 %v2519_v16 }
 0x354   :  { %2688 = vmatmul.mubr.bf16.vlgmr.msra.gmra.mrb[8].mxu1 %v2518_v42 }
 0x427   :  { %v3067_v24 = vpop.f32.mrb[8].mxu1 }
 0x428   :  { %v3068_v45 = vpop.f32.mrb[9].mxu1 }
 0x429   :  { %v3069_v10 = vadd.f32 %v3068_v45, %v3067_v24  ;;  %v3070_v43 = vpop.f32.mrb[10].mxu1 }
 0x42a   :  { %v3071_v12 = vpop.f32.mrb[11].mxu1 }
 0x42b   :  { %v2690_v30 = vadd.f32 %v3069_v10, %v3034_v44 }
 0x42d   :  { %2696 = vst.msk [vmem:[#allocation11] sm:$0x3] %vm2695_vm0, %v2690_v30 }
 0x42e   :  { %3735 = shalt.err (!%p3732_p2)
}
 0x42f   :  { %s3736_s2 = scalar_lea.hbm %s4010_s7, 32 }
 0x430   :  { %p3737_p3 = scmp.ne.s32.totalorder %s4010_s7, %s3736_s2  ;;  %p3740_p4 = scmp.lt.u32.totalorder %s3736_s2, %s4010_s7 }
 0x432   :  { %p3742_p5 = pnand %p3740_p4, %p3737_p3 }
 0x434   :  { %3745 = shalt.err (!%p3742_p5)
}
 0x435   :  { %2706 = dma.vmem_to_hbm [thread:$0]  %s2704_s19, 32, %s4010_s7, [#allocation4]  }
 0x436   :  { %3752 = dma.done.wait [#allocation4], 32  }
 0x437   :  { %3753 = vsyncadd [#allocation4], 4294967264 }
 0x438   :  { %2710 = vsyncpa [#allocation3], 1 }
 0x439   :  { %2711 = vsyncpa [#allocation6], 1 }
 0x43a   :  { %2712 = vsyncpa [#allocation9], 1 }
 0x43b   :  { %2713 = vsyncpa [#allocation4], 1 }

// kernel: pointnet_forward.2
= control target key start
LH: loop header
LB: loop body
LE: loop exit
PB: predicated region body
PF: predicated region fallthrough
CT: control target
= control target key end

     0   :  { %s6415_s0 = inlined_call_operand.vmem [shape: f32[2,256,3], index: 0, kind: input, shape index: {}]   ;;  %s6416_s1 = inlined_call_operand.hbm [shape: f32[3,64], index: 1, kind: input, shape index: {}]   ;;  %s6417_s2 = inlined_call_operand.hbm [shape: f32[1,64], index: 2, kind: input, shape index: {}]   ;;  %s6418_s3 = inlined_call_operand.hbm [shape: bf16[64,64], index: 3, kind: input, shape index: {}]   ;;  %s6419_s4 = inlined_call_operand.hbm [shape: f32[1,64], index: 4, kind: input, shape index: {}]   ;;  %s6420_s5 = inlined_call_operand.hbm [shape: bf16[64,128], index: 5, kind: input, shape index: {}]   ;;  %s6421_s6 = inlined_call_operand.hbm [shape: f32[1,128], index: 6, kind: input, shape index: {}]   ;;  %s6422_s7 = inlined_call_operand.hbm [shape: bf16[128,1024], index: 7, kind: input, shape index: {}]   ;;  %s6423_s8 = inlined_call_operand.hbm [shape: f32[1,1024], index: 8, kind: input, shape index: {}]   ;;  %s6424_s9 = inlined_call_operand.vmem [shape: f32[2,256,1024], index: 9, kind: output, shape index: {0}]   ;;  %s6425_s10 = inlined_call_operand.vmem [shape: f32[2,1,1024], index: 10, kind: output, shape index: {1}]  }
   0x1   :  { %6429 = sst [smem:[#allocation20_spill]] %s6416_s1 }
   0x2   :  { %6430 = sst [smem:[#allocation21_spill]] %s6417_s2 }
   0x3   :  { %16 = vsyncpa [#allocation3], 0 }
   0x4   :  { %17 = vsyncpa [#allocation5], 0 }
   0x5   :  { %18 = vsyncpa [#allocation8], 0 }
   0x6   :  { %19 = vsyncpa [#allocation11], 0 }
   0x7   :  { %20 = vsyncpa [#allocation14], 0  ;;  %s5011_s13 = smov 0   ;;  %s5013_s14 = smov 0  }
   0x8   :  { %s5015_s15 = smov 0  }
   0x9 LB: > { %s4940_s16 = smov [#allocation4]   ;;  %s4259_s18 = sadd.s32 4294967295, %s4938_s15   ;;  %s4938_s15 = sphi %s5015_s15, %s26_s15   ;;  %s4934_s14 = sphi %s5013_s14, %s6440_s14   ;;  %s4930_s13 = sphi %s5011_s13, %s6439_s13  }
   0xa   : > { %s317_s17 = sshll.u32 %s4940_s16, 4  ;;  %p4261_p0 = scmp.ge.s32.totalorder %s4938_s15, 1  ;;  %s318_s17 = int_to_ptr.vmem [resolvable:$true] %s317_s17 }
   0xb   : > { %p293_p1 = scmp.lt.s32.totalorder %s4938_s15, 3  ;;  %p5029_p2 = scmp.eq.s32.totalorder %s4259_s18, 0 }
   0xc   : > { %s4941_s21 = smov [#allocation7]   ;;  %s4942_s23 = smov [#allocation10]  }
   0xd   : > { %s6431_s19 = scalar_select %p5029_p2, 1, 0 }
   0xe   : > { %p5033_p3 = pnand %p4261_p0, %p293_p1  ;;  %s341_s22 = sshll.u32 %s4941_s21, 4  ;;  %s5039_s22 = int_to_ptr.vmem [resolvable:$true] %s341_s22 }
   0xf   : > { %s365_s24 = sshll.u32 %s4942_s23, 4  ;;  %s6434_s2 = sld [smem:[#allocation21_spill]]  ;;  %s5047_s24 = int_to_ptr.vmem [resolvable:$true] %s365_s24 }
  0x10   : > { %s6432_s20 = scalar_select %p5033_p3, 1, 0 }
  0x11   : > { %p4548_p4 = pneg %p5033_p3 }
  0x13   : > { %p5043_p5 = pnand %p5029_p2, %p4548_p4 }
  0x15   : > { %s4672_s28 = scalar_lea.hbm %s6434_s2, 16  ;;  %p5057_p7 = pneg %p5043_p5 }
  0x16   : > { %p4673_p6 = scmp.ne.s32.totalorder %s6434_s2, %s4672_s28  ;;  %p4679_p10 = scmp.lt.u32.totalorder %s4672_s28, %s6434_s2 }
  0x18   : > { %p4675_p8 = pnand %p5057_p7, %p4673_p6 }
  0x1a   : > { %p4676_p9 = pneg %p4675_p8 }
  0x1c   : > { %p4681_p11 = pnand %p4679_p10, %p4676_p9 }
  0x1e   : > { %4684 = shalt.err (!%p4681_p11)
}
  0x1f   : > { %s4685_s18 = scalar_lea.vmem %s318_s17, 16  ;;  %s4692_s21 = scalar_lea.vmem %s318_s17, 32 }
  0x20   : > { %p4686_p12 = scmp.ne.s32.totalorder %s318_s17, %s4685_s18  ;;  %p4693_p1 = scmp.lt.s32.totalorder %s318_s17, %s318_s17 }
  0x21   : > { %p4694_p4 = scmp.lt.s32.totalorder %s4692_s21, %s4685_s18 }
  0x22   : > { %p4688_p13 = pnand %p4686_p12, %p5057_p7 }
  0x23   : > { %p4695_p2 = por %p4694_p4, %p4693_p1 }
  0x24   : > { %p4689_p0 = pneg %p4688_p13 }
  0x26   : > { %p4696_p3 = pnand %p4695_p2, %p4689_p0 }
  0x28   : > { %4699 = shalt.err (!%p4696_p3)
}
  0x29   : > { %4554 = dma.hbm_to_vmem [thread:$0]  (!%p5043_p5), %s6434_s2, 16, %s318_s17, [#allocation5]  }
  0x2a   : > { %s4700_s29 = scalar_lea.hbm %s6419_s4, 16 }
  0x2b   : > { %p4701_p6 = scmp.ne.s32.totalorder %s6419_s4, %s4700_s29  ;;  %p4707_p2 = scmp.lt.u32.totalorder %s4700_s29, %s6419_s4 }
  0x2d   : > { %p4703_p8 = pnand %p4701_p6, %p5057_p7 }
  0x2f   : > { %p4704_p9 = pneg %p4703_p8 }
  0x31   : > { %p4709_p3 = pnand %p4707_p2, %p4704_p9 }
  0x33   : > { %4712 = shalt.err (!%p4709_p3)
}
  0x34   : > { %s4713_s17 = scalar_lea.vmem %s5039_s22, 16  ;;  %s4720_s21 = scalar_lea.vmem %s5039_s22, 32 }
  0x35   : > { %p4714_p10 = scmp.ne.s32.totalorder %s5039_s22, %s4713_s17  ;;  %p4721_p13 = scmp.lt.s32.totalorder %s5039_s22, %s5039_s22 }
  0x36   : > { %p4722_p0 = scmp.lt.s32.totalorder %s4720_s21, %s4713_s17 }
  0x37   : > { %p4716_p11 = pnand %p4714_p10, %p5057_p7 }
  0x38   : > { %p4723_p1 = por %p4722_p0, %p4721_p13 }
  0x39   : > { %p4717_p12 = pneg %p4716_p11 }
  0x3b   : > { %p4724_p4 = pnand %p4723_p1, %p4717_p12 }
  0x3d   : > { %4727 = shalt.err (!%p4724_p4)
}
  0x3e   : > { %4560 = dma.hbm_to_vmem [thread:$0]  (!%p5043_p5), %s6419_s4, 16, %s5039_s22, [#allocation8]  }
  0x3f   : > { %s4728_s29 = scalar_lea.hbm %s6421_s6, 16 }
  0x40   : > { %p4729_p6 = scmp.ne.s32.totalorder %s6421_s6, %s4728_s29  ;;  %p4735_p2 = scmp.lt.u32.totalorder %s4728_s29, %s6421_s6 }
  0x42   : > { %p4731_p8 = pnand %p4729_p6, %p5057_p7 }
  0x44   : > { %p4732_p9 = pneg %p4731_p8 }
  0x46   : > { %p4737_p3 = pnand %p4735_p2, %p4732_p9 }
  0x48   : > { %4740 = shalt.err (!%p4737_p3)
}
  0x49   : > { %s4741_s22 = scalar_lea.vmem %s5047_s24, 16  ;;  %s4748_s17 = scalar_lea.vmem %s5047_s24, 32 }
  0x4a   : > { %p4742_p10 = scmp.ne.s32.totalorder %s5047_s24, %s4741_s22  ;;  %p4749_p13 = scmp.lt.s32.totalorder %s5047_s24, %s5047_s24 }
  0x4b   : > { %p4750_p0 = scmp.lt.s32.totalorder %s4748_s17, %s4741_s22 }
  0x4c   : > { %p4744_p11 = pnand %p4742_p10, %p5057_p7 }
  0x4d   : > { %p4751_p1 = por %p4750_p0, %p4749_p13 }
  0x4e   : > { %p4745_p12 = pneg %p4744_p11 }
  0x50   : > { %p4752_p4 = pnand %p4751_p1, %p4745_p12 }
  0x52   : > { %4755 = shalt.err (!%p4752_p4)
}
  0x53   : > { %4566 = dma.hbm_to_vmem [thread:$0]  (!%p5043_p5), %s6421_s6, 16, %s5047_s24, [#allocation11]  }
  0x54   : > { %s38_s26 = sadd.s32 1, %s4934_s14  ;;  %s4943_s27 = smov [#allocation2]  }
  0x55   : > { %p40_p6 = scmp.ge.s32.totalorder %s38_s26, 2  ;;  %s306_s28 = sshll.u32 %s4943_s27, 4  ;;  %s307_s28 = int_to_ptr.vmem [resolvable:$true] %s306_s28 }
  0x56   : > { %s6436_s1 = sld [smem:[#allocation20_spill]] }
  0x57   : > { %s6442_s26 = smov (%p40_p6, %s38_s26), 0 }
  0x5c   : > { %s4756_s12 = scalar_lea.hbm %s6436_s1, 64 }
  0x5d   : > { %p4757_p8 = scmp.ne.s32.totalorder %s6436_s1, %s4756_s12  ;;  %p4763_p3 = scmp.lt.u32.totalorder %s4756_s12, %s6436_s1 }
  0x5f   : > { %p4759_p9 = pnand %p4757_p8, %p5057_p7 }
  0x61   : > { %p4760_p2 = pneg %p4759_p9 }
  0x63   : > { %p4765_p10 = pnand %p4763_p3, %p4760_p2 }
  0x65   : > { %4768 = shalt.err (!%p4765_p10)
}
  0x66   : > { %s4769_s17 = scalar_lea.vmem %s307_s28, 64  ;;  %p4777_p0 = scmp.lt.s32.totalorder %s307_s28, %s307_s28 }
  0x67   : > { %p4770_p11 = scmp.ne.s32.totalorder %s307_s28, %s4769_s17  ;;  %p4778_p1 = scmp.lt.s32.totalorder %s4769_s17, %s4769_s17 }
  0x69   : > { %p4772_p12 = pnand %p4770_p11, %p5057_p7  ;;  %p4779_p4 = por %p4778_p1, %p4777_p0 }
  0x6b   : > { %p4773_p13 = pneg %p4772_p12 }
  0x6d   : > { %p4780_p6 = pnand %p4779_p4, %p4773_p13 }
  0x6f   : > { %4783 = shalt.err (!%p4780_p6)
}
  0x70   : > { %4551 = dma.hbm_to_vmem [thread:$0]  (!%p5043_p5), %s6436_s1, 64, %s307_s28, [#allocation3]  }
  0x71   : > { %s4944_s27 = smov [#allocation6]   ;;  %s4784_s16 = scalar_lea.hbm %s6418_s3, 512 }
  0x72   : > { %s327_s29 = sshll.u32 %s4944_s27, 4  ;;  %p4785_p8 = scmp.ne.s32.totalorder %s6418_s3, %s4784_s16  ;;  %s328_s29 = int_to_ptr.vmem [resolvable:$true] %s327_s29 }
  0x73   : > { %p4791_p3 = scmp.lt.u32.totalorder %s4784_s16, %s6418_s3 }
  0x74   : > { %p4787_p9 = pnand %p4785_p8, %p5057_p7 }
  0x76   : > { %p4788_p2 = pneg %p4787_p9 }
  0x78   : > { %p4793_p10 = pnand %p4791_p3, %p4788_p2 }
  0x7a   : > { %4796 = shalt.err (!%p4793_p10)
}
  0x7b   : > { %s4797_s28 = scalar_lea.vmem %s328_s29, 512  ;;  %p4805_p0 = scmp.lt.s32.totalorder %s328_s29, %s328_s29 }
  0x7c   : > { %p4798_p11 = scmp.ne.s32.totalorder %s328_s29, %s4797_s28  ;;  %p4806_p1 = scmp.lt.s32.totalorder %s4797_s28, %s4797_s28 }
  0x7e   : > { %p4800_p12 = pnand %p4798_p11, %p5057_p7  ;;  %p4807_p4 = por %p4806_p1, %p4805_p0 }
  0x80   : > { %p4801_p13 = pneg %p4800_p12 }
  0x82   : > { %p4808_p6 = pnand %p4807_p4, %p4801_p13 }
  0x84   : > { %4811 = shalt.err (!%p4808_p6)
}
  0x85   : > { %s4945_s21 = smov 64   ;;  %s4946_s23 = smov 4  }
  0x86   : > { %4557 = dma.hbm_to_vmem [thread:$0]  (!%p5043_p5), %s6418_s3, 512, %s328_s29, [#allocation5], %s4945_s21, %s4945_s21, %s4946_s23  }
  0x87   : > { %s4947_s12 = smov [#allocation9]   ;;  %s4948_s18 = smov [#allocation12]  }
  0x88   : > { %s351_s16 = sshll.u32 %s4947_s12, 4  ;;  %s375_s22 = sshll.u32 %s4948_s18, 4  ;;  %s352_s16 = int_to_ptr.vmem [resolvable:$true] %s351_s16  ;;  %s5160_s22 = int_to_ptr.vmem [resolvable:$true] %s375_s22 }
  0x89   : > { %s4812_s28 = scalar_lea.hbm %s6420_s5, 512 }
  0x8a   : > { %p4813_p8 = scmp.ne.s32.totalorder %s6420_s5, %s4812_s28  ;;  %p4819_p3 = scmp.lt.u32.totalorder %s4812_s28, %s6420_s5 }
  0x8c   : > { %p4815_p9 = pnand %p4813_p8, %p5057_p7 }
  0x8e   : > { %p4816_p2 = pneg %p4815_p9 }
  0x90   : > { %p4821_p10 = pnand %p4819_p3, %p4816_p2 }
  0x92   : > { %4824 = shalt.err (!%p4821_p10)
}
  0x93   : > { %s4825_s30 = scalar_lea.vmem %s352_s16, 512  ;;  %p4833_p0 = scmp.lt.s32.totalorder %s352_s16, %s352_s16 }
  0x94   : > { %p4826_p11 = scmp.ne.s32.totalorder %s352_s16, %s4825_s30  ;;  %p4834_p1 = scmp.lt.s32.totalorder %s4825_s30, %s4825_s30 }
  0x96   : > { %p4828_p12 = pnand %p4826_p11, %p5057_p7  ;;  %p4835_p4 = por %p4834_p1, %p4833_p0 }
  0x98   : > { %p4829_p13 = pneg %p4828_p12 }
  0x9a   : > { %p4836_p6 = pnand %p4835_p4, %p4829_p13 }
  0x9c   : > { %4839 = shalt.err (!%p4836_p6)
}
  0x9d   : > { %4563 = dma.hbm_to_vmem [thread:$0]  (!%p5043_p5), %s6420_s5, 512, %s352_s16, [#allocation8], %s4945_s21, %s4945_s21, %s4946_s23  }
  0x9e   : > { %s4840_s24 = scalar_lea.hbm %s6422_s7, 8192 }
  0x9f   : > { %p4841_p8 = scmp.ne.s32.totalorder %s6422_s7, %s4840_s24  ;;  %p4847_p3 = scmp.lt.u32.totalorder %s4840_s24, %s6422_s7 }
  0xa1   : > { %p4843_p9 = pnand %p4841_p8, %p5057_p7 }
  0xa3   : > { %p4844_p2 = pneg %p4843_p9 }
  0xa5   : > { %p4849_p10 = pnand %p4847_p3, %p4844_p2 }
  0xa7   : > { %4852 = shalt.err (!%p4849_p10)
}
  0xa8   : > { %s4853_s21 = scalar_lea.vmem %s5160_s22, 8192  ;;  %p4861_p0 = scmp.lt.s32.totalorder %s5160_s22, %s5160_s22 }
  0xa9   : > { %p4854_p11 = scmp.ne.s32.totalorder %s5160_s22, %s4853_s21  ;;  %p4862_p1 = scmp.lt.s32.totalorder %s4853_s21, %s4853_s21 }
  0xab   : > { %p4856_p12 = pnand %p4854_p11, %p5057_p7  ;;  %p4863_p4 = por %p4862_p1, %p4861_p0 }
  0xad   : > { %p4857_p13 = pneg %p4856_p12 }
  0xaf   : > { %p4864_p6 = pnand %p4863_p4, %p4857_p13 }
  0xb1   : > { %4867 = shalt.err (!%p4864_p6)
}
  0xb2   : > { %s4949_s23 = smov 512   ;;  %s4950_s16 = smov 32  }
  0xb3   : > { %4569 = dma.hbm_to_vmem [thread:$0]  (!%p5043_p5), %s6422_s7, 8192, %s5160_s22, [#allocation11], %s4949_s23, %s4949_s23, %s4950_s16  }
  0xb4   : > { %s4951_s2 = smov [#allocation13]   ;;  %s4868_s17 = scalar_lea.hbm %s6423_s8, 128 }
  0xb5   : > { %s389_s12 = sshll.u32 %s4951_s2, 4  ;;  %p4869_p8 = scmp.ne.s32.totalorder %s6423_s8, %s4868_s17  ;;  %s390_s12 = int_to_ptr.vmem [resolvable:$true] %s389_s12 }
  0xb6   : > { %p4875_p3 = scmp.lt.u32.totalorder %s4868_s17, %s6423_s8 }
  0xb7   : > { %p4871_p9 = pnand %p4869_p8, %p5057_p7 }
  0xb9   : > { %p4872_p2 = pneg %p4871_p9 }
  0xbb   : > { %p4877_p10 = pnand %p4875_p3, %p4872_p2 }
  0xbd   : > { %4880 = shalt.err (!%p4877_p10)
}
  0xbe   : > { %s4881_s22 = scalar_lea.vmem %s390_s12, 128  ;;  %p4889_p0 = scmp.lt.s32.totalorder %s390_s12, %s390_s12 }
  0xbf   : > { %p4882_p11 = scmp.ne.s32.totalorder %s390_s12, %s4881_s22  ;;  %p4890_p1 = scmp.lt.s32.totalorder %s4881_s22, %s4881_s22 }
  0xc1   : > { %p4884_p12 = pnand %p4882_p11, %p5057_p7  ;;  %p4891_p4 = por %p4890_p1, %p4889_p0 }
  0xc3   : > { %p4885_p13 = pneg %p4884_p12 }
  0xc5   : > { %p4892_p6 = pnand %p4891_p4, %p4885_p13 }
  0xc7   : > { %4895 = shalt.err (!%p4892_p6)
}
  0xc8   : > { %4572 = dma.hbm_to_vmem [thread:$0]  (!%p5043_p5), %s6423_s8, 128, %s390_s12, [#allocation14]  }
  0xc9   : > { %p6437_p8 = scmp.ne.s32.totalorder %s6432_s20, 0 }
  0xca   : > { %p6438_p9 = scmp.ne.s32.totalorder (!%p6437_p8), %s6431_s19, 0 }
  0xcb   : > { %415 = sbr.rel (%p6437_p8) target bundleno = 1414 (0x586), region = 56 }
  0xd2   : > { %4909 = dma.done.wait (%p6438_p9), [#allocation3], 64  }
  0xd3   : > { %4911 = vsyncadd (%p6438_p9), [#allocation3], 4294967232 }
  0xd4   : > { %4913 = dma.done.wait (%p6438_p9), [#allocation5], 528  }
  0xd5   : > { %4915 = vsyncadd (%p6438_p9), [#allocation5], 4294966768 }
  0xd6   : > { %4917 = dma.done.wait (%p6438_p9), [#allocation8], 528  }
  0xd7   : > { %4919 = vsyncadd (%p6438_p9), [#allocation8], 4294966768 }
  0xd8   : > { %4921 = dma.done.wait (%p6438_p9), [#allocation11], 8208  }
  0xd9   : > { %4923 = vsyncadd (%p6438_p9), [#allocation11], 4294959088 }
  0xda   : > { %4925 = dma.done.wait (%p6438_p9), [#allocation14], 128  }
  0xdb   : > { %4927 = vsyncadd (%p6438_p9), [#allocation14], 4294967168  ;;  %p495_p5 = scmp.lt.s32.totalorder %s4930_s13, 1  ;;  %v4952_v0 = vmov 0   ;;  %v4953_v5 = vmov 1   ;;  %v4954_v7 = vmov 2   ;;  %v720_v38 = vlaneseq }
  0xdc   : > { %4631 = vset.pattern.permute.xlu1 %v4952_v0  ;;  %4630 = vset.pattern.permute.xlu0 %v4952_v0  ;;  %v4663_v9 = vld [vmem:[#allocation6] sm:$0xff]   ;;  %v4664_v11 = vld [vmem:[#allocation6 + $0x8] sm:$0xff]   ;;  %v4665_v12 = vld [vmem:[#allocation6 + $0x10] sm:$0xff]   ;;  %vm1267_vm0 = vcmask 523264  }
  0xdd   : > { %s6444_s13 = smov (!%p495_p5, %s4930_s13), 1  ;;  %4436 = vmatprep.subr.bf16.mxu0 %v4663_v9  ;;  %v4666_v15 = vld [vmem:[#allocation6 + $0x18] sm:$0xff]   ;;  %v5338_v40 = vshrl.u32 %v720_v38, 7 }
  0xde   : > { %s4394_s20 = sshll.u32 %s6444_s13, 8  ;;  %4437 = vmatpush3.bf16.msra.mxu0 %v4663_v9  ;;  %v552_v46 = vld [vmem:[#allocation2] sm:$0x7]  ;;  %v5367_v56 = vld [vmem:[#allocation4] ss:$0 sm:$0xff]  ;;  %s4395_s19 = sshll.u32 %s6444_s13, 11 }
  0xdf   : > { %s5253_s30 = scalar_lea.vmem %s6415_s0, %s4394_s20  ;;  %4438 = vmatprep.subr.bf16.mxu0 %v4664_v11  ;;  %v722_v43 = vsub.s32 0, %v5338_v40  ;;  %v918_v49 = vsub.s32 1, %v5338_v40  ;;  %v1114_v53 = vsub.s32 2, %v5338_v40  ;;  %s5756_s12 = scalar_lea.vmem %s6424_s9, %s4395_s19 }
  0xe0   : > { %v522_v1 = vld [vmem:[%s5253_s30 + $0x10] sm:$0xff]  ;;  %v520_v2 = vld [vmem:[%s5253_s30] sm:$0xff]  ;;  %v523_v3 = vld [vmem:[%s5253_s30 + $0x18] sm:$0xff]  ;;  %s4284_s18 = sshll.u32 %s6444_s13, 3 }
  0xe1   : > { %572 = vperm.xlu1 %4631, %v522_v1   ;;  %562 = vperm.xlu0 %4630, %v520_v2   ;;  %v521_v4 = vld [vmem:[%s5253_s30 + $0x8] sm:$0xff]  ;;  %v528_v8 = vld [vmem:[%s5253_s30 + $0x40] sm:$0xff]  ;;  %v531_v10 = vld [vmem:[%s5253_s30 + $0x58] sm:$0xff]  ;;  %v5352_v48 = vrot.slane %v552_v46, %v722_v43  ;;  %v5362_v54 = vrot.slane %v552_v46, %v918_v49  ;;  %v5376_v62 = vrot.slane %v552_v46, %v1114_v53  ;;  %s518_s17 = scalar_lea.vmem %s6425_s10, %s4284_s18 }
  0xe2   : > { %v525_v6 = vld [vmem:[%s5253_s30 + $0x28] sm:$0xff]  ;;  %4439 = vmatpush3.bf16.msra.mxu0 %v4664_v11  ;;  %v524_v13 = vld [vmem:[%s5253_s30 + $0x20] sm:$0xff]  ;;  %v526_v14 = vld [vmem:[%s5253_s30 + $0x30] sm:$0xff] }
  0xe3   : > { %4440 = vmatprep.subr.bf16.mxu0 %v4665_v12  ;;  %v527_v16 = vld [vmem:[%s5253_s30 + $0x38] sm:$0xff]  ;;  %v529_v17 = vld [vmem:[%s5253_s30 + $0x48] sm:$0xff]  ;;  %v532_v18 = vld [vmem:[%s5253_s30 + $0x60] sm:$0xff] }
  0xe4   : > { %v535_v19 = vld [vmem:[%s5253_s30 + $0x78] sm:$0xff]  ;;  %v5275_v20 = vld [vmem:[%s5253_s30 + $0x88] sm:$0xff]  ;;  %v530_v21 = vld [vmem:[%s5253_s30 + $0x50] sm:$0xff] }
  0xe5   : > { %577 = vperm.xlu1 %4631, %v523_v3   ;;  %567 = vperm.xlu0 %4630, %v521_v4   ;;  %v5285_v22 = vld [vmem:[%s5253_s30 + $0xa0] sm:$0xff]  ;;  %v5290_v23 = vld [vmem:[%s5253_s30 + $0xb8] sm:$0xff]  ;;  %v533_v24 = vld [vmem:[%s5253_s30 + $0x68] sm:$0xff] }
  0xe6   : > { %4441 = vmatpush3.bf16.msra.mxu0 %v4665_v12  ;;  %v5296_v25 = vld [vmem:[%s5253_s30 + $0x80] sm:$0xff]  ;;  %v534_v26 = vld [vmem:[%s5253_s30 + $0x70] sm:$0xff]  ;;  %v5302_v27 = vld [vmem:[%s5253_s30 + $0x98] sm:$0xff] }
  0xe7   : > { %4442 = vmatprep.subr.bf16.mxu0 %v4666_v15  ;;  %v5306_v28 = vld [vmem:[%s5253_s30 + $0xa8] sm:$0xff]  ;;  %v5311_v29 = vld [vmem:[%s5253_s30 + $0xc0] sm:$0xff]  ;;  %v5315_v30 = vld [vmem:[%s5253_s30 + $0xd8] sm:$0xff] }
  0xe8   : > { %v5323_v31 = vld [vmem:[%s5253_s30 + $0xc8] sm:$0xff]  ;;  %v538_v34 = vld [vmem:[%s5253_s30 + $0x90] sm:$0xff]  ;;  %v5332_v37 = vld [vmem:[%s5253_s30 + $0xe0] sm:$0xff] }
  0xe9   : > { %4633 = vset.pattern.permute.xlu1 %v4953_v5  ;;  %4632 = vset.pattern.permute.xlu0 %v4953_v5  ;;  %v5336_v39 = vld [vmem:[%s5253_s30 + $0xf8] sm:$0xff]  ;;  %v5346_v47 = vld [vmem:[%s5253_s30 + $0xe8] sm:$0xff] }
  0xea   : > { %793 = vperm.xlu1 %4633, %v521_v4   ;;  %789 = vperm.xlu0 %4632, %v520_v2  }
  0xeb   : > { %4443 = vmatpush3.bf16.msra.mxu0 %v4666_v15 }
  0xee   : > { %797 = vperm.xlu1 %4633, %v522_v1   ;;  %801 = vperm.xlu0 %4632, %v523_v3  }
  0xf2   : > { %4634 = vset.pattern.permute.xlu1 %v4954_v7  ;;  %809 = vperm.xlu0 %4632, %v525_v6  }
  0xf3   : > { %985 = vperm.xlu1 %4634, %v520_v2  }
  0xf6   : > { %821 = vperm.xlu0 %4632, %v528_v8  }
  0xf7   : > { %993 = vperm.xlu1 %4634, %v522_v1  }
  0xfa   : > { %833 = vperm.xlu0 %4632, %v531_v10  }
  0xfb   : > { %997 = vperm.xlu1 %4634, %v523_v3  }
  0xfe   : > { %4640 = vset.pattern.permute.xlu0 %v4954_v7 }
  0xff   : > { %4635 = vset.pattern.permute.xlu1 %v4952_v0  ;;  %989 = vperm.xlu0 %4640, %v521_v4  }
 0x100   : > { %587 = vperm.xlu1 %4635, %v525_v6  }
 0x103   : > { %1001 = vperm.xlu0 %4640, %v524_v13  }
 0x104   : > { %592 = vperm.xlu1 %4635, %v526_v14  }
 0x107   : > { %1013 = vperm.xlu0 %4640, %v527_v16  }
 0x108   : > { %4636 = vset.pattern.permute.xlu1 %v4953_v5 }
 0x109   : > { %805 = vperm.xlu1 %4636, %v524_v13  }
 0x10b   : > { %1021 = vperm.xlu0 %4640, %v529_v17  }
 0x10d   : > { %813 = vperm.xlu1 %4636, %v526_v14  }
 0x10f   : > { %1033 = vperm.xlu0 %4640, %v532_v18  }
 0x111   : > { %817 = vperm.xlu1 %4636, %v527_v16  }
 0x113   : > { %1045 = vperm.xlu0 %4640, %v535_v19  }
 0x115   : > { %4637 = vset.pattern.permute.xlu1 %v4954_v7 }
 0x116   : > { %1005 = vperm.xlu1 %4637, %v525_v6  }
 0x117   : > { %1053 = vperm.xlu0 %4640, %v5275_v20  }
 0x11a   : > { %1009 = vperm.xlu1 %4637, %v526_v14  }
 0x11b   : > { %4648 = vset.pattern.permute.xlu0 %v4952_v0 }
 0x11c   : > { %582 = vperm.xlu0 %4648, %v524_v13  }
 0x11e   : > { %4638 = vset.pattern.permute.xlu1 %v4952_v0 }
 0x11f   : > { %602 = vperm.xlu1 %4638, %v528_v8  }
 0x120   : > { %597 = vperm.xlu0 %4648, %v527_v16  }
 0x123   : > { %612 = vperm.xlu1 %4638, %v530_v21  }
 0x124   : > { %607 = vperm.xlu0 %4648, %v529_v17  }
 0x127   : > { %617 = vperm.xlu1 %4638, %v531_v10  }
 0x128   : > { %622 = vperm.xlu0 %4648, %v532_v18  }
 0x12b   : > { %4639 = vset.pattern.permute.xlu1 %v4953_v5 }
 0x12c   : > { %825 = vperm.xlu1 %4639, %v529_v17   ;;  %637 = vperm.xlu0 %4648, %v535_v19  }
 0x130   : > { %829 = vperm.xlu1 %4639, %v530_v21   ;;  %647 = vperm.xlu0 %4648, %v5275_v20  }
 0x134   : > { %4641 = vset.pattern.permute.xlu1 %v4954_v7  ;;  %662 = vperm.xlu0 %4648, %v5285_v22  }
 0x135   : > { %1017 = vperm.xlu1 %4641, %v528_v8  }
 0x138   : > { %677 = vperm.xlu0 %4648, %v5290_v23  }
 0x139   : > { %1025 = vperm.xlu1 %4641, %v530_v21  }
 0x13c   : > { %4650 = vset.pattern.permute.xlu0 %v4953_v5 }
 0x13d   : > { %1029 = vperm.xlu1 %4641, %v531_v10   ;;  %841 = vperm.xlu0 %4650, %v533_v24  }
 0x141   : > { %4642 = vset.pattern.permute.xlu1 %v4952_v0  ;;  %853 = vperm.xlu0 %4650, %v5296_v25  }
 0x142   : > { %627 = vperm.xlu1 %4642, %v533_v24  }
 0x145   : > { %865 = vperm.xlu0 %4650, %v5302_v27  }
 0x146   : > { %632 = vperm.xlu1 %4642, %v534_v26  }
 0x149   : > { %873 = vperm.xlu0 %4650, %v5306_v28  }
 0x14a   : > { %4643 = vset.pattern.permute.xlu1 %v4953_v5 }
 0x14b   : > { %837 = vperm.xlu1 %4643, %v532_v18  }
 0x14d   : > { %885 = vperm.xlu0 %4650, %v5311_v29  }
 0x14f   : > { %845 = vperm.xlu1 %4643, %v534_v26  }
 0x151   : > { %897 = vperm.xlu0 %4650, %v5315_v30  }
 0x153   : > { %849 = vperm.xlu1 %4643, %v535_v19  }
 0x155   : > { %4655 = vset.pattern.permute.xlu0 %v4954_v7 }
 0x156   : > { %1065 = vperm.xlu0 %4655, %v5285_v22  }
 0x157   : > { %4644 = vset.pattern.permute.xlu1 %v4954_v7 }
 0x158   : > { %1037 = vperm.xlu1 %4644, %v533_v24  }
 0x15a   : > { %1077 = vperm.xlu0 %4655, %v5290_v23  }
 0x15c   : > { %1041 = vperm.xlu1 %4644, %v534_v26  }
 0x15e   : > { %1085 = vperm.xlu0 %4655, %v5323_v31  }
 0x160   : > { %v573_v32 = vpop.permute.xlu1 %572  ;;  %4645 = vset.pattern.permute.xlu1 %v4952_v0  ;;  %v563_v33 = vpop.permute.xlu0 %562 }
 0x161   : > { %642 = vperm.xlu1 %4645, %v5296_v25   ;;  %v724_v52 = vmul.f32 %v5352_v48, %v563_v33  ;;  %v726_v63 = vmul.f32 %v5352_v48, %v573_v32 }
 0x162   : > { %4657 = vset.pattern.permute.xlu0 %v4952_v0 }
 0x163   : > { %687 = vperm.xlu0 %4657, %v5323_v31   ;;  %v756_v60 = vadd.f32 %v5367_v56, %v724_v52  ;;  %v758_v13 = vadd.f32 %v5367_v56, %v726_v63 }
 0x164   : > { %v578_v35 = vpop.permute.xlu1 %577  ;;  %v568_v36 = vpop.permute.xlu0 %567 }
 0x165   : > { %652 = vperm.xlu1 %4645, %v538_v34   ;;  %v727_v57 = vmul.f32 %v5352_v48, %v578_v35  ;;  %v725_v58 = vmul.f32 %v5352_v48, %v568_v36 }
 0x167   : > { %702 = vperm.xlu0 %4657, %v5332_v37   ;;  %v759_v3 = vadd.f32 %v5367_v56, %v727_v57  ;;  %v757_v4 = vadd.f32 %v5367_v56, %v725_v58 }
 0x169   : > { %v794_v41 = vpop.permute.xlu1 %793  ;;  %657 = vperm.xlu1 %4645, %v5302_v27   ;;  %v790_v42 = vpop.permute.xlu0 %789 }
 0x16a   : > { %v920_v61 = vmul.f32 %v5362_v54, %v790_v42  ;;  %v921_v9 = vmul.f32 %v5362_v54, %v794_v41  ;;  %v542_v42 = vld [vmem:[%s5253_s30 + $0xb0] sm:$0xff] }
 0x16b   : > { %717 = vperm.xlu0 %4657, %v5336_v39  }
 0x16c   : > { %v952_v10 = vadd.f32 %v920_v61, %v756_v60  ;;  %v953_v19 = vadd.f32 %v921_v9, %v757_v4 }
 0x16d   : > { %v798_v44 = vpop.permute.xlu1 %797  ;;  %4646 = vset.pattern.permute.xlu1 %v4953_v5  ;;  %v802_v45 = vpop.permute.xlu0 %801 }
 0x16e   : > { %857 = vperm.xlu1 %4646, %v5275_v20   ;;  %v923_v1 = vmul.f32 %v5362_v54, %v802_v45  ;;  %v922_v6 = vmul.f32 %v5362_v54, %v798_v44 }
 0x16f   : > { %4660 = vset.pattern.permute.xlu0 %v4953_v5 }
 0x170   : > { %905 = vperm.xlu0 %4660, %v5346_v47   ;;  %v955_v14 = vadd.f32 %v923_v1, %v759_v3  ;;  %v954_v16 = vadd.f32 %v922_v6, %v758_v13 }
 0x171   : > { %v5355_v50 = vpop.permute.xlu0 %809 }
 0x172   : > { %861 = vperm.xlu1 %4646, %v538_v34   ;;  %v986_v51 = vpop.permute.xlu1 %985  ;;  %v925_v1 = vmul.f32 %v5362_v54, %v5355_v50 }
 0x173   : > { %v1116_v11 = vmul.f32 %v5376_v62, %v986_v51 }
 0x174   : > { %4661 = vset.pattern.permute.xlu0 %v4954_v7 }
 0x175   : > { %v5364_v55 = vpop.permute.xlu0 %821  ;;  %1097 = vperm.xlu0 %4661, %v5332_v37   ;;  %v1148_v20 = vadd.f32 %v1116_v11, %v952_v10 }
 0x176   : > { %4647 = vset.pattern.permute.xlu1 %v4954_v7  ;;  %v994_v59 = vpop.permute.xlu1 %993 }
 0x177   : > { %1049 = vperm.xlu1 %4647, %v5296_v25   ;;  %v1118_v15 = vmul.f32 %v5376_v62, %v994_v59  ;;  %v1180_v36 = vmax.f32 %v1148_v20, 0.0 }
 0x179   : > { %v5381_v2 = vpop.permute.xlu0 %833  ;;  %1109 = vperm.xlu0 %4661, %v5336_v39   ;;  %v1150_v25 = vadd.f32 %v1118_v15, %v954_v16 }
 0x17a   : > { %v998_v8 = vpop.permute.xlu1 %997 }
 0x17b   : > { %v1119_v12 = vmul.f32 %v5376_v62, %v998_v8  ;;  %1057 = vperm.xlu1 %4647, %v538_v34   ;;  %v1182_v38 = vmax.f32 %v1150_v25, 0.0 }
 0x17d   : > { %v1151_v17 = vadd.f32 %v1119_v12, %v955_v14 }
 0x17e   : > { %v990_v18 = vpop.permute.xlu0 %989 }
 0x17f   : > { %v1117_v21 = vmul.f32 %v5376_v62, %v990_v18  ;;  %1061 = vperm.xlu1 %4647, %v5302_v27   ;;  %v588_v24 = vpop.permute.xlu1 %587  ;;  %v1183_v32 = vmax.f32 %v1151_v17, 0.0 }
 0x180   : > { %v729_v60 = vmul.f32 %v5352_v48, %v588_v24 }
 0x181   : > { %v1149_v26 = vadd.f32 %v1117_v21, %v953_v19  ;;  %v1213_v44 = vpack.c.bf16 %v1183_v32, %v1182_v38 }
 0x182   : > { %v1002_v33 = vpop.permute.xlu0 %1001 }
 0x183   : > { %v1181_v34 = vmax.f32 %v1149_v26, 0.0  ;;  %4649 = vset.pattern.permute.xlu1 %v4952_v0  ;;  %v593_v35 = vpop.permute.xlu1 %592  ;;  %v1120_v8 = vmul.f32 %v5376_v62, %v1002_v33 }
 0x184   : > { %667 = vperm.xlu1 %4649, %v5306_v28   ;;  %v730_v3 = vmul.f32 %v5352_v48, %v593_v35  ;;  %v546_v35 = vld [vmem:[%s5253_s30 + $0xd0] sm:$0xff] }
 0x185   : > { %v1212_v41 = vpack.c.bf16 %v1181_v34, %v1180_v36 }
 0x186   : > { %v1014_v45 = vpop.permute.xlu0 %1013 }
 0x187   : > { %4444 = vmatprep.mubr.msk.bf16.mxu0 %vm1267_vm0, %v1212_v41  ;;  %v1123_v18 = vmul.f32 %v5376_v62, %v1014_v45 }
 0x188   : > { %672 = vperm.xlu1 %4649, %v542_v42   ;;  %v806_v27 = vpop.permute.xlu1 %805  ;;  %4445 = vmatmul.mubr.msk.bf16.vlgmr.msra.gmra.mrb[0].mxu0 %vm1267_vm0, %v1213_v44 }
 0x189   : > { %v924_v9 = vmul.f32 %v5362_v54, %v806_v27 }
 0x18a   : > { %v5399_v46 = vpop.permute.xlu0 %1021 }
 0x18c   : > { %4651 = vset.pattern.permute.xlu1 %v4953_v5  ;;  %v814_v51 = vpop.permute.xlu1 %813 }
 0x18d   : > { %869 = vperm.xlu1 %4651, %v5285_v22   ;;  %v761_v22 = vadd.f32 %v5367_v56, %v729_v60  ;;  %v926_v10 = vmul.f32 %v5362_v54, %v814_v51 }
 0x18e   : > { %v5403_v52 = vpop.permute.xlu0 %1033 }
 0x18f   : > { %v957_v11 = vadd.f32 %v925_v1, %v761_v22  ;;  %v928_v22 = vmul.f32 %v5362_v54, %v5364_v55 }
 0x190   : > { %v818_v57 = vpop.permute.xlu1 %817 }
 0x191   : > { %877 = vperm.xlu1 %4651, %v542_v42   ;;  %v927_v20 = vmul.f32 %v5362_v54, %v818_v57 }
 0x192   : > { %v5405_v58 = vpop.permute.xlu0 %1045 }
 0x195   : > { %881 = vperm.xlu1 %4651, %v5290_v23   ;;  %v1006_v59 = vpop.permute.xlu1 %1005 }
 0x196   : > { %v5409_v61 = vpop.permute.xlu0 %1053  ;;  %v1121_v23 = vmul.f32 %v5376_v62, %v1006_v59 }
 0x198   : > { %v1153_v14 = vadd.f32 %v1121_v23, %v957_v11 }
 0x199   : > { %4652 = vset.pattern.permute.xlu1 %v4954_v7  ;;  %v1010_v63 = vpop.permute.xlu1 %1009 }
 0x19a   : > { %1069 = vperm.xlu1 %4652, %v5306_v28   ;;  %v762_v28 = vadd.f32 %v5367_v56, %v730_v3  ;;  %v1122_v15 = vmul.f32 %v5376_v62, %v1010_v63  ;;  %v1185_v26 = vmax.f32 %v1153_v14, 0.0  ;;  %v1125_v3 = vmul.f32 %v5376_v62, %v5399_v46 }
 0x19b   : > { %v583_v4 = vpop.permute.xlu0 %582  ;;  %v931_v46 = vmul.f32 %v5362_v54, %v5381_v2 }
 0x19c   : > { %v728_v6 = vmul.f32 %v5352_v48, %v583_v4  ;;  %v958_v19 = vadd.f32 %v926_v10, %v762_v28 }
 0x19e   : > { %v760_v50 = vadd.f32 %v5367_v56, %v728_v6  ;;  %1073 = vperm.xlu1 %4652, %v542_v42   ;;  %v603_v12 = vpop.permute.xlu1 %602  ;;  %v1154_v32 = vadd.f32 %v1122_v15, %v958_v19 }
 0x19f   : > { %v598_v13 = vpop.permute.xlu0 %597  ;;  %v732_v59 = vmul.f32 %v5352_v48, %v603_v12 }
 0x1a0   : > { %v956_v16 = vadd.f32 %v924_v9, %v760_v50  ;;  %v731_v17 = vmul.f32 %v5352_v48, %v598_v13  ;;  %v1186_v44 = vmax.f32 %v1154_v32, 0.0 }
 0x1a1   : > { %v764_v4 = vadd.f32 %v5367_v56, %v732_v59 }
 0x1a2   : > { %v1152_v21 = vadd.f32 %v1120_v8, %v956_v16  ;;  %v763_v24 = vadd.f32 %v5367_v56, %v731_v17  ;;  %4653 = vset.pattern.permute.xlu1 %v4952_v0  ;;  %v613_v25 = vpop.permute.xlu1 %612 }
 0x1a3   : > { %682 = vperm.xlu1 %4653, %v5311_v29   ;;  %v608_v42 = vpop.permute.xlu0 %607  ;;  %v734_v8 = vmul.f32 %v5352_v48, %v613_v25  ;;  %v960_v50 = vadd.f32 %v928_v22, %v764_v4 }
 0x1a4   : > { %v1184_v33 = vmax.f32 %v1152_v21, 0.0  ;;  %v959_v34 = vadd.f32 %v927_v20, %v763_v24  ;;  %v733_v27 = vmul.f32 %v5352_v48, %v608_v42 }
 0x1a5   : > { %v766_v28 = vadd.f32 %v5367_v56, %v734_v8  ;;  %v1131_v8 = vmul.f32 %v5376_v62, %v5405_v58 }
 0x1a6   : > { %v1155_v36 = vadd.f32 %v1123_v18, %v959_v34  ;;  %v618_v38 = vpop.permute.xlu1 %617  ;;  %v1214_v41 = vpack.c.bf16 %v1185_v26, %v1184_v33  ;;  %v765_v60 = vadd.f32 %v5367_v56, %v733_v27 }
 0x1a7   : > { %692 = vperm.xlu1 %4653, %v546_v35   ;;  %v623_v6 = vpop.permute.xlu0 %622  ;;  %v735_v10 = vmul.f32 %v5352_v48, %v618_v38 }
 0x1a8   : > { %v1187_v45 = vmax.f32 %v1155_v36, 0.0  ;;  %4448 = vmatprep.mubr.msk.bf16.mxu0 %vm1267_vm0, %v1214_v41 }
 0x1a9   : > { %v767_v14 = vadd.f32 %v5367_v56, %v735_v10 }
 0x1aa   : > { %v1215_v51 = vpack.c.bf16 %v1187_v45, %v1186_v44  ;;  %v736_v44 = vmul.f32 %v5352_v48, %v623_v6 }
 0x1ab   : > { %697 = vperm.xlu1 %4653, %v5315_v30   ;;  %v826_v57 = vpop.permute.xlu1 %825  ;;  %v638_v16 = vpop.permute.xlu0 %637  ;;  %v963_v25 = vadd.f32 %v931_v46, %v767_v14 }
 0x1ac   : > { %4449 = vmatmul.mubr.msk.bf16.gmra.mrb[4].mxu0 %vm1267_vm0, %v1215_v51  ;;  %v929_v63 = vmul.f32 %v5362_v54, %v826_v57  ;;  %v768_v27 = vadd.f32 %v5367_v56, %v736_v44  ;;  %v739_v57 = vmul.f32 %v5352_v48, %v638_v16  ;;  %v4669_v16 = vld [vmem:[#allocation9 + $0x10] sm:$0xff]  }
 0x1ae   : > { %v961_v23 = vadd.f32 %v929_v63, %v765_v60 }
 0x1af   : > { %4654 = vset.pattern.permute.xlu1 %v4953_v5  ;;  %v830_v1 = vpop.permute.xlu1 %829  ;;  %v5459_v26 = vpop.permute.xlu0 %647 }
 0x1b0   : > { %889 = vperm.xlu1 %4654, %v5323_v31   ;;  %v1157_v11 = vadd.f32 %v1125_v3, %v961_v23  ;;  %v930_v12 = vmul.f32 %v5362_v54, %v830_v1  ;;  %v1128_v1 = vmul.f32 %v5376_v62, %v5403_v52 }
 0x1b2   : > { %v1189_v15 = vmax.f32 %v1157_v11, 0.0  ;;  %v962_v19 = vadd.f32 %v930_v12, %v766_v28  ;;  %v4668_v12 = vld [vmem:[#allocation9 + $0x8] sm:$0xff]  }
 0x1b3   : > { %v5462_v38 = vpop.permute.xlu0 %662 }
 0x1b4   : > { %893 = vperm.xlu1 %4654, %v546_v35   ;;  %v1018_v9 = vpop.permute.xlu1 %1017 }
 0x1b5   : > { %v1124_v31 = vmul.f32 %v5376_v62, %v1018_v9 }
 0x1b7   : > { %v1156_v55 = vadd.f32 %v1124_v31, %v960_v50  ;;  %v5469_v45 = vpop.permute.xlu0 %677 }
 0x1b8   : > { %4656 = vset.pattern.permute.xlu1 %v4954_v7  ;;  %v1026_v13 = vpop.permute.xlu1 %1025 }
 0x1b9   : > { %v1188_v17 = vmax.f32 %v1156_v55, 0.0  ;;  %v1126_v18 = vmul.f32 %v5376_v62, %v1026_v13  ;;  %1081 = vperm.xlu1 %4656, %v5311_v29  }
 0x1bb   : > { %v1216_v20 = vpack.c.bf16 %v1189_v15, %v1188_v17  ;;  %v1158_v24 = vadd.f32 %v1126_v18, %v962_v19 }
 0x1bc   : > { %v1030_v21 = vpop.permute.xlu1 %1029  ;;  %v842_v60 = vpop.permute.xlu0 %841 }
 0x1bd   : > { %v1127_v2 = vmul.f32 %v5376_v62, %v1030_v21  ;;  %1089 = vperm.xlu1 %4656, %v546_v35   ;;  %4452 = vmatprep.mubr.msk.bf16.mxu0 %vm1267_vm0, %v1216_v20  ;;  %v1190_v33 = vmax.f32 %v1158_v24, 0.0  ;;  %v550_v35 = vld [vmem:[%s5253_s30 + $0xf0] sm:$0xff]  ;;  %v933_v4 = vmul.f32 %v5362_v54, %v842_v60 }
 0x1bf   : > { %v1159_v32 = vadd.f32 %v1127_v2, %v963_v25 }
 0x1c1   : > { %v1191_v34 = vmax.f32 %v1159_v32, 0.0  ;;  %1093 = vperm.xlu1 %4656, %v5315_v30   ;;  %v628_v36 = vpop.permute.xlu1 %627 }
 0x1c2   : > { %v737_v59 = vmul.f32 %v5352_v48, %v628_v36 }
 0x1c3   : > { %v1217_v29 = vpack.c.bf16 %v1191_v34, %v1190_v33 }
 0x1c4   : > { %v769_v3 = vadd.f32 %v5367_v56, %v737_v59 }
 0x1c5   : > { %4658 = vset.pattern.permute.xlu1 %v4952_v0  ;;  %v633_v41 = vpop.permute.xlu1 %632  ;;  %4453 = vmatmul.mubr.msk.bf16.gmra.mrb[8].mxu0 %vm1267_vm0, %v1217_v29  ;;  %v854_v29 = vpop.permute.xlu0 %853 }
 0x1c6   : > { %707 = vperm.xlu1 %4658, %v5346_v47   ;;  %v738_v6 = vmul.f32 %v5352_v48, %v633_v41  ;;  %v965_v10 = vadd.f32 %v933_v4, %v769_v3 }
 0x1c8   : > { %v770_v55 = vadd.f32 %v5367_v56, %v738_v6 }
 0x1c9   : > { %v866_v59 = vpop.permute.xlu0 %865 }
 0x1ca   : > { %712 = vperm.xlu1 %4658, %v550_v35   ;;  %v838_v42 = vpop.permute.xlu1 %837  ;;  %v939_v3 = vmul.f32 %v5362_v54, %v866_v59 }
 0x1cb   : > { %v932_v51 = vmul.f32 %v5362_v54, %v838_v42  ;;  %v936_v42 = vmul.f32 %v5362_v54, %v854_v29 }
 0x1cd   : > { %v964_v22 = vadd.f32 %v932_v51, %v768_v27 }
 0x1ce   : > { %4659 = vset.pattern.permute.xlu1 %v4953_v5  ;;  %v846_v30 = vpop.permute.xlu1 %845  ;;  %v771_v5 = vadd.f32 %v5367_v56, %v739_v57 }
 0x1cf   : > { %901 = vperm.xlu1 %4659, %v5332_v37   ;;  %v4667_v37 = vld [vmem:[#allocation9] sm:$0xff]   ;;  %v1160_v9 = vadd.f32 %v1128_v1, %v964_v22  ;;  %v934_v11 = vmul.f32 %v5362_v54, %v846_v30  ;;  %v1133_v30 = vmul.f32 %v5376_v62, %v5409_v61 }
 0x1d0   : > { %4476 = vmatprep.subr.bf16.mxu1 %v4667_v37 }
 0x1d1   : > { %4477 = vmatpush3.bf16.msra.mxu1 %v4667_v37  ;;  %v1192_v28 = vmax.f32 %v1160_v9, 0.0  ;;  %v966_v13 = vadd.f32 %v934_v11, %v770_v55 }
 0x1d2   : > { %v850_v63 = vpop.permute.xlu1 %849  ;;  %4478 = vmatprep.subr.bf16.mxu1 %v4668_v12 }
 0x1d3   : > { %909 = vperm.xlu1 %4659, %v550_v35   ;;  %v935_v23 = vmul.f32 %v5362_v54, %v850_v63 }
 0x1d5   : > { %v967_v50 = vadd.f32 %v935_v23, %v771_v5  ;;  %4479 = vmatpush3.bf16.msra.mxu1 %v4668_v12 }
 0x1d6   : > { %4480 = vmatprep.subr.bf16.mxu1 %v4669_v16 }
 0x1d7   : > { %913 = vperm.xlu1 %4659, %v5336_v39   ;;  %v1038_v52 = vpop.permute.xlu1 %1037  ;;  %v1163_v39 = vadd.f32 %v1131_v8, %v967_v50 }
 0x1d8   : > { %v1129_v31 = vmul.f32 %v5376_v62, %v1038_v52 }
 0x1d9   : > { %4481 = vmatpush3.bf16.msra.mxu1 %v4669_v16  ;;  %v1195_v19 = vmax.f32 %v1163_v39, 0.0  ;;  %v744_v16 = vmul.f32 %v5352_v48, %v5462_v38 }
 0x1da   : > { %v1161_v46 = vadd.f32 %v1129_v31, %v965_v10  ;;  %v874_v31 = vpop.permute.xlu0 %873 }
 0x1db   : > { %4662 = vset.pattern.permute.xlu1 %v4954_v7  ;;  %v1042_v58 = vpop.permute.xlu1 %1041  ;;  %v4670_v7 = vld [vmem:[#allocation9 + $0x18] sm:$0xff]  }
 0x1dc   : > { %v1193_v14 = vmax.f32 %v1161_v46, 0.0  ;;  %v1130_v15 = vmul.f32 %v5376_v62, %v1042_v58  ;;  %1101 = vperm.xlu1 %4662, %v5346_v47   ;;  %4482 = vmatprep.subr.bf16.mxu1 %v4670_v7  ;;  %v741_v47 = vmul.f32 %v5352_v48, %v5459_v26 }
 0x1dd   : > { %4483 = vmatpush3.bf16.msra.mxu1 %v4670_v7  ;;  %v747_v7 = vmul.f32 %v5352_v48, %v5469_v45 }
 0x1de   : > { %v1218_v17 = vpack.c.bf16 %v1193_v14, %v1192_v28  ;;  %v1162_v18 = vadd.f32 %v1130_v15, %v966_v13  ;;  %v773_v33 = vadd.f32 %v5367_v56, %v741_v47  ;;  %v886_v13 = vpop.permute.xlu0 %885  ;;  %v941_v47 = vmul.f32 %v5362_v54, %v874_v31 }
 0x1e0   : > { %v1194_v20 = vmax.f32 %v1162_v18, 0.0  ;;  %1105 = vperm.xlu1 %4662, %v550_v35   ;;  %v643_v21 = vpop.permute.xlu1 %642  ;;  %4456 = vmatprep.mubr.msk.bf16.mxu0 %vm1267_vm0, %v1218_v17 }
 0x1e1   : > { %v740_v34 = vmul.f32 %v5352_v48, %v643_v21  ;;  %v776_v21 = vadd.f32 %v5367_v56, %v744_v16 }
 0x1e2   : > { %v1219_v24 = vpack.c.bf16 %v1195_v19, %v1194_v20  ;;  %v5515_v14 = vpop.permute.xlu0 %897 }
 0x1e3   : > { %v772_v35 = vadd.f32 %v5367_v56, %v740_v34  ;;  %v779_v34 = vadd.f32 %v5367_v56, %v747_v7 }
 0x1e4   : > { %v653_v25 = vpop.permute.xlu1 %652  ;;  %4457 = vmatmul.mubr.msk.bf16.gmra.mrb[12].mxu0 %vm1267_vm0, %v1219_v24 }
 0x1e5   : > { %v742_v27 = vmul.f32 %v5352_v48, %v653_v25  ;;  %v968_v51 = vadd.f32 %v936_v42, %v772_v35 }
 0x1e6   : > { %v1066_v20 = vpop.permute.xlu0 %1065 }
 0x1e7   : > { %v774_v5 = vadd.f32 %v5367_v56, %v742_v27 }
 0x1e8   : > { %v658_v2 = vpop.permute.xlu1 %657 }
 0x1e9   : > { %v743_v57 = vmul.f32 %v5352_v48, %v658_v2  ;;  %v1136_v2 = vmul.f32 %v5376_v62, %v1066_v20 }
 0x1eb   : > { %v775_v61 = vadd.f32 %v5367_v56, %v743_v57 }
 0x1ed   : > { %v858_v32 = vpop.permute.xlu1 %857  ;;  %v971_v10 = vadd.f32 %v939_v3, %v775_v61 }
 0x1ee   : > { %v937_v36 = vmul.f32 %v5362_v54, %v858_v32 }
 0x1f0   : > { %v969_v44 = vadd.f32 %v937_v36, %v773_v33  ;;  %v1078_v33 = vpop.permute.xlu0 %1077 }
 0x1f1   : > { %v862_v41 = vpop.permute.xlu1 %861 }
 0x1f2   : > { %v1165_v60 = vadd.f32 %v1133_v30, %v969_v44  ;;  %v938_v1 = vmul.f32 %v5362_v54, %v862_v41  ;;  %v1139_v41 = vmul.f32 %v5376_v62, %v1078_v33 }
 0x1f4   : > { %v1197_v23 = vmax.f32 %v1165_v60, 0.0  ;;  %v970_v8 = vadd.f32 %v938_v1, %v774_v5 }
 0x1f6   : > { %v1050_v26 = vpop.permute.xlu1 %1049 }
 0x1f7   : > { %v1132_v63 = vmul.f32 %v5376_v62, %v1050_v26 }
 0x1f9   : > { %v1164_v22 = vadd.f32 %v1132_v63, %v968_v51 }
 0x1fa   : > { %v1058_v4 = vpop.permute.xlu1 %1057 }
 0x1fb   : > { %v1196_v37 = vmax.f32 %v1164_v22, 0.0  ;;  %v1134_v6 = vmul.f32 %v5376_v62, %v1058_v4 }
 0x1fd   : > { %v1220_v9 = vpack.c.bf16 %v1197_v23, %v1196_v37  ;;  %v1166_v11 = vadd.f32 %v1134_v6, %v970_v8  ;;  %v1086_v37 = vpop.permute.xlu0 %1085 }
 0x1fe   : > { %v1062_v52 = vpop.permute.xlu1 %1061 }
 0x1ff   : > { %v1135_v50 = vmul.f32 %v5376_v62, %v1062_v52  ;;  %4460 = vmatprep.mubr.msk.bf16.mxu0 %vm1267_vm0, %v1220_v9  ;;  %v1198_v55 = vmax.f32 %v1166_v11, 0.0 }
 0x201   : > { %v1167_v12 = vadd.f32 %v1135_v50, %v971_v10  ;;  %v688_v9 = vpop.permute.xlu0 %687 }
 0x202   : > { %v749_v52 = vmul.f32 %v5352_v48, %v688_v9 }
 0x203   : > { %v1199_v46 = vmax.f32 %v1167_v12, 0.0  ;;  %v668_v28 = vpop.permute.xlu1 %667 }
 0x204   : > { %v745_v19 = vmul.f32 %v5352_v48, %v668_v28  ;;  %v781_v50 = vadd.f32 %v5367_v56, %v749_v52 }
 0x205   : > { %v1221_v58 = vpack.c.bf16 %v1199_v46, %v1198_v55  ;;  %v1141_v46 = vmul.f32 %v5376_v62, %v1086_v37 }
 0x206   : > { %v777_v32 = vadd.f32 %v5367_v56, %v745_v19 }
 0x207   : > { %v673_v39 = vpop.permute.xlu1 %672  ;;  %4461 = vmatmul.mubr.msk.bf16.gmra.mrb[16].mxu0 %vm1267_vm0, %v1221_v58  ;;  %v944_v58 = vmul.f32 %v5362_v54, %v886_v13 }
 0x208   : > { %v746_v36 = vmul.f32 %v5352_v48, %v673_v39  ;;  %v973_v44 = vadd.f32 %v941_v47, %v777_v32  ;;  %v947_v32 = vmul.f32 %v5362_v54, %v5515_v14 }
 0x20a   : > { %v778_v27 = vadd.f32 %v5367_v56, %v746_v36 }
 0x20c   : > { %v870_v15 = vpop.permute.xlu1 %869 }
 0x20d   : > { %v940_v18 = vmul.f32 %v5362_v54, %v870_v15 }
 0x20f   : > { %v972_v25 = vadd.f32 %v940_v18, %v776_v21 }
 0x210   : > { %v878_v17 = vpop.permute.xlu1 %877 }
 0x211   : > { %v1168_v29 = vadd.f32 %v1136_v2, %v972_v25  ;;  %v942_v45 = vmul.f32 %v5362_v54, %v878_v17 }
 0x213   : > { %v1200_v51 = vmax.f32 %v1168_v29, 0.0  ;;  %v974_v59 = vadd.f32 %v942_v45, %v778_v27  ;;  %v703_v45 = vpop.permute.xlu0 %702 }
 0x214   : > { %v882_v24 = vpop.permute.xlu1 %881 }
 0x215   : > { %v943_v38 = vmul.f32 %v5362_v54, %v882_v24 }
 0x217   : > { %v975_v42 = vadd.f32 %v943_v38, %v779_v34 }
 0x219   : > { %v1070_v35 = vpop.permute.xlu1 %1069  ;;  %v1171_v60 = vadd.f32 %v1139_v41, %v975_v42 }
 0x21a   : > { %v1137_v30 = vmul.f32 %v5376_v62, %v1070_v35 }
 0x21b   : > { %v1203_v3 = vmax.f32 %v1171_v60, 0.0 }
 0x21c   : > { %v1169_v26 = vadd.f32 %v1137_v30, %v973_v44 }
 0x21d   : > { %v1074_v57 = vpop.permute.xlu1 %1073 }
 0x21e   : > { %v1201_v63 = vmax.f32 %v1169_v26, 0.0  ;;  %v1138_v1 = vmul.f32 %v5376_v62, %v1074_v57 }
 0x220   : > { %v1222_v22 = vpack.c.bf16 %v1201_v63, %v1200_v51  ;;  %v1170_v5 = vadd.f32 %v1138_v1, %v974_v59  ;;  %v718_v51 = vpop.permute.xlu0 %717  ;;  %v752_v59 = vmul.f32 %v5352_v48, %v703_v45 }
 0x222   : > { %v1202_v4 = vmax.f32 %v1170_v5, 0.0  ;;  %v683_v61 = vpop.permute.xlu1 %682  ;;  %4464 = vmatprep.mubr.msk.bf16.mxu0 %vm1267_vm0, %v1222_v22  ;;  %v784_v5 = vadd.f32 %v5367_v56, %v752_v59 }
 0x223   : > { %v748_v11 = vmul.f32 %v5352_v48, %v683_v61 }
 0x224   : > { %v1223_v23 = vpack.c.bf16 %v1203_v3, %v1202_v4  ;;  %v906_v57 = vpop.permute.xlu0 %905  ;;  %v755_v3 = vmul.f32 %v5352_v48, %v718_v51 }
 0x225   : > { %v780_v55 = vadd.f32 %v5367_v56, %v748_v11  ;;  %v5567_v11 = vld [vmem:[#allocation7] ss:$0 sm:$0xff] }
 0x226   : > { %v693_v6 = vpop.permute.xlu1 %692  ;;  %4465 = vmatmul.mubr.msk.bf16.gmra.mrb[20].mxu0 %vm1267_vm0, %v1223_v23  ;;  %v787_v52 = vadd.f32 %v5367_v56, %v755_v3 }
 0x227   : > { %v750_v39 = vmul.f32 %v5352_v48, %v693_v6  ;;  %v976_v18 = vadd.f32 %v944_v58, %v780_v55 }
 0x228   : > { %v1098_v22 = vpop.permute.xlu0 %1097 }
 0x229   : > { %v782_v7 = vadd.f32 %v5367_v56, %v750_v39  ;;  %v1144_v23 = vmul.f32 %v5376_v62, %v1098_v22 }
 0x22a   : > { %v698_v8 = vpop.permute.xlu1 %697 }
 0x22b   : > { %v751_v16 = vmul.f32 %v5352_v48, %v698_v8  ;;  %v949_v8 = vmul.f32 %v5362_v54, %v906_v57 }
 0x22c   : > { %v1110_v9 = vpop.permute.xlu0 %1109 }
 0x22d   : > { %v783_v25 = vadd.f32 %v5367_v56, %v751_v16  ;;  %v1147_v55 = vmul.f32 %v5376_v62, %v1110_v9 }
 0x22f   : > { %v890_v10 = vpop.permute.xlu1 %889  ;;  %v979_v29 = vadd.f32 %v947_v32, %v783_v25 }
 0x230   : > { %v945_v31 = vmul.f32 %v5362_v54, %v890_v10 }
 0x232   : > { %v977_v28 = vadd.f32 %v945_v31, %v781_v50 }
 0x233   : > { %v894_v12 = vpop.permute.xlu1 %893 }
 0x234   : > { %v1173_v17 = vadd.f32 %v1141_v46, %v977_v28  ;;  %v946_v20 = vmul.f32 %v5362_v54, %v894_v12 }
 0x236   : > { %v1205_v2 = vmax.f32 %v1173_v17, 0.0  ;;  %v978_v38 = vadd.f32 %v946_v20, %v782_v7 }
 0x238   : > { %v1082_v15 = vpop.permute.xlu1 %1081 }
 0x239   : > { %v1140_v19 = vmul.f32 %v5376_v62, %v1082_v15 }
 0x23b   : > { %v1172_v21 = vadd.f32 %v1140_v19, %v976_v18 }
 0x23c   : > { %v1090_v24 = vpop.permute.xlu1 %1089 }
 0x23d   : > { %v1204_v47 = vmax.f32 %v1172_v21, 0.0  ;;  %v1142_v13 = vmul.f32 %v5376_v62, %v1090_v24 }
 0x23f   : > { %v1224_v33 = vpack.c.bf16 %v1205_v2, %v1204_v47  ;;  %v1174_v36 = vadd.f32 %v1142_v13, %v978_v38 }
 0x240   : > { %v1094_v34 = vpop.permute.xlu1 %1093 }
 0x241   : > { %v1143_v41 = vmul.f32 %v5376_v62, %v1094_v34  ;;  %4468 = vmatprep.mubr.msk.bf16.mxu0 %vm1267_vm0, %v1224_v33  ;;  %v1206_v42 = vmax.f32 %v1174_v36, 0.0 }
 0x243   : > { %v1175_v35 = vadd.f32 %v1143_v41, %v979_v29 }
 0x245   : > { %v1207_v44 = vmax.f32 %v1175_v35, 0.0  ;;  %v708_v30 = vpop.permute.xlu1 %707 }
 0x246   : > { %v753_v1 = vmul.f32 %v5352_v48, %v708_v30 }
 0x247   : > { %v1225_v27 = vpack.c.bf16 %v1207_v44, %v1206_v42 }
 0x248   : > { %v785_v6 = vadd.f32 %v5367_v56, %v753_v1 }
 0x249   : > { %v713_v26 = vpop.permute.xlu1 %712  ;;  %4469 = vmatmul.mubr.msk.bf16.gmra.mrb[24].mxu0 %vm1267_vm0, %v1225_v27 }
 0x24a   : > { %v754_v10 = vmul.f32 %v5352_v48, %v713_v26  ;;  %v981_v58 = vadd.f32 %v949_v8, %v785_v6 }
 0x24c   : > { %v786_v17 = vadd.f32 %v5367_v56, %v754_v10 }
 0x24e   : > { %v902_v14 = vpop.permute.xlu1 %901 }
 0x24f   : > { %v948_v63 = vmul.f32 %v5362_v54, %v902_v14 }
 0x251   : > { %v980_v61 = vadd.f32 %v948_v63, %v784_v5 }
 0x252   : > { %v910_v60 = vpop.permute.xlu1 %909 }
 0x253   : > { %v1176_v50 = vadd.f32 %v1144_v23, %v980_v61  ;;  %v950_v31 = vmul.f32 %v5362_v54, %v910_v60 }
 0x255   : > { %v1208_v21 = vmax.f32 %v1176_v50, 0.0  ;;  %v982_v7 = vadd.f32 %v950_v31, %v786_v17 }
 0x256   : > { %v914_v4 = vpop.permute.xlu1 %913 }
 0x257   : > { %v951_v37 = vmul.f32 %v5362_v54, %v914_v4 }
 0x259   : > { %v983_v12 = vadd.f32 %v951_v37, %v787_v52 }
 0x25b   : > { %v1102_v46 = vpop.permute.xlu1 %1101  ;;  %v4446_v28 = vpop.f32.mrb[0].mxu0  ;;  %v1179_v24 = vadd.f32 %v1147_v55, %v983_v12 }
 0x25c   : > { %v1145_v39 = vmul.f32 %v5376_v62, %v1102_v46  ;;  %v1359_v15 = vadd.f32 %v4446_v28, %v5567_v11  ;;  %v1350_v16 = vpop.f32.mrb[1].mxu0  ;;  %v1821_v46 = vld [vmem:[#allocation12] sm:$0xff] }
 0x25d   : > { %v1351_v48 = vadd.f32 %v5567_v11, %v1350_v16  ;;  %v4447_v18 = vpop.f32.mrb[2].mxu0  ;;  %v1211_v35 = vmax.f32 %v1179_v24, 0.0  ;;  %v1825_v28 = vld [vmem:[#allocation12 + $0x20] sm:$0xff] }
 0x25e   : > { %v1177_v19 = vadd.f32 %v1145_v39, %v981_v58  ;;  %v1362_v20 = vadd.f32 %v4447_v18, %v5567_v11  ;;  %v1353_v54 = vpop.f32.mrb[3].mxu0  ;;  %v1479_v13 = vmax.f32 %v1359_v15, 0.0  ;;  %v4329_v58 = vcombine.high %v1821_v46, %v1825_v28  ;;  %v1829_v15 = vld [vmem:[#allocation12 + $0x40] sm:$0xff] }
 0x25f   : > { %v1354_v25 = vadd.f32 %v5567_v11, %v1353_v54  ;;  %v1106_v2 = vpop.permute.xlu1 %1105  ;;  %v1477_v33 = vmax.f32 %v1351_v48, 0.0  ;;  %v4328_v39 = vcombine.low %v1821_v46, %v1825_v28  ;;  %v1833_v16 = vld [vmem:[#allocation12 + $0x60] sm:$0xff] }
 0x260   : > { %v1209_v47 = vmax.f32 %v1177_v19, 0.0  ;;  %v1480_v32 = vmax.f32 %v1362_v20, 0.0  ;;  %v1146_v38 = vmul.f32 %v5376_v62, %v1106_v2  ;;  %2247 = vmatprep.subr.bf16.mxu0 %v4329_v58  ;;  %v4337_v17 = vcombine.high %v1829_v15, %v1833_v16  ;;  %v1837_v18 = vld [vmem:[#allocation12 + $0x80] sm:$0xff]  ;;  %v1822_v20 = vld [vmem:[#allocation12 + $0x8] sm:$0xff] }
 0x261   : > { %v1478_v56 = vmax.f32 %v1354_v25, 0.0  ;;  %2248 = vmatpush1.bf16.msra.mxu0 %v4328_v39  ;;  %v4336_v48 = vcombine.low %v1829_v15, %v1833_v16  ;;  %v1841_v19 = vld [vmem:[#allocation12 + $0xa0] sm:$0xff] }
 0x262   : > { %v1226_v34 = vpack.c.bf16 %v1209_v47, %v1208_v21  ;;  %v1510_v36 = vpack.c.bf16 %v1480_v32, %v1479_v13  ;;  %v1178_v29 = vadd.f32 %v1146_v38, %v982_v7  ;;  %2249 = vmatprep.subr.bf16.mxu0 %v4337_v17  ;;  %v4344_v54 = vcombine.low %v1837_v18, %v1841_v19  ;;  %v1826_v7 = vld [vmem:[#allocation12 + $0x28] sm:$0xff]  ;;  %v1845_v24 = vld [vmem:[#allocation12 + $0xc0] sm:$0xff] }
 0x263   : > { %v1509_v41 = vpack.c.bf16 %v1478_v56, %v1477_v33  ;;  %v4345_v21 = vcombine.high %v1837_v18, %v1841_v19  ;;  %v1849_v25 = vld [vmem:[#allocation12 + $0xe0] sm:$0xff]  ;;  %v4330_v2 = vcombine.low %v1822_v20, %v1826_v7  ;;  %v4331_v47 = vcombine.high %v1822_v20, %v1826_v7  ;;  %v1830_v32 = vld [vmem:[#allocation12 + $0x48] sm:$0xff] }
 0x264   : > { %v1210_v45 = vmax.f32 %v1178_v29, 0.0  ;;  %4472 = vmatprep.mubr.msk.bf16.mxu0 %vm1267_vm0, %v1226_v34  ;;  %v4353_v13 = vcombine.high %v1845_v24, %v1849_v25  ;;  %v1834_v38 = vld [vmem:[#allocation12 + $0x68] sm:$0xff]  ;;  %v1853_v33 = vld [vmem:[#allocation12 + $0x100] sm:$0xff] }
 0x265   : > { %4484 = vmatprep.mubr.msk.bf16.mxu1 %vm1267_vm0, %v1509_v41  ;;  %2250 = vmatpush1.bf16.msra.mxu0 %v4336_v48  ;;  %v4339_v56 = vcombine.high %v1830_v32, %v1834_v38  ;;  %v1857_v34 = vld [vmem:[#allocation12 + $0x120] sm:$0xff]  ;;  %v1842_v29 = vld [vmem:[#allocation12 + $0xa8] sm:$0xff]  ;;  %v4352_v41 = vcombine.low %v1845_v24, %v1849_v25 }
 0x266   : > { %v1227_v42 = vpack.c.bf16 %v1211_v35, %v1210_v45  ;;  %4485 = vmatmul.mubr.msk.bf16.vlgmr.msra.gmra.mrb[0].mxu1 %vm1267_vm0, %v1510_v36  ;;  %2251 = vmatprep.subr.bf16.mxu0 %v4345_v21  ;;  %v1838_v36 = vld [vmem:[#allocation12 + $0x88] sm:$0xff]  ;;  %v4338_v35 = vcombine.low %v1830_v32, %v1834_v38  ;;  %v4361_v45 = vcombine.high %v1853_v33, %v1857_v34  ;;  %v1881_v46 = vld [vmem:[#allocation12 + $0x1e0] sm:$0xff] }
 0x267   : > { %2440 = vmatprep.subr.bf16.mxu1 %v4331_v47  ;;  %v1862_v18 = vld [vmem:[#allocation12 + $0x148] sm:$0xff] }
 0x268   : > { %4473 = vmatmul.mubr.msk.bf16.gmra.mrb[28].mxu0 %vm1267_vm0, %v1227_v42  ;;  %2441 = vmatpush1.bf16.msra.mxu1 %v4330_v2  ;;  %v4347_v42 = vcombine.high %v1838_v36, %v1842_v29  ;;  %v1866_v19 = vld [vmem:[#allocation12 + $0x168] sm:$0xff] }
 0x269   : > { %2279 = vmatprep.mubr.bf16.mxu0 %v4952_v0  ;;  %2252 = vmatpush1.bf16.msra.mxu0 %v4344_v54  ;;  %v4371_v20 = vcombine.high %v1862_v18, %v1866_v19  ;;  %v4370_v54 = vcombine.low %v1862_v18, %v1866_v19  ;;  %v1870_v21 = vld [vmem:[#allocation12 + $0x188] sm:$0xff]  ;;  %v1828_v18 = vld [vmem:[#allocation12 + $0x38] sm:$0xff] }
 0x26a   : > { %2253 = vmatprep.subr.bf16.mxu0 %v4353_v13  ;;  %2442 = vmatprep.subr.bf16.mxu1 %v4339_v56  ;;  %v1874_v7 = vld [vmem:[#allocation12 + $0x1a8] sm:$0xff] }
 0x26b   : > { %v4379_v24 = vcombine.high %v1870_v21, %v1874_v7  ;;  %v4378_v25 = vcombine.low %v1870_v21, %v1874_v7  ;;  %v1878_v2 = vld [vmem:[#allocation12 + $0x1c8] sm:$0xff] }
 0x26c   : > { %2443 = vmatpush1.bf16.msra.mxu1 %v4338_v35  ;;  %v1882_v47 = vld [vmem:[#allocation12 + $0x1e8] sm:$0xff] }
 0x26d   : > { %2254 = vmatpush1.bf16.msra.mxu0 %v4352_v41  ;;  %2444 = vmatprep.subr.bf16.mxu1 %v4347_v42  ;;  %v4386_v13 = vcombine.low %v1878_v2, %v1882_v47  ;;  %v4387_v32 = vcombine.high %v1878_v2, %v1882_v47 }
 0x26e   : > { %2255 = vmatprep.subr.bf16.mxu0 %v4361_v45 }
 0x27f   : > { %v4450_v62 = vpop.f32.mrb[4].mxu0 }
 0x280   : > { %v1375_v44 = vadd.f32 %v4450_v62, %v5567_v11  ;;  %v1366_v30 = vpop.f32.mrb[5].mxu0  ;;  %v1861_v62 = vld [vmem:[#allocation12 + $0x140] sm:$0xff] }
 0x281   : > { %v1367_v27 = vadd.f32 %v5567_v11, %v1366_v30  ;;  %v4451_v26 = vpop.f32.mrb[6].mxu0  ;;  %v4360_v30 = vcombine.low %v1853_v33, %v1857_v34 }
 0x282   : > { %v1378_v51 = vadd.f32 %v4451_v26, %v5567_v11  ;;  %v1369_v14 = vpop.f32.mrb[7].mxu0  ;;  %v1483_v59 = vmax.f32 %v1375_v44, 0.0  ;;  %v1865_v44 = vld [vmem:[#allocation12 + $0x160] sm:$0xff] }
 0x283   : > { %v1370_v57 = vadd.f32 %v5567_v11, %v1369_v14  ;;  %v1481_v63 = vmax.f32 %v1367_v27, 0.0  ;;  %v4346_v27 = vcombine.low %v1838_v36, %v1842_v29  ;;  %v4369_v26 = vcombine.high %v1861_v62, %v1865_v44  ;;  %2256 = vmatpush1.bf16.msra.mxu0 %v4360_v30 }
 0x284   : > { %v1484_v60 = vmax.f32 %v1378_v51, 0.0  ;;  %v4368_v51 = vcombine.low %v1861_v62, %v1865_v44 }
 0x285   : > { %v1482_v1 = vmax.f32 %v1370_v57, 0.0  ;;  %2445 = vmatpush1.bf16.msra.mxu1 %v4346_v27  ;;  %2257 = vmatprep.subr.bf16.mxu0 %v4369_v26  ;;  %v1846_v57 = vld [vmem:[#allocation12 + $0xc8] sm:$0xff] }
 0x286   : > { %v1512_v22 = vpack.c.bf16 %v1484_v60, %v1483_v59  ;;  %v1850_v59 = vld [vmem:[#allocation12 + $0xe8] sm:$0xff] }
 0x287   : > { %v1511_v5 = vpack.c.bf16 %v1482_v1, %v1481_v63  ;;  %2258 = vmatpush1.bf16.msra.mxu0 %v4368_v51  ;;  %v4355_v1 = vcombine.high %v1846_v57, %v1850_v59 }
 0x289   : > { %4488 = vmatprep.mubr.msk.bf16.mxu1 %vm1267_vm0, %v1511_v5  ;;  %v1873_v5 = vld [vmem:[#allocation12 + $0x1a0] sm:$0xff]  ;;  %2446 = vmatprep.subr.bf16.mxu1 %v4355_v1 }
 0x28a   : > { %4489 = vmatmul.mubr.msk.bf16.gmra.mrb[4].mxu1 %vm1267_vm0, %v1512_v22  ;;  %v1869_v22 = vld [vmem:[#allocation12 + $0x180] sm:$0xff] }
 0x298   : > { %v4454_v3 = vpop.f32.mrb[8].mxu0 }
 0x299   : > { %v1391_v4 = vadd.f32 %v4454_v3, %v5567_v11  ;;  %v1382_v61 = vpop.f32.mrb[9].mxu0 }
 0x29a   : > { %v1383_v23 = vadd.f32 %v5567_v11, %v1382_v61  ;;  %v4455_v37 = vpop.f32.mrb[10].mxu0  ;;  %v4354_v61 = vcombine.low %v1846_v57, %v1850_v59 }
 0x29b   : > { %v1394_v6 = vadd.f32 %v4455_v37, %v5567_v11  ;;  %v1385_v8 = vpop.f32.mrb[11].mxu0  ;;  %v1487_v52 = vmax.f32 %v1391_v4, 0.0 }
 0x29c   : > { %v1386_v9 = vadd.f32 %v5567_v11, %v1385_v8  ;;  %v1485_v50 = vmax.f32 %v1383_v23, 0.0  ;;  %v4377_v23 = vcombine.high %v1869_v22, %v1873_v5  ;;  %v4376_v8 = vcombine.low %v1869_v22, %v1873_v5  ;;  %2447 = vmatpush1.bf16.msra.mxu1 %v4354_v61 }
 0x29d   : > { %v1488_v10 = vmax.f32 %v1394_v6, 0.0 }
 0x29e   : > { %v1486_v31 = vmax.f32 %v1386_v9, 0.0  ;;  %2259 = vmatprep.subr.bf16.mxu0 %v4377_v23 }
 0x29f   : > { %v1514_v12 = vpack.c.bf16 %v1488_v10, %v1487_v52  ;;  %v1854_v52 = vld [vmem:[#allocation12 + $0x108] sm:$0xff]  ;;  %2260 = vmatpush1.bf16.msra.mxu0 %v4376_v8 }
 0x2a0   : > { %v1513_v55 = vpack.c.bf16 %v1486_v31, %v1485_v50  ;;  %v1858_v10 = vld [vmem:[#allocation12 + $0x128] sm:$0xff] }
 0x2a1   : > { %v4362_v39 = vcombine.low %v1854_v52, %v1858_v10 }
 0x2a2   : > { %4492 = vmatprep.mubr.msk.bf16.mxu1 %vm1267_vm0, %v1513_v55  ;;  %v1877_v55 = vld [vmem:[#allocation12 + $0x1c0] sm:$0xff] }
 0x2a3   : > { %4493 = vmatmul.mubr.msk.bf16.gmra.mrb[8].mxu1 %vm1267_vm0, %v1514_v12  ;;  %v4363_v12 = vcombine.high %v1854_v52, %v1858_v10  ;;  %v4385_v15 = vcombine.high %v1877_v55, %v1881_v46  ;;  %v4384_v17 = vcombine.low %v1877_v55, %v1881_v46 }
 0x2a5   : > { %2448 = vmatprep.subr.bf16.mxu1 %v4363_v12  ;;  %2261 = vmatprep.subr.bf16.mxu0 %v4385_v15  ;;  %v1823_v15 = vld [vmem:[#allocation12 + $0x10] sm:$0xff] }
 0x2a6   : > { %2449 = vmatpush1.bf16.msra.mxu1 %v4362_v39  ;;  %2262 = vmatpush1.bf16.msra.mxu0 %v4384_v17  ;;  %v5619_v17 = vld [vmem:[#allocation12 + $0x18] sm:$0xff] }
 0x2a7   : > { %2450 = vmatprep.subr.bf16.mxu1 %v4371_v20  ;;  %v4335_v19 = vcombine.high %v5619_v17, %v1828_v18  ;;  %v5622_v20 = vld [vmem:[#allocation10] ss:$0 sm:$0xff] }
 0x2aa   : > { %2451 = vmatpush1.bf16.msra.mxu1 %v4370_v54 }
 0x2ab   : > { %2452 = vmatprep.subr.bf16.mxu1 %v4379_v24 }
 0x2ae   : > { %2453 = vmatpush1.bf16.msra.mxu1 %v4378_v25 }
 0x2af   : > { %2454 = vmatprep.subr.bf16.mxu1 %v4387_v32 }
 0x2b2   : > { %2455 = vmatpush1.bf16.msra.mxu1 %v4386_v13 }
 0x2b3   : > { %2826 = vmatprep.subr.bf16.mxu1 %v4335_v19 }
 0x2b7   : > { %v4458_v14 = vpop.f32.mrb[12].mxu0 }
 0x2b8   : > { %v1407_v60 = vadd.f32 %v4458_v14, %v5567_v11  ;;  %v1398_v63 = vpop.f32.mrb[13].mxu0 }
 0x2b9   : > { %v1399_v3 = vadd.f32 %v5567_v11, %v1398_v63  ;;  %v4459_v4 = vpop.f32.mrb[14].mxu0 }
 0x2ba   : > { %v1410_v37 = vadd.f32 %v4459_v4, %v5567_v11  ;;  %v1401_v6 = vpop.f32.mrb[15].mxu0  ;;  %v1491_v50 = vmax.f32 %v1407_v60, 0.0 }
 0x2bb   : > { %v1402_v9 = vadd.f32 %v5567_v11, %v1401_v6  ;;  %v1489_v28 = vmax.f32 %v1399_v3, 0.0 }
 0x2bc   : > { %v1492_v31 = vmax.f32 %v1410_v37, 0.0 }
 0x2bd   : > { %v1490_v58 = vmax.f32 %v1402_v9, 0.0 }
 0x2be   : > { %v1516_v16 = vpack.c.bf16 %v1492_v31, %v1491_v50 }
 0x2bf   : > { %v1515_v48 = vpack.c.bf16 %v1490_v58, %v1489_v28 }
 0x2c1   : > { %4496 = vmatprep.mubr.msk.bf16.mxu1 %vm1267_vm0, %v1515_v48 }
 0x2c2   : > { %4497 = vmatmul.mubr.msk.bf16.gmra.mrb[12].mxu1 %vm1267_vm0, %v1516_v16  ;;  %v1827_v16 = vld [vmem:[#allocation12 + $0x30] sm:$0xff] }
 0x2c3   : > { %v4333_v48 = vcombine.high %v1823_v15, %v1827_v16 }
 0x2c5   : > { %2633 = vmatprep.subr.bf16.mxu0 %v4333_v48  ;;  %v1851_v48 = vld [vmem:[#allocation12 + $0xf0] sm:$0xff] }
 0x2da   : > { %v4462_v38 = vpop.f32.mrb[16].mxu0 }
 0x2db   : > { %v1423_v33 = vadd.f32 %v4462_v38, %v5567_v11  ;;  %v1414_v56 = vpop.f32.mrb[17].mxu0 }
 0x2dc   : > { %v1415_v34 = vadd.f32 %v5567_v11, %v1414_v56  ;;  %v4463_v36 = vpop.f32.mrb[18].mxu0 }
 0x2dd   : > { %v1426_v29 = vadd.f32 %v4463_v36, %v5567_v11  ;;  %v1417_v41 = vpop.f32.mrb[19].mxu0  ;;  %v1495_v45 = vmax.f32 %v1423_v33, 0.0 }
 0x2de   : > { %v1418_v35 = vadd.f32 %v5567_v11, %v1417_v41  ;;  %v1493_v62 = vmax.f32 %v1415_v34, 0.0 }
 0x2df   : > { %v1496_v42 = vmax.f32 %v1426_v29, 0.0 }
 0x2e0   : > { %v1494_v44 = vmax.f32 %v1418_v35, 0.0 }
 0x2e1   : > { %v1518_v30 = vpack.c.bf16 %v1496_v42, %v1495_v45 }
 0x2e2   : > { %v1517_v27 = vpack.c.bf16 %v1494_v44, %v1493_v62 }
 0x2e4   : > { %4500 = vmatprep.mubr.msk.bf16.mxu1 %vm1267_vm0, %v1517_v27 }
 0x2e5   : > { %4501 = vmatmul.mubr.msk.bf16.gmra.mrb[16].mxu1 %vm1267_vm0, %v1518_v30 }
 0x2f9   : > { %v4466_v26 = vpop.f32.mrb[20].mxu0 }
 0x2fa   : > { %v1439_v51 = vadd.f32 %v4466_v26, %v5567_v11  ;;  %v1430_v14 = vpop.f32.mrb[21].mxu0  ;;  %v4332_v26 = vcombine.low %v1823_v15, %v1827_v16 }
 0x2fb   : > { %v1431_v57 = vadd.f32 %v5567_v11, %v1430_v14  ;;  %v4467_v59 = vpop.f32.mrb[22].mxu0 }
 0x2fc   : > { %v1442_v60 = vadd.f32 %v4467_v59, %v5567_v11  ;;  %v1433_v63 = vpop.f32.mrb[23].mxu0  ;;  %v1499_v22 = vmax.f32 %v1439_v51, 0.0 }
 0x2fd   : > { %v1434_v1 = vadd.f32 %v5567_v11, %v1433_v63  ;;  %v1497_v3 = vmax.f32 %v1431_v57, 0.0  ;;  %v1835_v63 = vld [vmem:[#allocation12 + $0x70] sm:$0xff] }
 0x2fe   : > { %v1500_v5 = vmax.f32 %v1442_v60, 0.0  ;;  %v1831_v60 = vld [vmem:[#allocation12 + $0x50] sm:$0xff] }
 0x2ff   : > { %v1498_v4 = vmax.f32 %v1434_v1, 0.0 }
 0x300   : > { %v1520_v61 = vpack.c.bf16 %v1500_v5, %v1499_v22  ;;  %v4341_v22 = vcombine.high %v1831_v60, %v1835_v63  ;;  %v1832_v5 = vld [vmem:[#allocation12 + $0x58] sm:$0xff] }
 0x301   : > { %v1519_v23 = vpack.c.bf16 %v1498_v4, %v1497_v3  ;;  %v1836_v3 = vld [vmem:[#allocation12 + $0x78] sm:$0xff]  ;;  %v1839_v4 = vld [vmem:[#allocation12 + $0x90] sm:$0xff] }
 0x303   : > { %4504 = vmatprep.mubr.msk.bf16.mxu1 %vm1267_vm0, %v1519_v23  ;;  %v4334_v23 = vcombine.low %v5619_v17, %v1828_v18  ;;  %v1847_v17 = vld [vmem:[#allocation12 + $0xd0] sm:$0xff]  ;;  %v1848_v18 = vld [vmem:[#allocation12 + $0xd8] sm:$0xff] }
 0x304   : > { %4505 = vmatmul.mubr.msk.bf16.gmra.mrb[20].mxu1 %vm1267_vm0, %v1520_v61  ;;  %v1843_v61 = vld [vmem:[#allocation12 + $0xb0] sm:$0xff] }
 0x31c   : > { %v4470_v37 = vpop.f32.mrb[24].mxu0 }
 0x31d   : > { %v1455_v6 = vadd.f32 %v4470_v37, %v5567_v11  ;;  %v1446_v8 = vpop.f32.mrb[25].mxu0  ;;  %v4348_v37 = vcombine.low %v1839_v4, %v1843_v61 }
 0x31e   : > { %v1447_v9 = vadd.f32 %v5567_v11, %v1446_v8  ;;  %v4471_v52 = vpop.f32.mrb[26].mxu0  ;;  %v4343_v8 = vcombine.high %v1832_v5, %v1836_v3 }
 0x31f   : > { %v1458_v10 = vadd.f32 %v4471_v52, %v5567_v11  ;;  %v1449_v50 = vpop.f32.mrb[27].mxu0  ;;  %v1503_v12 = vmax.f32 %v1455_v6, 0.0  ;;  %v4349_v6 = vcombine.high %v1839_v4, %v1843_v61  ;;  %v1844_v52 = vld [vmem:[#allocation12 + $0xb8] sm:$0xff]  ;;  %v1867_v4 = vld [vmem:[#allocation12 + $0x170] sm:$0xff] }
 0x320   : > { %v1450_v31 = vadd.f32 %v5567_v11, %v1449_v50  ;;  %v1501_v46 = vmax.f32 %v1447_v9, 0.0  ;;  %v1840_v9 = vld [vmem:[#allocation12 + $0x98] sm:$0xff] }
 0x321   : > { %v1504_v55 = vmax.f32 %v1458_v10, 0.0  ;;  %v4342_v10 = vcombine.low %v1832_v5, %v1836_v3  ;;  %v4351_v50 = vcombine.high %v1840_v9, %v1844_v52  ;;  %v1863_v3 = vld [vmem:[#allocation12 + $0x150] sm:$0xff]  ;;  %v1864_v61 = vld [vmem:[#allocation12 + $0x158] sm:$0xff] }
 0x322   : > { %v1502_v28 = vmax.f32 %v1450_v31, 0.0  ;;  %v4350_v31 = vcombine.low %v1840_v9, %v1844_v52  ;;  %v1871_v52 = vld [vmem:[#allocation12 + $0x190] sm:$0xff] }
 0x323   : > { %v1522_v58 = vpack.c.bf16 %v1504_v55, %v1503_v12 }
 0x324   : > { %v1521_v39 = vpack.c.bf16 %v1502_v28, %v1501_v46 }
 0x326   : > { %4508 = vmatprep.mubr.msk.bf16.mxu1 %vm1267_vm0, %v1521_v39 }
 0x327   : > { %4509 = vmatmul.mubr.msk.bf16.gmra.mrb[24].mxu1 %vm1267_vm0, %v1522_v58 }
 0x339   : > { %v4486_v54 = vpop.f32.mrb[0].mxu1 }
 0x33a   : > { %v1655_v21 = vadd.f32 %v4486_v54, %v5622_v20  ;;  %v1646_v7 = vpop.f32.mrb[1].mxu1 }
 0x33b   : > { %v1647_v24 = vadd.f32 %v5622_v20, %v1646_v7  ;;  %v4474_v25 = vpop.f32.mrb[28].mxu0  ;;  %v4487_v2 = vpop.f32.mrb[2].mxu1  ;;  %v4357_v7 = vcombine.high %v1847_v17, %v1851_v48 }
 0x33c   : > { %v1471_v47 = vadd.f32 %v4474_v25, %v5567_v11  ;;  %v1658_v13 = vadd.f32 %v4487_v2, %v5622_v20  ;;  %v1462_v32 = vpop.f32.mrb[29].mxu0  ;;  %v1649_v38 = vpop.f32.mrb[3].mxu1  ;;  %v1775_v36 = vmax.f32 %v1655_v21, 0.0  ;;  %v4356_v21 = vcombine.low %v1847_v17, %v1851_v48 }
 0x33d   : > { %v1463_v33 = vadd.f32 %v5567_v11, %v1462_v32  ;;  %v1650_v56 = vadd.f32 %v5622_v20, %v1649_v38  ;;  %v4475_v34 = vpop.f32.mrb[30].mxu0  ;;  %v1773_v45 = vmax.f32 %v1647_v24, 0.0  ;;  %v1852_v24 = vld [vmem:[#allocation12 + $0xf8] sm:$0xff] }
 0x33e   : > { %v1776_v29 = vmax.f32 %v1658_v13, 0.0  ;;  %v1474_v41 = vadd.f32 %v4475_v34, %v5567_v11  ;;  %v1465_v35 = vpop.f32.mrb[31].mxu0  ;;  %v1507_v44 = vmax.f32 %v1471_v47, 0.0  ;;  %v4358_v47 = vcombine.low %v1848_v18, %v1852_v24  ;;  %v1856_v34 = vld [vmem:[#allocation12 + $0x118] sm:$0xff] }
 0x33f   : > { %v1774_v42 = vmax.f32 %v1650_v56, 0.0  ;;  %v1466_v62 = vadd.f32 %v5567_v11, %v1465_v35  ;;  %v1505_v51 = vmax.f32 %v1463_v33, 0.0  ;;  %v4340_v11 = vcombine.low %v1831_v60, %v1835_v63  ;;  %v1855_v33 = vld [vmem:[#allocation12 + $0x110] sm:$0xff] }
 0x340   : > { %v5632_v30 = vpack.c.bf16 %v1776_v29, %v1775_v36  ;;  %v1508_v27 = vmax.f32 %v1474_v41, 0.0  ;;  %v4359_v13 = vcombine.high %v1848_v18, %v1852_v24  ;;  %v1859_v56 = vld [vmem:[#allocation12 + $0x130] sm:$0xff]  ;;  %v1860_v41 = vld [vmem:[#allocation12 + $0x138] sm:$0xff] }
 0x341   : > { %v5634_v14 = vpack.c.bf16 %v1774_v42, %v1773_v45  ;;  %v1506_v57 = vmax.f32 %v1466_v62, 0.0  ;;  %v4364_v36 = vcombine.low %v1855_v33, %v1859_v56  ;;  %v4365_v29 = vcombine.high %v1855_v33, %v1859_v56  ;;  %v1880_v33 = vld [vmem:[#allocation12 + $0x1d8] sm:$0xff] }
 0x342   : > { %v1524_v59 = vpack.c.bf16 %v1508_v27, %v1507_v44  ;;  %v4366_v35 = vcombine.low %v1856_v34, %v1860_v41  ;;  %v4367_v45 = vcombine.high %v1856_v34, %v1860_v41 }
 0x343   : > { %v1523_v1 = vpack.c.bf16 %v1506_v57, %v1505_v51  ;;  %2280 = vmatmul.mubr.bf16.vlgmr.msra.gmra.mrb[32].mxu0 %v5634_v14 }
 0x344   : > { %2289 = vmatprep.mubr.bf16.mxu0 %v4952_v0  ;;  %2634 = vmatpush1.bf16.msra.mxu0 %v4332_v26 }
 0x345   : > { %4512 = vmatprep.mubr.msk.bf16.mxu1 %vm1267_vm0, %v1523_v1  ;;  %2635 = vmatprep.subr.bf16.mxu0 %v4341_v22 }
 0x346   : > { %4513 = vmatmul.mubr.msk.bf16.gmra.mrb[28].mxu1 %vm1267_vm0, %v1524_v59 }
 0x347   : > { %2472 = vmatprep.mubr.bf16.mxu1 %v4952_v0 }
 0x348   : > { %2636 = vmatpush1.bf16.msra.mxu0 %v4340_v11 }
 0x349   : > { %2637 = vmatprep.subr.bf16.mxu0 %v4349_v6  ;;  %v1868_v6 = vld [vmem:[#allocation12 + $0x178] sm:$0xff] }
 0x34a   : > { %v4375_v9 = vcombine.high %v1864_v61, %v1868_v6 }
 0x34b   : > { %2290 = vmatmul.mubr.bf16.gmra.mrb[36].mxu0 %v5632_v30 }
 0x34c   : > { %2299 = vmatprep.mubr.bf16.mxu0 %v4952_v0  ;;  %2638 = vmatpush1.bf16.msra.mxu0 %v4348_v37  ;;  %v4373_v37 = vcombine.high %v1863_v3, %v1867_v4 }
 0x34d   : > { %2639 = vmatprep.subr.bf16.mxu0 %v4357_v7 }
 0x34e   : > { %2473 = vmatmul.mubr.bf16.vlgmr.msra.gmra.mrb[32].mxu1 %v5634_v14 }
 0x34f   : > { %2482 = vmatprep.mubr.bf16.mxu1 %v4952_v0  ;;  %2827 = vmatpush1.bf16.msra.mxu1 %v4334_v23  ;;  %v4372_v23 = vcombine.low %v1863_v3, %v1867_v4 }
 0x350   : > { %2828 = vmatprep.subr.bf16.mxu1 %v4343_v8  ;;  %2640 = vmatpush1.bf16.msra.mxu0 %v4356_v21  ;;  %v4374_v8 = vcombine.low %v1864_v61, %v1868_v6 }
 0x351   : > { %2641 = vmatprep.subr.bf16.mxu0 %v4365_v29 }
 0x353   : > { %2829 = vmatpush1.bf16.msra.mxu1 %v4342_v10  ;;  %v1875_v10 = vld [vmem:[#allocation12 + $0x1b0] sm:$0xff] }
 0x354   : > { %2830 = vmatprep.subr.bf16.mxu1 %v4351_v50  ;;  %2642 = vmatpush1.bf16.msra.mxu0 %v4364_v36  ;;  %v1872_v50 = vld [vmem:[#allocation12 + $0x198] sm:$0xff] }
 0x355   : > { %2643 = vmatprep.subr.bf16.mxu0 %v4373_v37  ;;  %v1884_v36 = vld [vmem:[#allocation12 + $0x1f8] sm:$0xff] }
 0x356   : > { %2483 = vmatmul.mubr.bf16.gmra.mrb[36].mxu1 %v5632_v30  ;;  %v4390_v29 = vcombine.low %v1880_v33, %v1884_v36  ;;  %v4391_v41 = vcombine.high %v1880_v33, %v1884_v36 }
 0x357   : > { %2492 = vmatprep.mubr.bf16.mxu1 %v4952_v0  ;;  %2831 = vmatpush1.bf16.msra.mxu1 %v4350_v31  ;;  %v4380_v31 = vcombine.low %v1871_v52, %v1875_v10 }
 0x358   : > { %2832 = vmatprep.subr.bf16.mxu1 %v4359_v13  ;;  %2644 = vmatpush1.bf16.msra.mxu0 %v4372_v23  ;;  %v1883_v13 = vld [vmem:[#allocation12 + $0x1f0] sm:$0xff] }
 0x35b   : > { %2833 = vmatpush1.bf16.msra.mxu1 %v4358_v47  ;;  %v1879_v47 = vld [vmem:[#allocation12 + $0x1d0] sm:$0xff] }
 0x35c   : > { %2834 = vmatprep.subr.bf16.mxu1 %v4367_v45  ;;  %v4388_v56 = vcombine.low %v1879_v47, %v1883_v13  ;;  %v4389_v34 = vcombine.high %v1879_v47, %v1883_v13  ;;  %v1885_v47 = vld [vmem:[#allocation13] sm:$0xff] }
 0x35d   : > { %v4490_v12 = vpop.f32.mrb[4].mxu1  ;;  %v5747_v13 = vrot.slane %v1885_v47, %v722_v43  ;;  %v5751_v33 = vrot.slane %v1885_v47, %v918_v49 }
 0x35e   : > { %v1671_v55 = vadd.f32 %v4490_v12, %v5622_v20  ;;  %v1662_v46 = vpop.f32.mrb[5].mxu1  ;;  %v4381_v12 = vcombine.high %v1871_v52, %v1875_v10 }
 0x35f   : > { %v1663_v28 = vadd.f32 %v5622_v20, %v1662_v46  ;;  %v4491_v58 = vpop.f32.mrb[6].mxu1  ;;  %2835 = vmatpush1.bf16.msra.mxu1 %v4366_v35 }
 0x360   : > { %v1674_v39 = vadd.f32 %v4491_v58, %v5622_v20  ;;  %v1665_v15 = vpop.f32.mrb[7].mxu1  ;;  %v1779_v19 = vmax.f32 %v1671_v55, 0.0  ;;  %2836 = vmatprep.subr.bf16.mxu1 %v4375_v9  ;;  %v1876_v55 = vld [vmem:[#allocation12 + $0x1b8] sm:$0xff]  ;;  %2645 = vmatprep.subr.bf16.mxu0 %v4381_v12 }
 0x361   : > { %v1666_v16 = vadd.f32 %v5622_v20, %v1665_v15  ;;  %v1777_v25 = vmax.f32 %v1663_v28, 0.0  ;;  %v4382_v46 = vcombine.low %v1872_v50, %v1876_v55  ;;  %v4383_v28 = vcombine.high %v1872_v50, %v1876_v55  ;;  %2646 = vmatpush1.bf16.msra.mxu0 %v4380_v31 }
 0x362   : > { %v1780_v54 = vmax.f32 %v1674_v39, 0.0  ;;  %2647 = vmatprep.subr.bf16.mxu0 %v4389_v34 }
 0x363   : > { %v1778_v2 = vmax.f32 %v1666_v16, 0.0  ;;  %2837 = vmatpush1.bf16.msra.mxu1 %v4374_v8 }
 0x364   : > { %v5652_v32 = vpack.c.bf16 %v1780_v54, %v1779_v19  ;;  %2838 = vmatprep.subr.bf16.mxu1 %v4383_v28 }
 0x365   : > { %v5654_v38 = vpack.c.bf16 %v1778_v2, %v1777_v25  ;;  %2648 = vmatpush1.bf16.msra.mxu0 %v4388_v56 }
 0x367   : > { %2300 = vmatmul.mubr.bf16.gmra.mrb[40].mxu0 %v5654_v38  ;;  %2493 = vmatmul.mubr.bf16.gmra.mrb[40].mxu1 %v5654_v38 }
 0x368   : > { %2309 = vmatprep.mubr.bf16.mxu0 %v4952_v0  ;;  %2502 = vmatprep.mubr.bf16.mxu1 %v4952_v0 }
 0x369   : > { %2839 = vmatpush1.bf16.msra.mxu1 %v4382_v46 }
 0x36a   : > { %2840 = vmatprep.subr.bf16.mxu1 %v4391_v41 }
 0x36d   : > { %2841 = vmatpush1.bf16.msra.mxu1 %v4390_v29 }
 0x36f   : > { %2310 = vmatmul.mubr.bf16.gmra.mrb[44].mxu0 %v5652_v32  ;;  %2503 = vmatmul.mubr.bf16.gmra.mrb[44].mxu1 %v5652_v32 }
 0x370   : > { %2319 = vmatprep.mubr.bf16.mxu0 %v4952_v0  ;;  %2512 = vmatprep.mubr.bf16.mxu1 %v4952_v0 }
 0x376   : > { %v4494_v42 = vpop.f32.mrb[8].mxu1 }
 0x377   : > { %v1687_v62 = vadd.f32 %v4494_v42, %v5622_v20  ;;  %v1678_v44 = vpop.f32.mrb[9].mxu1 }
 0x378   : > { %v1679_v27 = vadd.f32 %v5622_v20, %v1678_v44  ;;  %v4495_v26 = vpop.f32.mrb[10].mxu1 }
 0x379   : > { %v1690_v51 = vadd.f32 %v4495_v26, %v5622_v20  ;;  %v1681_v57 = vpop.f32.mrb[11].mxu1  ;;  %v1783_v60 = vmax.f32 %v1687_v62, 0.0 }
 0x37a   : > { %v1682_v59 = vadd.f32 %v5622_v20, %v1681_v57  ;;  %v1781_v1 = vmax.f32 %v1679_v27, 0.0 }
 0x37b   : > { %v1784_v63 = vmax.f32 %v1690_v51, 0.0 }
 0x37c   : > { %v1782_v22 = vmax.f32 %v1682_v59, 0.0 }
 0x37d   : > { %v5668_v11 = vpack.c.bf16 %v1784_v63, %v1783_v60 }
 0x37e   : > { %v5670_v5 = vpack.c.bf16 %v1782_v22, %v1781_v1 }
 0x380   : > { %2320 = vmatmul.mubr.bf16.gmra.mrb[48].mxu0 %v5670_v5  ;;  %2513 = vmatmul.mubr.bf16.gmra.mrb[48].mxu1 %v5670_v5 }
 0x381   : > { %2329 = vmatprep.mubr.bf16.mxu0 %v4952_v0  ;;  %2522 = vmatprep.mubr.bf16.mxu1 %v4952_v0 }
 0x388   : > { %2330 = vmatmul.mubr.bf16.gmra.mrb[52].mxu0 %v5668_v11  ;;  %2523 = vmatmul.mubr.bf16.gmra.mrb[52].mxu1 %v5668_v11 }
 0x389   : > { %2339 = vmatprep.mubr.bf16.mxu0 %v4952_v0  ;;  %2532 = vmatprep.mubr.bf16.mxu1 %v4952_v0 }
 0x395   : > { %v4498_v58 = vpop.f32.mrb[12].mxu1 }
 0x396   : > { %v1703_v39 = vadd.f32 %v4498_v58, %v5622_v20  ;;  %v1694_v15 = vpop.f32.mrb[13].mxu1 }
 0x397   : > { %v1695_v16 = vadd.f32 %v5622_v20, %v1694_v15  ;;  %v4499_v17 = vpop.f32.mrb[14].mxu1 }
 0x398   : > { %v1706_v48 = vadd.f32 %v4499_v17, %v5622_v20  ;;  %v1697_v18 = vpop.f32.mrb[15].mxu1  ;;  %v1787_v54 = vmax.f32 %v1703_v39, 0.0 }
 0x399   : > { %v1698_v19 = vadd.f32 %v5622_v20, %v1697_v18  ;;  %v1785_v7 = vmax.f32 %v1695_v16, 0.0 }
 0x39a   : > { %v1788_v21 = vmax.f32 %v1706_v48, 0.0 }
 0x39b   : > { %v1786_v24 = vmax.f32 %v1698_v19, 0.0 }
 0x39c   : > { %v5684_v25 = vpack.c.bf16 %v1788_v21, %v1787_v54 }
 0x39d   : > { %v5686_v2 = vpack.c.bf16 %v1786_v24, %v1785_v7 }
 0x39f   : > { %2340 = vmatmul.mubr.bf16.gmra.mrb[56].mxu0 %v5686_v2  ;;  %2533 = vmatmul.mubr.bf16.gmra.mrb[56].mxu1 %v5686_v2 }
 0x3a0   : > { %2349 = vmatprep.mubr.bf16.mxu0 %v4952_v0  ;;  %2542 = vmatprep.mubr.bf16.mxu1 %v4952_v0 }
 0x3a7   : > { %2350 = vmatmul.mubr.bf16.gmra.mrb[60].mxu0 %v5684_v25  ;;  %2543 = vmatmul.mubr.bf16.gmra.mrb[60].mxu1 %v5684_v25 }
 0x3a8   : > { %2359 = vmatprep.mubr.bf16.mxu0 %v4952_v0  ;;  %2552 = vmatprep.mubr.bf16.mxu1 %v4952_v0 }
 0x3b8   : > { %v4502_v35 = vpop.f32.mrb[16].mxu1 }
 0x3b9   : > { %v1719_v45 = vadd.f32 %v4502_v35, %v5622_v20  ;;  %v1710_v42 = vpop.f32.mrb[17].mxu1 }
 0x3ba   : > { %v1711_v62 = vadd.f32 %v5622_v20, %v1710_v42  ;;  %v4503_v44 = vpop.f32.mrb[18].mxu1 }
 0x3bb   : > { %v1722_v27 = vadd.f32 %v4503_v44, %v5622_v20  ;;  %v1713_v26 = vpop.f32.mrb[19].mxu1  ;;  %v1791_v57 = vmax.f32 %v1719_v45, 0.0 }
 0x3bc   : > { %v1714_v51 = vadd.f32 %v5622_v20, %v1713_v26  ;;  %v1789_v60 = vmax.f32 %v1711_v62, 0.0 }
 0x3bd   : > { %v1792_v59 = vmax.f32 %v1722_v27, 0.0 }
 0x3be   : > { %v1790_v63 = vmax.f32 %v1714_v51, 0.0  ;;  %v1901_v51 = vsub.s32 3, %v5338_v40 }
 0x3bf   : > { %v5700_v1 = vpack.c.bf16 %v1792_v59, %v1791_v57 }
 0x3c0   : > { %v5702_v22 = vpack.c.bf16 %v1790_v63, %v1789_v60 }
 0x3c2   : > { %2360 = vmatmul.mubr.bf16.gmra.mrb[64].mxu0 %v5702_v22  ;;  %2553 = vmatmul.mubr.bf16.gmra.mrb[64].mxu1 %v5702_v22 }
 0x3c3   : > { %2369 = vmatprep.mubr.bf16.mxu0 %v4952_v0  ;;  %2562 = vmatprep.mubr.bf16.mxu1 %v4952_v0 }
 0x3ca   : > { %2370 = vmatmul.mubr.bf16.gmra.mrb[68].mxu0 %v5700_v1  ;;  %2563 = vmatmul.mubr.bf16.gmra.mrb[68].mxu1 %v5700_v1 }
 0x3cb   : > { %2379 = vmatprep.mubr.bf16.mxu0 %v4952_v0  ;;  %2572 = vmatprep.mubr.bf16.mxu1 %v4952_v0 }
 0x3d7   : > { %v4506_v3 = vpop.f32.mrb[20].mxu1 }
 0x3d8   : > { %v1735_v4 = vadd.f32 %v4506_v3, %v5622_v20  ;;  %v1726_v61 = vpop.f32.mrb[21].mxu1 }
 0x3d9   : > { %v1727_v23 = vadd.f32 %v5622_v20, %v1726_v61  ;;  %v4507_v37 = vpop.f32.mrb[22].mxu1 }
 0x3da   : > { %v1738_v6 = vadd.f32 %v4507_v37, %v5622_v20  ;;  %v1729_v8 = vpop.f32.mrb[23].mxu1  ;;  %v1795_v52 = vmax.f32 %v1735_v4, 0.0 }
 0x3db   : > { %v1730_v9 = vadd.f32 %v5622_v20, %v1729_v8  ;;  %v1793_v50 = vmax.f32 %v1727_v23, 0.0  ;;  %v5773_v23 = vrot.slane %v1885_v47, %v1114_v53 }
 0x3dc   : > { %v1796_v10 = vmax.f32 %v1738_v6, 0.0 }
 0x3dd   : > { %v1794_v31 = vmax.f32 %v1730_v9, 0.0 }
 0x3de   : > { %v5716_v12 = vpack.c.bf16 %v1796_v10, %v1795_v52  ;;  %v5776_v52 = vrot.slane %v1885_v47, %v1901_v51 }
 0x3df   : > { %v5718_v55 = vpack.c.bf16 %v1794_v31, %v1793_v50 }
 0x3e1   : > { %2380 = vmatmul.mubr.bf16.gmra.mrb[72].mxu0 %v5718_v55  ;;  %2573 = vmatmul.mubr.bf16.gmra.mrb[72].mxu1 %v5718_v55 }
 0x3e2   : > { %2389 = vmatprep.mubr.bf16.mxu0 %v4952_v0  ;;  %2582 = vmatprep.mubr.bf16.mxu1 %v4952_v0 }
 0x3e9   : > { %2390 = vmatmul.mubr.bf16.gmra.mrb[76].mxu0 %v5716_v12  ;;  %2583 = vmatmul.mubr.bf16.gmra.mrb[76].mxu1 %v5716_v12 }
 0x3ea   : > { %2399 = vmatprep.mubr.bf16.mxu0 %v4952_v0  ;;  %2592 = vmatprep.mubr.bf16.mxu1 %v4952_v0 }
 0x3fa   : > { %v4510_v46 = vpop.f32.mrb[24].mxu1 }
 0x3fb   : > { %v1751_v28 = vadd.f32 %v4510_v46, %v5622_v20  ;;  %v1742_v58 = vpop.f32.mrb[25].mxu1 }
 0x3fc   : > { %v1743_v39 = vadd.f32 %v5622_v20, %v1742_v58  ;;  %v4511_v15 = vpop.f32.mrb[26].mxu1 }
 0x3fd   : > { %v1754_v16 = vadd.f32 %v4511_v15, %v5622_v20  ;;  %v1745_v17 = vpop.f32.mrb[27].mxu1  ;;  %v1799_v18 = vmax.f32 %v1751_v28, 0.0 }
 0x3fe   : > { %v1746_v48 = vadd.f32 %v5622_v20, %v1745_v17  ;;  %v1797_v54 = vmax.f32 %v1743_v39, 0.0 }
 0x3ff   : > { %v1800_v19 = vmax.f32 %v1754_v16, 0.0 }
 0x400   : > { %v1798_v21 = vmax.f32 %v1746_v48, 0.0 }
 0x401   : > { %v5732_v7 = vpack.c.bf16 %v1800_v19, %v1799_v18 }
 0x402   : > { %v5734_v24 = vpack.c.bf16 %v1798_v21, %v1797_v54 }
 0x404   : > { %2400 = vmatmul.mubr.bf16.gmra.mrb[80].mxu0 %v5734_v24  ;;  %2593 = vmatmul.mubr.bf16.gmra.mrb[80].mxu1 %v5734_v24 }
 0x405   : > { %2409 = vmatprep.mubr.bf16.mxu0 %v4952_v0  ;;  %2602 = vmatprep.mubr.bf16.mxu1 %v4952_v0 }
 0x40c   : > { %2410 = vmatmul.mubr.bf16.gmra.mrb[84].mxu0 %v5732_v7  ;;  %2603 = vmatmul.mubr.bf16.gmra.mrb[84].mxu1 %v5732_v7 }
 0x40d   : > { %2419 = vmatprep.mubr.bf16.mxu0 %v4952_v0  ;;  %2612 = vmatprep.mubr.bf16.mxu1 %v4952_v0 }
 0x416   : > { %v2281_v56 = vpop.f32.mrb[32].mxu0 }
 0x417   : > { %v2282_v34 = vadd.f32 %v2281_v56, %v5747_v13  ;;  %v2283_v36 = vpop.f32.mrb[33].mxu0 }
 0x418   : > { %v2284_v43 = vadd.f32 %v2283_v36, %v5751_v33  ;;  %v2285_v29 = vpop.f32.mrb[34].mxu0 }
 0x419   : > { %3019 = vst [vmem:[%s5756_s12] sm:$0xff] %v2282_v34  ;;  %v2286_v49 = vadd.f32 %v2285_v29, %v5747_v13  ;;  %v4514_v41 = vpop.f32.mrb[28].mxu1  ;;  %v2287_v35 = vpop.f32.mrb[35].mxu0 }
 0x41a   : > { %3020 = vst [vmem:[%s5756_s12 + $0x8] sm:$0xff] %v2284_v43  ;;  %v1767_v45 = vadd.f32 %v4514_v41, %v5622_v20  ;;  %v2288_v42 = vadd.f32 %v2287_v35, %v5751_v33  ;;  %v1758_v62 = vpop.f32.mrb[29].mxu1 }
 0x41b   : > { %3027 = vst [vmem:[%s5756_s12 + $0x40] sm:$0xff] %v2286_v49  ;;  %v3700_v44 = vmax.f32 %v2282_v34, %v2286_v49  ;;  %v1759_v27 = vadd.f32 %v5622_v20, %v1758_v62  ;;  %v4515_v26 = vpop.f32.mrb[30].mxu1 }
 0x41c   : > { %3028 = vst [vmem:[%s5756_s12 + $0x48] sm:$0xff] %v2288_v42  ;;  %v3737_v57 = vmax.f32 %v2284_v43, %v2288_v42  ;;  %v1770_v59 = vadd.f32 %v4515_v26, %v5622_v20  ;;  %v1761_v60 = vpop.f32.mrb[31].mxu1  ;;  %v1803_v3 = vmax.f32 %v1767_v45, 0.0 }
 0x41d   : > { %v1762_v63 = vadd.f32 %v5622_v20, %v1761_v60  ;;  %v1801_v37 = vmax.f32 %v1759_v27, 0.0 }
 0x41e   : > { %v1804_v4 = vmax.f32 %v1770_v59, 0.0  ;;  %v2291_v61 = vpop.f32.mrb[36].mxu0 }
 0x41f   : > { %v1802_v6 = vmax.f32 %v1762_v63, 0.0  ;;  %v2292_v8 = vadd.f32 %v2291_v61, %v5747_v13  ;;  %v2293_v9 = vpop.f32.mrb[37].mxu0 }
 0x420   : > { %v5778_v10 = vpack.c.bf16 %v1804_v4, %v1803_v3  ;;  %v2294_v20 = vadd.f32 %v2293_v9, %v5751_v33  ;;  %v2295_v50 = vpop.f32.mrb[38].mxu0 }
 0x421   : > { %v5781_v31 = vpack.c.bf16 %v1802_v6, %v1801_v37  ;;  %3035 = vst [vmem:[%s5756_s12 + $0x80] sm:$0xff] %v2292_v8  ;;  %v5784_v46 = vmax.f32 %v3700_v44, %v2292_v8  ;;  %v5787_v53 = vadd.f32 %v2295_v50, %v5747_v13  ;;  %v2297_v28 = vpop.f32.mrb[39].mxu0  ;;  %v2474_v58 = vpop.f32.mrb[32].mxu1 }
 0x422   : > { %3036 = vst [vmem:[%s5756_s12 + $0x88] sm:$0xff] %v2294_v20  ;;  %v5790_v39 = vmax.f32 %v3737_v57, %v2294_v20  ;;  %v5793_v15 = vadd.f32 %v2297_v28, %v5751_v33  ;;  %v2475_v16 = vadd.f32 %v2474_v58, %v5773_v23  ;;  %v2476_v17 = vpop.f32.mrb[33].mxu1 }
 0x423   : > { %3043 = vst [vmem:[%s5756_s12 + $0xc0] sm:$0xff] %v5787_v53  ;;  %v3702_v48 = vmax.f32 %v5784_v46, %v5787_v53  ;;  %v2477_v18 = vadd.f32 %v2476_v17, %v5776_v52  ;;  %2420 = vmatmul.mubr.bf16.gmra.mrb[88].mxu0 %v5781_v31  ;;  %v2478_v19 = vpop.f32.mrb[34].mxu1  ;;  %2613 = vmatmul.mubr.bf16.gmra.mrb[88].mxu1 %v5781_v31 }
 0x424   : > { %3044 = vst [vmem:[%s5756_s12 + $0xc8] sm:$0xff] %v5793_v15  ;;  %v3739_v54 = vmax.f32 %v5790_v39, %v5793_v15  ;;  %3021 = vst [vmem:[%s5756_s12 + $0x10] sm:$0xff] %v2475_v16  ;;  %v2479_v21 = vadd.f32 %v2478_v19, %v5773_v23  ;;  %v2480_v47 = vpop.f32.mrb[35].mxu1  ;;  %2429 = vmatprep.mubr.bf16.mxu0 %v4952_v0  ;;  %2622 = vmatprep.mubr.bf16.mxu1 %v4952_v0 }
 0x425   : > { %3022 = vst [vmem:[%s5756_s12 + $0x18] sm:$0xff] %v2477_v18  ;;  %v2481_v56 = vadd.f32 %v2480_v47, %v5776_v52 }
 0x426   : > { %3029 = vst [vmem:[%s5756_s12 + $0x50] sm:$0xff] %v2479_v21  ;;  %v3774_v34 = vmax.f32 %v2475_v16, %v2479_v21 }
 0x427   : > { %3030 = vst [vmem:[%s5756_s12 + $0x58] sm:$0xff] %v2481_v56  ;;  %v3811_v36 = vmax.f32 %v2477_v18, %v2481_v56 }
 0x429   : > { %v2484_v43 = vpop.f32.mrb[36].mxu1 }
 0x42a   : > { %v2485_v29 = vadd.f32 %v2484_v43, %v5773_v23  ;;  %v2486_v49 = vpop.f32.mrb[37].mxu1 }
 0x42b   : > { %v2487_v41 = vadd.f32 %v2486_v49, %v5776_v52  ;;  %2430 = vmatmul.mubr.bf16.gmra.mrb[92].mxu0 %v5778_v10  ;;  %v2488_v35 = vpop.f32.mrb[38].mxu1  ;;  %2623 = vmatmul.mubr.bf16.gmra.mrb[92].mxu1 %v5778_v10 }
 0x42c   : > { %3037 = vst [vmem:[%s5756_s12 + $0x90] sm:$0xff] %v2485_v29  ;;  %v3775_v45 = vmax.f32 %v3774_v34, %v2485_v29  ;;  %v2489_v42 = vadd.f32 %v2488_v35, %v5773_v23  ;;  %v2490_v62 = vpop.f32.mrb[39].mxu1  ;;  %2665 = vmatprep.mubr.bf16.mxu0 %v4952_v0  ;;  %2858 = vmatprep.mubr.bf16.mxu1 %v4952_v0 }
 0x42d   : > { %3038 = vst [vmem:[%s5756_s12 + $0x98] sm:$0xff] %v2487_v41  ;;  %v3812_v44 = vmax.f32 %v3811_v36, %v2487_v41  ;;  %v2491_v27 = vadd.f32 %v2490_v62, %v5776_v52 }
 0x42e   : > { %3045 = vst [vmem:[%s5756_s12 + $0xd0] sm:$0xff] %v2489_v42  ;;  %v3776_v26 = vmax.f32 %v3775_v45, %v2489_v42 }
 0x42f   : > { %3046 = vst [vmem:[%s5756_s12 + $0xd8] sm:$0xff] %v2491_v27  ;;  %v3813_v51 = vmax.f32 %v3812_v44, %v2491_v27 }
 0x433   : > { %2666 = vmatmul.mubr.bf16.vlgmr.msra.gmra.mrb[96].mxu0 %v5634_v14  ;;  %2859 = vmatmul.mubr.bf16.vlgmr.msra.gmra.mrb[96].mxu1 %v5634_v14 }
 0x434   : > { %2675 = vmatprep.mubr.bf16.mxu0 %v4952_v0  ;;  %2868 = vmatprep.mubr.bf16.mxu1 %v4952_v0 }
 0x43a   : > { %v2301_v57 = vpop.f32.mrb[40].mxu0  ;;  %v2494_v59 = vpop.f32.mrb[40].mxu1 }
 0x43b   : > { %v2302_v60 = vadd.f32 %v2301_v57, %v5747_v13  ;;  %v2495_v63 = vadd.f32 %v2494_v59, %v5773_v23  ;;  %v2303_v3 = vpop.f32.mrb[41].mxu0  ;;  %v2496_v4 = vpop.f32.mrb[41].mxu1  ;;  %2676 = vmatmul.mubr.bf16.gmra.mrb[100].mxu0 %v5632_v30  ;;  %2869 = vmatmul.mubr.bf16.gmra.mrb[100].mxu1 %v5632_v30 }
 0x43c   : > { %v2304_v14 = vadd.f32 %v2303_v3, %v5751_v33  ;;  %v2497_v61 = vadd.f32 %v2496_v4, %v5776_v52  ;;  %v2305_v37 = vpop.f32.mrb[42].mxu0  ;;  %v2498_v6 = vpop.f32.mrb[42].mxu1  ;;  %2685 = vmatprep.mubr.bf16.mxu0 %v4952_v0  ;;  %2878 = vmatprep.mubr.bf16.mxu1 %v4952_v0 }
 0x43d   : > { %3051 = vst [vmem:[%s5756_s12 + $0x100] sm:$0xff] %v2302_v60  ;;  %v3703_v8 = vmax.f32 %v3702_v48, %v2302_v60  ;;  %3053 = vst [vmem:[%s5756_s12 + $0x110] sm:$0xff] %v2495_v63  ;;  %v3777_v9 = vmax.f32 %v3776_v26, %v2495_v63  ;;  %v2306_v30 = vadd.f32 %v2305_v37, %v5747_v13  ;;  %v2307_v50 = vpop.f32.mrb[43].mxu0  ;;  %v2500_v46 = vpop.f32.mrb[43].mxu1 }
 0x43e   : > { %v2499_v20 = vadd.f32 %v2498_v6, %v5773_v23  ;;  %3052 = vst [vmem:[%s5756_s12 + $0x108] sm:$0xff] %v2304_v14  ;;  %v3740_v53 = vmax.f32 %v3739_v54, %v2304_v14  ;;  %3054 = vst [vmem:[%s5756_s12 + $0x118] sm:$0xff] %v2497_v61  ;;  %v3814_v28 = vmax.f32 %v3813_v51, %v2497_v61 }
 0x43f   : > { %v2308_v58 = vadd.f32 %v2307_v50, %v5751_v33  ;;  %v2501_v39 = vadd.f32 %v2500_v46, %v5776_v52  ;;  %3059 = vst [vmem:[%s5756_s12 + $0x140] sm:$0xff] %v2306_v30  ;;  %v3704_v15 = vmax.f32 %v3703_v8, %v2306_v30 }
 0x440   : > { %3061 = vst [vmem:[%s5756_s12 + $0x150] sm:$0xff] %v2499_v20  ;;  %v3778_v16 = vmax.f32 %v3777_v9, %v2499_v20 }
 0x441   : > { %3060 = vst [vmem:[%s5756_s12 + $0x148] sm:$0xff] %v2308_v58  ;;  %v3741_v17 = vmax.f32 %v3740_v53, %v2308_v58  ;;  %3062 = vst [vmem:[%s5756_s12 + $0x158] sm:$0xff] %v2501_v39  ;;  %v3815_v48 = vmax.f32 %v3814_v28, %v2501_v39 }
 0x442   : > { %v2311_v18 = vpop.f32.mrb[44].mxu0  ;;  %v2504_v19 = vpop.f32.mrb[44].mxu1 }
 0x443   : > { %v2312_v54 = vadd.f32 %v2311_v18, %v5747_v13  ;;  %v2505_v21 = vadd.f32 %v2504_v19, %v5773_v23  ;;  %v2313_v47 = vpop.f32.mrb[45].mxu0  ;;  %v2506_v56 = vpop.f32.mrb[45].mxu1  ;;  %2686 = vmatmul.mubr.bf16.gmra.mrb[104].mxu0 %v5654_v38  ;;  %2879 = vmatmul.mubr.bf16.gmra.mrb[104].mxu1 %v5654_v38 }
 0x444   : > { %v2314_v34 = vadd.f32 %v2313_v47, %v5751_v33  ;;  %v2507_v36 = vadd.f32 %v2506_v56, %v5776_v52  ;;  %v2315_v43 = vpop.f32.mrb[46].mxu0  ;;  %v2508_v29 = vpop.f32.mrb[46].mxu1  ;;  %2695 = vmatprep.mubr.bf16.mxu0 %v4952_v0  ;;  %2888 = vmatprep.mubr.bf16.mxu1 %v4952_v0 }
 0x445   : > { %3067 = vst [vmem:[%s5756_s12 + $0x180] sm:$0xff] %v2312_v54  ;;  %v3705_v49 = vmax.f32 %v3704_v15, %v2312_v54  ;;  %3069 = vst [vmem:[%s5756_s12 + $0x190] sm:$0xff] %v2505_v21  ;;  %v3779_v41 = vmax.f32 %v3778_v16, %v2505_v21  ;;  %v2316_v38 = vadd.f32 %v2315_v43, %v5747_v13  ;;  %v2317_v45 = vpop.f32.mrb[47].mxu0  ;;  %v2510_v42 = vpop.f32.mrb[47].mxu1 }
 0x446   : > { %v2509_v35 = vadd.f32 %v2508_v29, %v5773_v23  ;;  %3068 = vst [vmem:[%s5756_s12 + $0x188] sm:$0xff] %v2314_v34  ;;  %v3742_v62 = vmax.f32 %v3741_v17, %v2314_v34  ;;  %3070 = vst [vmem:[%s5756_s12 + $0x198] sm:$0xff] %v2507_v36  ;;  %v3816_v44 = vmax.f32 %v3815_v48, %v2507_v36 }
 0x447   : > { %v2318_v27 = vadd.f32 %v2317_v45, %v5751_v33  ;;  %v2511_v26 = vadd.f32 %v2510_v42, %v5776_v52  ;;  %3075 = vst [vmem:[%s5756_s12 + $0x1c0] sm:$0xff] %v2316_v38  ;;  %v3706_v51 = vmax.f32 %v3705_v49, %v2316_v38 }
 0x448   : > { %3077 = vst [vmem:[%s5756_s12 + $0x1d0] sm:$0xff] %v2509_v35  ;;  %v3780_v57 = vmax.f32 %v3779_v41, %v2509_v35 }
 0x449   : > { %3076 = vst [vmem:[%s5756_s12 + $0x1c8] sm:$0xff] %v2318_v27  ;;  %v3743_v59 = vmax.f32 %v3742_v62, %v2318_v27  ;;  %3078 = vst [vmem:[%s5756_s12 + $0x1d8] sm:$0xff] %v2511_v26  ;;  %v3817_v60 = vmax.f32 %v3816_v44, %v2511_v26 }
 0x44b   : > { %2696 = vmatmul.mubr.bf16.gmra.mrb[108].mxu0 %v5652_v32  ;;  %2889 = vmatmul.mubr.bf16.gmra.mrb[108].mxu1 %v5652_v32 }
 0x44c   : > { %2705 = vmatprep.mubr.bf16.mxu0 %v4952_v0  ;;  %2898 = vmatprep.mubr.bf16.mxu1 %v4952_v0 }
 0x453   : > { %v2321_v63 = vpop.f32.mrb[48].mxu0  ;;  %v2514_v3 = vpop.f32.mrb[48].mxu1  ;;  %2706 = vmatmul.mubr.bf16.gmra.mrb[112].mxu0 %v5670_v5  ;;  %2899 = vmatmul.mubr.bf16.gmra.mrb[112].mxu1 %v5670_v5 }
 0x454   : > { %v2322_v4 = vadd.f32 %v2321_v63, %v5747_v13  ;;  %v2515_v14 = vadd.f32 %v2514_v3, %v5773_v23  ;;  %v2323_v61 = vpop.f32.mrb[49].mxu0  ;;  %v2516_v37 = vpop.f32.mrb[49].mxu1  ;;  %2715 = vmatprep.mubr.bf16.mxu0 %v4952_v0  ;;  %2908 = vmatprep.mubr.bf16.mxu1 %v4952_v0 }
 0x455   : > { %v2324_v32 = vadd.f32 %v2323_v61, %v5751_v33  ;;  %v2517_v6 = vadd.f32 %v2516_v37, %v5776_v52  ;;  %v2325_v8 = vpop.f32.mrb[50].mxu0  ;;  %v2518_v9 = vpop.f32.mrb[50].mxu1 }
 0x456   : > { %3083 = vst [vmem:[%s5756_s12 + $0x200] sm:$0xff] %v2322_v4  ;;  %v3707_v5 = vmax.f32 %v3706_v51, %v2322_v4  ;;  %3085 = vst [vmem:[%s5756_s12 + $0x210] sm:$0xff] %v2515_v14  ;;  %v3781_v30 = vmax.f32 %v3780_v57, %v2515_v14  ;;  %v2326_v20 = vadd.f32 %v2325_v8, %v5747_v13  ;;  %v2327_v46 = vpop.f32.mrb[51].mxu0  ;;  %v2520_v53 = vpop.f32.mrb[51].mxu1 }
 0x457   : > { %v2519_v50 = vadd.f32 %v2518_v9, %v5773_v23  ;;  %3084 = vst [vmem:[%s5756_s12 + $0x208] sm:$0xff] %v2324_v32  ;;  %v3744_v28 = vmax.f32 %v3743_v59, %v2324_v32  ;;  %3086 = vst [vmem:[%s5756_s12 + $0x218] sm:$0xff] %v2517_v6  ;;  %v3818_v58 = vmax.f32 %v3817_v60, %v2517_v6 }
 0x458   : > { %v2328_v39 = vadd.f32 %v2327_v46, %v5751_v33  ;;  %v2521_v15 = vadd.f32 %v2520_v53, %v5776_v52  ;;  %3091 = vst [vmem:[%s5756_s12 + $0x240] sm:$0xff] %v2326_v20  ;;  %v3708_v16 = vmax.f32 %v3707_v5, %v2326_v20 }
 0x459   : > { %3093 = vst [vmem:[%s5756_s12 + $0x250] sm:$0xff] %v2519_v50  ;;  %v3782_v17 = vmax.f32 %v3781_v30, %v2519_v50 }
 0x45a   : > { %3092 = vst [vmem:[%s5756_s12 + $0x248] sm:$0xff] %v2328_v39  ;;  %v3745_v48 = vmax.f32 %v3744_v28, %v2328_v39  ;;  %3094 = vst [vmem:[%s5756_s12 + $0x258] sm:$0xff] %v2521_v15  ;;  %v3819_v18 = vmax.f32 %v3818_v58, %v2521_v15 }
 0x45b   : > { %v2331_v19 = vpop.f32.mrb[52].mxu0  ;;  %v2524_v54 = vpop.f32.mrb[52].mxu1  ;;  %2716 = vmatmul.mubr.bf16.gmra.mrb[116].mxu0 %v5668_v11  ;;  %2909 = vmatmul.mubr.bf16.gmra.mrb[116].mxu1 %v5668_v11 }
 0x45c   : > { %v2332_v21 = vadd.f32 %v2331_v19, %v5747_v13  ;;  %v2525_v47 = vadd.f32 %v2524_v54, %v5773_v23  ;;  %v2333_v56 = vpop.f32.mrb[53].mxu0  ;;  %v2526_v34 = vpop.f32.mrb[53].mxu1  ;;  %2725 = vmatprep.mubr.bf16.mxu0 %v4952_v0  ;;  %2918 = vmatprep.mubr.bf16.mxu1 %v4952_v0 }
 0x45d   : > { %v2334_v36 = vadd.f32 %v2333_v56, %v5751_v33  ;;  %v2527_v43 = vadd.f32 %v2526_v34, %v5776_v52  ;;  %v2335_v29 = vpop.f32.mrb[54].mxu0  ;;  %v2528_v49 = vpop.f32.mrb[54].mxu1 }
 0x45e   : > { %3099 = vst [vmem:[%s5756_s12 + $0x280] sm:$0xff] %v2332_v21  ;;  %v3709_v11 = vmax.f32 %v3708_v16, %v2332_v21  ;;  %3101 = vst [vmem:[%s5756_s12 + $0x290] sm:$0xff] %v2525_v47  ;;  %v3783_v41 = vmax.f32 %v3782_v17, %v2525_v47  ;;  %v2336_v38 = vadd.f32 %v2335_v29, %v5747_v13  ;;  %v2337_v45 = vpop.f32.mrb[55].mxu0  ;;  %v2530_v42 = vpop.f32.mrb[55].mxu1 }
 0x45f   : > { %v2529_v35 = vadd.f32 %v2528_v49, %v5773_v23  ;;  %3100 = vst [vmem:[%s5756_s12 + $0x288] sm:$0xff] %v2334_v36  ;;  %v3746_v62 = vmax.f32 %v3745_v48, %v2334_v36  ;;  %3102 = vst [vmem:[%s5756_s12 + $0x298] sm:$0xff] %v2527_v43  ;;  %v3820_v44 = vmax.f32 %v3819_v18, %v2527_v43 }
 0x460   : > { %v2338_v27 = vadd.f32 %v2337_v45, %v5751_v33  ;;  %v2531_v26 = vadd.f32 %v2530_v42, %v5776_v52  ;;  %3107 = vst [vmem:[%s5756_s12 + $0x2c0] sm:$0xff] %v2336_v38  ;;  %v3710_v51 = vmax.f32 %v3709_v11, %v2336_v38 }
 0x461   : > { %3109 = vst [vmem:[%s5756_s12 + $0x2d0] sm:$0xff] %v2529_v35  ;;  %v3784_v57 = vmax.f32 %v3783_v41, %v2529_v35 }
 0x462   : > { %3108 = vst [vmem:[%s5756_s12 + $0x2c8] sm:$0xff] %v2338_v27  ;;  %v3747_v59 = vmax.f32 %v3746_v62, %v2338_v27  ;;  %3110 = vst [vmem:[%s5756_s12 + $0x2d8] sm:$0xff] %v2531_v26  ;;  %v3821_v60 = vmax.f32 %v3820_v44, %v2531_v26 }
 0x463   : > { %2726 = vmatmul.mubr.bf16.gmra.mrb[120].mxu0 %v5686_v2  ;;  %2919 = vmatmul.mubr.bf16.gmra.mrb[120].mxu1 %v5686_v2 }
 0x464   : > { %2735 = vmatprep.mubr.bf16.mxu0 %v4952_v0  ;;  %2928 = vmatprep.mubr.bf16.mxu1 %v4952_v0 }
 0x46b   : > { %2736 = vmatmul.mubr.bf16.gmra.mrb[124].mxu0 %v5684_v25  ;;  %2929 = vmatmul.mubr.bf16.gmra.mrb[124].mxu1 %v5684_v25 }
 0x46c   : > { %2745 = vmatprep.mubr.bf16.mxu0 %v4952_v0  ;;  %2938 = vmatprep.mubr.bf16.mxu1 %v4952_v0 }
 0x472   : > { %v2341_v63 = vpop.f32.mrb[56].mxu0  ;;  %v2534_v3 = vpop.f32.mrb[56].mxu1 }
 0x473   : > { %v2342_v4 = vadd.f32 %v2341_v63, %v5747_v13  ;;  %v2535_v2 = vadd.f32 %v2534_v3, %v5773_v23  ;;  %v2343_v14 = vpop.f32.mrb[57].mxu0  ;;  %v2536_v61 = vpop.f32.mrb[57].mxu1  ;;  %2746 = vmatmul.mubr.bf16.gmra.mrb[128].mxu0 %v5702_v22  ;;  %2939 = vmatmul.mubr.bf16.gmra.mrb[128].mxu1 %v5702_v22 }
 0x474   : > { %v2344_v25 = vadd.f32 %v2343_v14, %v5751_v33  ;;  %v2537_v37 = vadd.f32 %v2536_v61, %v5776_v52  ;;  %v2345_v32 = vpop.f32.mrb[58].mxu0  ;;  %v2538_v6 = vpop.f32.mrb[58].mxu1  ;;  %2755 = vmatprep.mubr.bf16.mxu0 %v4952_v0  ;;  %2948 = vmatprep.mubr.bf16.mxu1 %v4952_v0 }
 0x475   : > { %3115 = vst [vmem:[%s5756_s12 + $0x300] sm:$0xff] %v2342_v4  ;;  %v3711_v8 = vmax.f32 %v3710_v51, %v2342_v4  ;;  %3117 = vst [vmem:[%s5756_s12 + $0x310] sm:$0xff] %v2535_v2  ;;  %v3785_v9 = vmax.f32 %v3784_v57, %v2535_v2  ;;  %v2346_v22 = vadd.f32 %v2345_v32, %v5747_v13  ;;  %v2347_v30 = vpop.f32.mrb[59].mxu0  ;;  %v2540_v20 = vpop.f32.mrb[59].mxu1 }
 0x476   : > { %v2539_v5 = vadd.f32 %v2538_v6, %v5773_v23  ;;  %3116 = vst [vmem:[%s5756_s12 + $0x308] sm:$0xff] %v2344_v25  ;;  %v3748_v50 = vmax.f32 %v3747_v59, %v2344_v25  ;;  %3118 = vst [vmem:[%s5756_s12 + $0x318] sm:$0xff] %v2537_v37  ;;  %v3822_v46 = vmax.f32 %v3821_v60, %v2537_v37 }
 0x477   : > { %v2348_v53 = vadd.f32 %v2347_v30, %v5751_v33  ;;  %v2541_v28 = vadd.f32 %v2540_v20, %v5776_v52  ;;  %3123 = vst [vmem:[%s5756_s12 + $0x340] sm:$0xff] %v2346_v22  ;;  %v3712_v58 = vmax.f32 %v3711_v8, %v2346_v22 }
 0x478   : > { %3125 = vst [vmem:[%s5756_s12 + $0x350] sm:$0xff] %v2539_v5  ;;  %v3786_v39 = vmax.f32 %v3785_v9, %v2539_v5 }
 0x479   : > { %3124 = vst [vmem:[%s5756_s12 + $0x348] sm:$0xff] %v2348_v53  ;;  %v3749_v15 = vmax.f32 %v3748_v50, %v2348_v53  ;;  %3126 = vst [vmem:[%s5756_s12 + $0x358] sm:$0xff] %v2541_v28  ;;  %v3823_v16 = vmax.f32 %v3822_v46, %v2541_v28 }
 0x47a   : > { %v2351_v17 = vpop.f32.mrb[60].mxu0  ;;  %v2544_v48 = vpop.f32.mrb[60].mxu1 }
 0x47b   : > { %v2352_v18 = vadd.f32 %v2351_v17, %v5747_v13  ;;  %v2545_v19 = vadd.f32 %v2544_v48, %v5773_v23  ;;  %v2353_v54 = vpop.f32.mrb[61].mxu0  ;;  %v2546_v21 = vpop.f32.mrb[61].mxu1  ;;  %2756 = vmatmul.mubr.bf16.gmra.mrb[132].mxu0 %v5700_v1  ;;  %2949 = vmatmul.mubr.bf16.gmra.mrb[132].mxu1 %v5700_v1 }
 0x47c   : > { %v2354_v47 = vadd.f32 %v2353_v54, %v5751_v33  ;;  %v2547_v56 = vadd.f32 %v2546_v21, %v5776_v52  ;;  %v2355_v34 = vpop.f32.mrb[62].mxu0  ;;  %v2548_v36 = vpop.f32.mrb[62].mxu1  ;;  %2765 = vmatprep.mubr.bf16.mxu0 %v4952_v0  ;;  %2958 = vmatprep.mubr.bf16.mxu1 %v4952_v0 }
 0x47d   : > { %3131 = vst [vmem:[%s5756_s12 + $0x380] sm:$0xff] %v2352_v18  ;;  %v3713_v43 = vmax.f32 %v3712_v58, %v2352_v18  ;;  %3133 = vst [vmem:[%s5756_s12 + $0x390] sm:$0xff] %v2545_v19  ;;  %v3787_v29 = vmax.f32 %v3786_v39, %v2545_v19  ;;  %v2356_v1 = vadd.f32 %v2355_v34, %v5747_v13  ;;  %v2357_v11 = vpop.f32.mrb[63].mxu0  ;;  %v2550_v41 = vpop.f32.mrb[63].mxu1 }
 0x47e   : > { %v2549_v49 = vadd.f32 %v2548_v36, %v5773_v23  ;;  %3132 = vst [vmem:[%s5756_s12 + $0x388] sm:$0xff] %v2354_v47  ;;  %v3750_v38 = vmax.f32 %v3749_v15, %v2354_v47  ;;  %3134 = vst [vmem:[%s5756_s12 + $0x398] sm:$0xff] %v2547_v56  ;;  %v3824_v35 = vmax.f32 %v3823_v16, %v2547_v56 }
 0x47f   : > { %v2358_v45 = vadd.f32 %v2357_v11, %v5751_v33  ;;  %v2551_v42 = vadd.f32 %v2550_v41, %v5776_v52  ;;  %3139 = vst [vmem:[%s5756_s12 + $0x3c0] sm:$0xff] %v2356_v1  ;;  %v3714_v62 = vmax.f32 %v3713_v43, %v2356_v1 }
 0x480   : > { %3141 = vst [vmem:[%s5756_s12 + $0x3d0] sm:$0xff] %v2549_v49  ;;  %v3788_v44 = vmax.f32 %v3787_v29, %v2549_v49 }
 0x481   : > { %3140 = vst [vmem:[%s5756_s12 + $0x3c8] sm:$0xff] %v2358_v45  ;;  %v3751_v27 = vmax.f32 %v3750_v38, %v2358_v45  ;;  %3142 = vst [vmem:[%s5756_s12 + $0x3d8] sm:$0xff] %v2551_v42  ;;  %v3825_v26 = vmax.f32 %v3824_v35, %v2551_v42 }
 0x483   : > { %2766 = vmatmul.mubr.bf16.gmra.mrb[136].mxu0 %v5718_v55  ;;  %2959 = vmatmul.mubr.bf16.gmra.mrb[136].mxu1 %v5718_v55 }
 0x484   : > { %2775 = vmatprep.mubr.bf16.mxu0 %v4952_v0  ;;  %2968 = vmatprep.mubr.bf16.mxu1 %v4952_v0 }
 0x48b   : > { %2776 = vmatmul.mubr.bf16.gmra.mrb[140].mxu0 %v5716_v12  ;;  %2969 = vmatmul.mubr.bf16.gmra.mrb[140].mxu1 %v5716_v12 }
 0x48c   : > { %2785 = vmatprep.mubr.bf16.mxu0 %v4952_v0  ;;  %2978 = vmatprep.mubr.bf16.mxu1 %v4952_v0 }
 0x493   : > { %2786 = vmatmul.mubr.bf16.gmra.mrb[144].mxu0 %v5734_v24  ;;  %2979 = vmatmul.mubr.bf16.gmra.mrb[144].mxu1 %v5734_v24 }
 0x494   : > { %2795 = vmatprep.mubr.bf16.mxu0 %v4952_v0  ;;  %2988 = vmatprep.mubr.bf16.mxu1 %v4952_v0 }
 0x495   : > { %v2361_v55 = vpop.f32.mrb[64].mxu0  ;;  %v2554_v51 = vpop.f32.mrb[64].mxu1 }
 0x496   : > { %v2362_v57 = vadd.f32 %v2361_v55, %v5747_v13  ;;  %v2555_v12 = vadd.f32 %v2554_v51, %v5773_v23  ;;  %v2363_v59 = vpop.f32.mrb[65].mxu0  ;;  %v2556_v60 = vpop.f32.mrb[65].mxu1 }
 0x497   : > { %v2364_v63 = vadd.f32 %v2363_v59, %v5751_v33  ;;  %v2557_v3 = vadd.f32 %v2556_v60, %v5776_v52  ;;  %v2365_v4 = vpop.f32.mrb[66].mxu0  ;;  %v2558_v24 = vpop.f32.mrb[66].mxu1 }
 0x498   : > { %3147 = vst [vmem:[%s5756_s12 + $0x400] sm:$0xff] %v2362_v57  ;;  %v3715_v2 = vmax.f32 %v3714_v62, %v2362_v57  ;;  %3149 = vst [vmem:[%s5756_s12 + $0x410] sm:$0xff] %v2555_v12  ;;  %v3789_v14 = vmax.f32 %v3788_v44, %v2555_v12  ;;  %v2366_v61 = vadd.f32 %v2365_v4, %v5747_v13  ;;  %v2367_v37 = vpop.f32.mrb[67].mxu0  ;;  %v2560_v32 = vpop.f32.mrb[67].mxu1 }
 0x499   : > { %v2559_v25 = vadd.f32 %v2558_v24, %v5773_v23  ;;  %3148 = vst [vmem:[%s5756_s12 + $0x408] sm:$0xff] %v2364_v63  ;;  %v3752_v6 = vmax.f32 %v3751_v27, %v2364_v63  ;;  %3150 = vst [vmem:[%s5756_s12 + $0x418] sm:$0xff] %v2557_v3  ;;  %v3826_v8 = vmax.f32 %v3825_v26, %v2557_v3 }
 0x49a   : > { %v2368_v9 = vadd.f32 %v2367_v37, %v5751_v33  ;;  %v2561_v22 = vadd.f32 %v2560_v32, %v5776_v52  ;;  %3155 = vst [vmem:[%s5756_s12 + $0x440] sm:$0xff] %v2366_v61  ;;  %v3716_v5 = vmax.f32 %v3715_v2, %v2366_v61 }
 0x49b   : > { %3157 = vst [vmem:[%s5756_s12 + $0x450] sm:$0xff] %v2559_v25  ;;  %v3790_v30 = vmax.f32 %v3789_v14, %v2559_v25  ;;  %2796 = vmatmul.mubr.bf16.gmra.mrb[148].mxu0 %v5732_v7  ;;  %2989 = vmatmul.mubr.bf16.gmra.mrb[148].mxu1 %v5732_v7 }
 0x49c   : > { %3156 = vst [vmem:[%s5756_s12 + $0x448] sm:$0xff] %v2368_v9  ;;  %v3753_v20 = vmax.f32 %v3752_v6, %v2368_v9  ;;  %3158 = vst [vmem:[%s5756_s12 + $0x458] sm:$0xff] %v2561_v22  ;;  %v3827_v50 = vmax.f32 %v3826_v8, %v2561_v22  ;;  %2805 = vmatprep.mubr.bf16.mxu0 %v4952_v0  ;;  %2998 = vmatprep.mubr.bf16.mxu1 %v4952_v0 }
 0x49d   : > { %v2371_v46 = vpop.f32.mrb[68].mxu0  ;;  %v2564_v53 = vpop.f32.mrb[68].mxu1 }
 0x49e   : > { %v2372_v28 = vadd.f32 %v2371_v46, %v5747_v13  ;;  %v2565_v58 = vadd.f32 %v2564_v53, %v5773_v23  ;;  %v2373_v39 = vpop.f32.mrb[69].mxu0  ;;  %v2566_v15 = vpop.f32.mrb[69].mxu1 }
 0x49f   : > { %v2374_v16 = vadd.f32 %v2373_v39, %v5751_v33  ;;  %v2567_v17 = vadd.f32 %v2566_v15, %v5776_v52  ;;  %v2375_v48 = vpop.f32.mrb[70].mxu0  ;;  %v2568_v7 = vpop.f32.mrb[70].mxu1 }
 0x4a0   : > { %3163 = vst [vmem:[%s5756_s12 + $0x480] sm:$0xff] %v2372_v28  ;;  %v3717_v18 = vmax.f32 %v3716_v5, %v2372_v28  ;;  %3165 = vst [vmem:[%s5756_s12 + $0x490] sm:$0xff] %v2565_v58  ;;  %v3791_v19 = vmax.f32 %v3790_v30, %v2565_v58  ;;  %v2376_v54 = vadd.f32 %v2375_v48, %v5747_v13  ;;  %v2377_v47 = vpop.f32.mrb[71].mxu0  ;;  %v2570_v56 = vpop.f32.mrb[71].mxu1 }
 0x4a1   : > { %v2569_v21 = vadd.f32 %v2568_v7, %v5773_v23  ;;  %3164 = vst [vmem:[%s5756_s12 + $0x488] sm:$0xff] %v2374_v16  ;;  %v3754_v34 = vmax.f32 %v3753_v20, %v2374_v16  ;;  %3166 = vst [vmem:[%s5756_s12 + $0x498] sm:$0xff] %v2567_v17  ;;  %v3828_v36 = vmax.f32 %v3827_v50, %v2567_v17 }
 0x4a2   : > { %v2378_v43 = vadd.f32 %v2377_v47, %v5751_v33  ;;  %v2571_v29 = vadd.f32 %v2570_v56, %v5776_v52  ;;  %3171 = vst [vmem:[%s5756_s12 + $0x4c0] sm:$0xff] %v2376_v54  ;;  %v3718_v1 = vmax.f32 %v3717_v18, %v2376_v54 }
 0x4a3   : > { %3173 = vst [vmem:[%s5756_s12 + $0x4d0] sm:$0xff] %v2569_v21  ;;  %v3792_v49 = vmax.f32 %v3791_v19, %v2569_v21  ;;  %2806 = vmatmul.mubr.bf16.gmra.mrb[152].mxu0 %v5781_v31  ;;  %2999 = vmatmul.mubr.bf16.gmra.mrb[152].mxu1 %v5781_v31 }
 0x4a4   : > { %3172 = vst [vmem:[%s5756_s12 + $0x4c8] sm:$0xff] %v2378_v43  ;;  %v3755_v11 = vmax.f32 %v3754_v34, %v2378_v43  ;;  %3174 = vst [vmem:[%s5756_s12 + $0x4d8] sm:$0xff] %v2571_v29  ;;  %v3829_v41 = vmax.f32 %v3828_v36, %v2571_v29  ;;  %2815 = vmatprep.mubr.bf16.mxu0 %v4952_v0  ;;  %3008 = vmatprep.mubr.bf16.mxu1 %v4952_v0 }
 0x4ab   : > { %2816 = vmatmul.mubr.bf16.gmra.mrb[156].mxu0 %v5778_v10  ;;  %3009 = vmatmul.mubr.bf16.gmra.mrb[156].mxu1 %v5778_v10 }
 0x4b4   : > { %v2381_v38 = vpop.f32.mrb[72].mxu0  ;;  %v2574_v35 = vpop.f32.mrb[72].mxu1 }
 0x4b5   : > { %v2382_v45 = vadd.f32 %v2381_v38, %v5747_v13  ;;  %v2575_v42 = vadd.f32 %v2574_v35, %v5773_v23  ;;  %v2383_v62 = vpop.f32.mrb[73].mxu0  ;;  %v2576_v44 = vpop.f32.mrb[73].mxu1 }
 0x4b6   : > { %v2384_v31 = vadd.f32 %v2383_v62, %v5751_v33  ;;  %v2577_v27 = vadd.f32 %v2576_v44, %v5776_v52  ;;  %v2385_v26 = vpop.f32.mrb[74].mxu0  ;;  %v2578_v0 = vpop.f32.mrb[74].mxu1 }
 0x4b7   : > { %3179 = vst [vmem:[%s5756_s12 + $0x500] sm:$0xff] %v2382_v45  ;;  %v3719_v10 = vmax.f32 %v3718_v1, %v2382_v45  ;;  %3181 = vst [vmem:[%s5756_s12 + $0x510] sm:$0xff] %v2575_v42  ;;  %v3793_v55 = vmax.f32 %v3792_v49, %v2575_v42  ;;  %v2386_v51 = vadd.f32 %v2385_v26, %v5747_v13  ;;  %v2387_v12 = vpop.f32.mrb[75].mxu0  ;;  %v2580_v59 = vpop.f32.mrb[75].mxu1  ;;  %v4955_v1 = vmov 1966171168  }
 0x4b8   : > { %v2579_v57 = vadd.f32 %v2578_v0, %v5773_v23  ;;  %3180 = vst [vmem:[%s5756_s12 + $0x508] sm:$0xff] %v2384_v31  ;;  %v3756_v60 = vmax.f32 %v3755_v11, %v2384_v31  ;;  %3182 = vst [vmem:[%s5756_s12 + $0x518] sm:$0xff] %v2577_v27  ;;  %v3830_v63 = vmax.f32 %v3829_v41, %v2577_v27  ;;  %v6052_v49 = vunpack.c.l.s4 %v4955_v1 }
 0x4b9   : > { %v2388_v3 = vadd.f32 %v2387_v12, %v5751_v33  ;;  %v2581_v4 = vadd.f32 %v2580_v59, %v5776_v52  ;;  %3187 = vst [vmem:[%s5756_s12 + $0x540] sm:$0xff] %v2386_v51  ;;  %v3720_v24 = vmax.f32 %v3719_v10, %v2386_v51 }
 0x4ba   : > { %3189 = vst [vmem:[%s5756_s12 + $0x550] sm:$0xff] %v2579_v57  ;;  %v3794_v2 = vmax.f32 %v3793_v55, %v2579_v57 }
 0x4bb   : > { %3188 = vst [vmem:[%s5756_s12 + $0x548] sm:$0xff] %v2388_v3  ;;  %v3757_v14 = vmax.f32 %v3756_v60, %v2388_v3  ;;  %3190 = vst [vmem:[%s5756_s12 + $0x558] sm:$0xff] %v2581_v4  ;;  %v3831_v61 = vmax.f32 %v3830_v63, %v2581_v4  ;;  %v4010_v3 = vunpack.c.0.s8 %v6052_v49 }
 0x4bc   : > { %v2391_v25 = vpop.f32.mrb[76].mxu0  ;;  %v2584_v37 = vpop.f32.mrb[76].mxu1 }
 0x4bd   : > { %v2392_v32 = vadd.f32 %v2391_v25, %v5747_v13  ;;  %v2585_v6 = vadd.f32 %v2584_v37, %v5773_v23  ;;  %v2393_v8 = vpop.f32.mrb[77].mxu0  ;;  %v2586_v9 = vpop.f32.mrb[77].mxu1 }
 0x4be   : > { %v2394_v22 = vadd.f32 %v2393_v8, %v5751_v33  ;;  %v2587_v5 = vadd.f32 %v2586_v9, %v5776_v52  ;;  %v2395_v30 = vpop.f32.mrb[78].mxu0  ;;  %v2588_v20 = vpop.f32.mrb[78].mxu1 }
 0x4bf   : > { %3195 = vst [vmem:[%s5756_s12 + $0x580] sm:$0xff] %v2392_v32  ;;  %v3721_v50 = vmax.f32 %v3720_v24, %v2392_v32  ;;  %3197 = vst [vmem:[%s5756_s12 + $0x590] sm:$0xff] %v2585_v6  ;;  %v3795_v46 = vmax.f32 %v3794_v2, %v2585_v6  ;;  %v2396_v53 = vadd.f32 %v2395_v30, %v5747_v13  ;;  %v2397_v58 = vpop.f32.mrb[79].mxu0  ;;  %v2590_v39 = vpop.f32.mrb[79].mxu1 }
 0x4c0   : > { %v2589_v28 = vadd.f32 %v2588_v20, %v5773_v23  ;;  %3196 = vst [vmem:[%s5756_s12 + $0x588] sm:$0xff] %v2394_v22  ;;  %v3758_v15 = vmax.f32 %v3757_v14, %v2394_v22  ;;  %3198 = vst [vmem:[%s5756_s12 + $0x598] sm:$0xff] %v2587_v5  ;;  %v3832_v16 = vmax.f32 %v3831_v61, %v2587_v5 }
 0x4c1   : > { %v2398_v17 = vadd.f32 %v2397_v58, %v5751_v33  ;;  %v2591_v48 = vadd.f32 %v2590_v39, %v5776_v52  ;;  %3203 = vst [vmem:[%s5756_s12 + $0x5c0] sm:$0xff] %v2396_v53  ;;  %v3722_v7 = vmax.f32 %v3721_v50, %v2396_v53 }
 0x4c2   : > { %3205 = vst [vmem:[%s5756_s12 + $0x5d0] sm:$0xff] %v2589_v28  ;;  %v3796_v18 = vmax.f32 %v3795_v46, %v2589_v28 }
 0x4c3   : > { %3204 = vst [vmem:[%s5756_s12 + $0x5c8] sm:$0xff] %v2398_v17  ;;  %v3759_v19 = vmax.f32 %v3758_v15, %v2398_v17  ;;  %3206 = vst [vmem:[%s5756_s12 + $0x5d8] sm:$0xff] %v2591_v48  ;;  %v3833_v54 = vmax.f32 %v3832_v16, %v2591_v48 }
 0x4d7   : > { %v2401_v21 = vpop.f32.mrb[80].mxu0  ;;  %v2594_v47 = vpop.f32.mrb[80].mxu1 }
 0x4d8   : > { %v2402_v56 = vadd.f32 %v2401_v21, %v5747_v13  ;;  %v2595_v34 = vadd.f32 %v2594_v47, %v5773_v23  ;;  %v2403_v36 = vpop.f32.mrb[81].mxu0  ;;  %v2596_v43 = vpop.f32.mrb[81].mxu1 }
 0x4d9   : > { %v2404_v29 = vadd.f32 %v2403_v36, %v5751_v33  ;;  %v2597_v11 = vadd.f32 %v2596_v43, %v5776_v52  ;;  %v2405_v41 = vpop.f32.mrb[82].mxu0  ;;  %v2598_v38 = vpop.f32.mrb[82].mxu1 }
 0x4da   : > { %3211 = vst [vmem:[%s5756_s12 + $0x600] sm:$0xff] %v2402_v56  ;;  %v3723_v35 = vmax.f32 %v3722_v7, %v2402_v56  ;;  %3213 = vst [vmem:[%s5756_s12 + $0x610] sm:$0xff] %v2595_v34  ;;  %v3797_v45 = vmax.f32 %v3796_v18, %v2595_v34  ;;  %v2406_v42 = vadd.f32 %v2405_v41, %v5747_v13  ;;  %v2407_v44 = vpop.f32.mrb[83].mxu0  ;;  %v2600_v31 = vpop.f32.mrb[83].mxu1 }
 0x4db   : > { %v2599_v62 = vadd.f32 %v2598_v38, %v5773_v23  ;;  %3212 = vst [vmem:[%s5756_s12 + $0x608] sm:$0xff] %v2404_v29  ;;  %v3760_v27 = vmax.f32 %v3759_v19, %v2404_v29  ;;  %3214 = vst [vmem:[%s5756_s12 + $0x618] sm:$0xff] %v2597_v11  ;;  %v3834_v26 = vmax.f32 %v3833_v54, %v2597_v11 }
 0x4dc   : > { %v2408_v0 = vadd.f32 %v2407_v44, %v5751_v33  ;;  %v2601_v10 = vadd.f32 %v2600_v31, %v5776_v52  ;;  %v3731_v55 = vrot.slane %v3723_v35, 4  ;;  %v3805_v51 = vrot.slane %v3797_v45, 4  ;;  %3219 = vst [vmem:[%s5756_s12 + $0x640] sm:$0xff] %v2406_v42 }
 0x4dd   : > { %3221 = vst [vmem:[%s5756_s12 + $0x650] sm:$0xff] %v2599_v62  ;;  %v3768_v57 = vrot.slane %v3760_v27, 4  ;;  %v3842_v12 = vrot.slane %v3834_v26, 4  ;;  %v6085_v34 = vsub.s32 %v4010_v3, %v5338_v40 }
 0x4de   : > { %3220 = vst [vmem:[%s5756_s12 + $0x648] sm:$0xff] %v2408_v0  ;;  %3222 = vst [vmem:[%s5756_s12 + $0x658] sm:$0xff] %v2601_v10  ;;  %v3732_v59 = vmax.f32 %v3723_v35, %v3731_v55  ;;  %v3806_v60 = vmax.f32 %v3797_v45, %v3805_v51 }
 0x4df   : > { %v3769_v63 = vmax.f32 %v3760_v27, %v3768_v57  ;;  %v3843_v4 = vmax.f32 %v3834_v26, %v3842_v12  ;;  %v2411_v24 = vpop.f32.mrb[84].mxu0  ;;  %v2604_v2 = vpop.f32.mrb[84].mxu1 }
 0x4e0   : > { %v3733_v14 = vrot.slane %v3732_v59, 2  ;;  %v3807_v61 = vrot.slane %v3806_v60, 2  ;;  %v2412_v25 = vadd.f32 %v2411_v24, %v5747_v13  ;;  %v2605_v37 = vadd.f32 %v2604_v2, %v5773_v23  ;;  %v2413_v32 = vpop.f32.mrb[85].mxu0  ;;  %v2606_v6 = vpop.f32.mrb[85].mxu1 }
 0x4e1   : > { %v3770_v8 = vrot.slane %v3769_v63, 2  ;;  %v3844_v9 = vrot.slane %v3843_v4, 2  ;;  %v2414_v22 = vadd.f32 %v2413_v32, %v5751_v33  ;;  %v2607_v5 = vadd.f32 %v2606_v6, %v5776_v52  ;;  %v2415_v30 = vpop.f32.mrb[86].mxu0  ;;  %v2608_v20 = vpop.f32.mrb[86].mxu1 }
 0x4e2   : > { %v3734_v50 = vmax.f32 %v3732_v59, %v3733_v14  ;;  %v3808_v46 = vmax.f32 %v3806_v60, %v3807_v61  ;;  %3227 = vst [vmem:[%s5756_s12 + $0x680] sm:$0xff] %v2412_v25  ;;  %3229 = vst [vmem:[%s5756_s12 + $0x690] sm:$0xff] %v2605_v37  ;;  %v2416_v53 = vadd.f32 %v2415_v30, %v5747_v13  ;;  %v2417_v58 = vpop.f32.mrb[87].mxu0  ;;  %v2610_v39 = vpop.f32.mrb[87].mxu1  ;;  %v1905_v2 = vsub.s32 4, %v5338_v40 }
 0x4e3   : > { %v2609_v28 = vadd.f32 %v2608_v20, %v5773_v23  ;;  %v3771_v15 = vmax.f32 %v3769_v63, %v3770_v8  ;;  %v3845_v16 = vmax.f32 %v3843_v4, %v3844_v9  ;;  %3228 = vst [vmem:[%s5756_s12 + $0x688] sm:$0xff] %v2414_v22  ;;  %3230 = vst [vmem:[%s5756_s12 + $0x698] sm:$0xff] %v2607_v5  ;;  %v1913_v14 = vsub.s32 6, %v5338_v40 }
 0x4e4   : > { %v2418_v17 = vadd.f32 %v2417_v58, %v5751_v33  ;;  %v2611_v48 = vadd.f32 %v2610_v39, %v5776_v52  ;;  %v3735_v7 = vrot.slane %v3734_v50, 1  ;;  %v3809_v18 = vrot.slane %v3808_v46, 1  ;;  %3235 = vst [vmem:[%s5756_s12 + $0x6c0] sm:$0xff] %v2416_v53 }
 0x4e5   : > { %3237 = vst [vmem:[%s5756_s12 + $0x6d0] sm:$0xff] %v2609_v28  ;;  %v3772_v19 = vrot.slane %v3771_v15, 1  ;;  %v3846_v54 = vrot.slane %v3845_v16, 1  ;;  %v1909_v6 = vsub.s32 5, %v5338_v40  ;;  %v1917_v8 = vsub.s32 7, %v5338_v40 }
 0x4e6   : > { %3236 = vst [vmem:[%s5756_s12 + $0x6c8] sm:$0xff] %v2418_v17  ;;  %3238 = vst [vmem:[%s5756_s12 + $0x6d8] sm:$0xff] %v2611_v48  ;;  %v3736_v21 = vmax.f32 %v3734_v50, %v3735_v7  ;;  %v3810_v47 = vmax.f32 %v3808_v46, %v3809_v18  ;;  %v4671_v46 = vld [vmem:[#allocation13] sm:$0xff] }
 0x4e7   : > { %v3773_v56 = vmax.f32 %v3771_v15, %v3772_v19  ;;  %v3847_v36 = vmax.f32 %v3845_v16, %v3846_v54  ;;  %v6129_v40 = vrot.slane %v4671_v46, %v1905_v2  ;;  %v6131_v53 = vrot.slane %v4671_v46, %v1913_v14 }
 0x4e9   : > { %v4004_v43 = vcombine.low %v3736_v21, %v3773_v56  ;;  %v4005_v29 = vcombine.low %v3810_v47, %v3847_v36 }
 0x4eb   : > { %v6088_v1 = vrot.slane %v4004_v43, %v6085_v34  ;;  %v6091_v49 = vrot.slane %v4005_v29, %v6085_v34 }
 0x4ed   : > { %v4036_v11 = vcombine.low %v6088_v1, %v6091_v49 }
 0x4f6   : > { %v2421_v41 = vpop.f32.mrb[88].mxu0  ;;  %v2614_v38 = vpop.f32.mrb[88].mxu1 }
 0x4f7   : > { %v2422_v35 = vadd.f32 %v2421_v41, %v5747_v13  ;;  %v2615_v45 = vadd.f32 %v2614_v38, %v5773_v23  ;;  %v2423_v42 = vpop.f32.mrb[89].mxu0  ;;  %v2616_v62 = vpop.f32.mrb[89].mxu1 }
 0x4f8   : > { %v2424_v44 = vadd.f32 %v2423_v42, %v5751_v33  ;;  %v2617_v31 = vadd.f32 %v2616_v62, %v5776_v52  ;;  %v2425_v27 = vpop.f32.mrb[90].mxu0  ;;  %v2618_v26 = vpop.f32.mrb[90].mxu1 }
 0x4f9   : > { %3243 = vst [vmem:[%s5756_s12 + $0x700] sm:$0xff] %v2422_v35  ;;  %3245 = vst [vmem:[%s5756_s12 + $0x710] sm:$0xff] %v2615_v45  ;;  %v2426_v0 = vadd.f32 %v2425_v27, %v5747_v13  ;;  %v2619_v10 = vadd.f32 %v2618_v26, %v5773_v23  ;;  %v2427_v55 = vpop.f32.mrb[91].mxu0  ;;  %v2620_v51 = vpop.f32.mrb[91].mxu1 }
 0x4fa   : > { %3244 = vst [vmem:[%s5756_s12 + $0x708] sm:$0xff] %v2424_v44  ;;  %3246 = vst [vmem:[%s5756_s12 + $0x718] sm:$0xff] %v2617_v31  ;;  %v2428_v57 = vadd.f32 %v2427_v55, %v5751_v33  ;;  %v2621_v12 = vadd.f32 %v2620_v51, %v5776_v52 }
 0x4fb   : > { %3251 = vst [vmem:[%s5756_s12 + $0x740] sm:$0xff] %v2426_v0  ;;  %3253 = vst [vmem:[%s5756_s12 + $0x750] sm:$0xff] %v2619_v10 }
 0x4fc   : > { %3252 = vst [vmem:[%s5756_s12 + $0x748] sm:$0xff] %v2428_v57  ;;  %3254 = vst [vmem:[%s5756_s12 + $0x758] sm:$0xff] %v2621_v12 }
 0x4fe   : > { %v2431_v59 = vpop.f32.mrb[92].mxu0  ;;  %v2624_v60 = vpop.f32.mrb[92].mxu1 }
 0x4ff   : > { %v2432_v63 = vadd.f32 %v2431_v59, %v5747_v13  ;;  %v2625_v3 = vadd.f32 %v2624_v60, %v5773_v23  ;;  %v2433_v4 = vpop.f32.mrb[93].mxu0  ;;  %v2626_v24 = vpop.f32.mrb[93].mxu1 }
 0x500   : > { %v2434_v61 = vadd.f32 %v2433_v4, %v5751_v33  ;;  %v2627_v25 = vadd.f32 %v2626_v24, %v5776_v52  ;;  %v2435_v37 = vpop.f32.mrb[94].mxu0  ;;  %v2628_v32 = vpop.f32.mrb[94].mxu1 }
 0x501   : > { %3259 = vst [vmem:[%s5756_s12 + $0x780] sm:$0xff] %v2432_v63  ;;  %3261 = vst [vmem:[%s5756_s12 + $0x790] sm:$0xff] %v2625_v3  ;;  %v2436_v9 = vadd.f32 %v2435_v37, %v5747_v13  ;;  %v2629_v22 = vadd.f32 %v2628_v32, %v5773_v23  ;;  %v2437_v5 = vpop.f32.mrb[95].mxu0  ;;  %v2630_v30 = vpop.f32.mrb[95].mxu1  ;;  %v6135_v13 = vrot.slane %v4671_v46, %v1909_v6 }
 0x502   : > { %3260 = vst [vmem:[%s5756_s12 + $0x788] sm:$0xff] %v2434_v61  ;;  %3262 = vst [vmem:[%s5756_s12 + $0x798] sm:$0xff] %v2627_v25  ;;  %v2438_v20 = vadd.f32 %v2437_v5, %v5751_v33  ;;  %v2631_v50 = vadd.f32 %v2630_v30, %v5776_v52  ;;  %v6137_v23 = vrot.slane %v4671_v46, %v1917_v8 }
 0x503   : > { %3267 = vst [vmem:[%s5756_s12 + $0x7c0] sm:$0xff] %v2436_v9  ;;  %3269 = vst [vmem:[%s5756_s12 + $0x7d0] sm:$0xff] %v2629_v22 }
 0x504   : > { %3268 = vst [vmem:[%s5756_s12 + $0x7c8] sm:$0xff] %v2438_v20  ;;  %3270 = vst [vmem:[%s5756_s12 + $0x7d8] sm:$0xff] %v2631_v50 }
 0x506   : > { %v2667_v28 = vpop.f32.mrb[96].mxu0  ;;  %v2860_v33 = vpop.f32.mrb[96].mxu1 }
 0x507   : > { %v2668_v52 = vadd.f32 %v2667_v28, %v6129_v40  ;;  %v2861_v58 = vadd.f32 %v2860_v33, %v6131_v53  ;;  %v2669_v39 = vpop.f32.mrb[97].mxu0  ;;  %v2862_v15 = vpop.f32.mrb[97].mxu1 }
 0x508   : > { %v2670_v16 = vadd.f32 %v2669_v39, %v6135_v13  ;;  %v2863_v17 = vadd.f32 %v2862_v15, %v6137_v23  ;;  %v2671_v48 = vpop.f32.mrb[98].mxu0  ;;  %v2864_v7 = vpop.f32.mrb[98].mxu1 }
 0x509   : > { %3023 = vst [vmem:[%s5756_s12 + $0x20] sm:$0xff] %v2668_v52  ;;  %3025 = vst [vmem:[%s5756_s12 + $0x30] sm:$0xff] %v2861_v58  ;;  %v2672_v18 = vadd.f32 %v2671_v48, %v6129_v40  ;;  %v2865_v19 = vadd.f32 %v2864_v7, %v6131_v53  ;;  %v2673_v54 = vpop.f32.mrb[99].mxu0  ;;  %v2866_v21 = vpop.f32.mrb[99].mxu1 }
 0x50a   : > { %3024 = vst [vmem:[%s5756_s12 + $0x28] sm:$0xff] %v2670_v16  ;;  %3026 = vst [vmem:[%s5756_s12 + $0x38] sm:$0xff] %v2863_v17  ;;  %v2674_v47 = vadd.f32 %v2673_v54, %v6135_v13  ;;  %v2867_v56 = vadd.f32 %v2866_v21, %v6137_v23 }
 0x50b   : > { %3031 = vst [vmem:[%s5756_s12 + $0x60] sm:$0xff] %v2672_v18  ;;  %v3848_v36 = vmax.f32 %v2668_v52, %v2672_v18  ;;  %3033 = vst [vmem:[%s5756_s12 + $0x70] sm:$0xff] %v2865_v19  ;;  %v3922_v43 = vmax.f32 %v2861_v58, %v2865_v19 }
 0x50c   : > { %3032 = vst [vmem:[%s5756_s12 + $0x68] sm:$0xff] %v2674_v47  ;;  %v3885_v29 = vmax.f32 %v2670_v16, %v2674_v47  ;;  %3034 = vst [vmem:[%s5756_s12 + $0x78] sm:$0xff] %v2867_v56  ;;  %v3959_v41 = vmax.f32 %v2863_v17, %v2867_v56 }
 0x50e   : > { %v2677_v38 = vpop.f32.mrb[100].mxu0  ;;  %v2870_v35 = vpop.f32.mrb[100].mxu1 }
 0x50f   : > { %v2678_v45 = vadd.f32 %v2677_v38, %v6129_v40  ;;  %v2871_v42 = vadd.f32 %v2870_v35, %v6131_v53  ;;  %v2679_v62 = vpop.f32.mrb[101].mxu0  ;;  %v2872_v44 = vpop.f32.mrb[101].mxu1 }
 0x510   : > { %v2680_v31 = vadd.f32 %v2679_v62, %v6135_v13  ;;  %v2873_v27 = vadd.f32 %v2872_v44, %v6137_v23  ;;  %v2681_v26 = vpop.f32.mrb[102].mxu0  ;;  %v2874_v0 = vpop.f32.mrb[102].mxu1 }
 0x511   : > { %3039 = vst [vmem:[%s5756_s12 + $0xa0] sm:$0xff] %v2678_v45  ;;  %v3849_v10 = vmax.f32 %v3848_v36, %v2678_v45  ;;  %3041 = vst [vmem:[%s5756_s12 + $0xb0] sm:$0xff] %v2871_v42  ;;  %v3923_v55 = vmax.f32 %v3922_v43, %v2871_v42  ;;  %v2682_v51 = vadd.f32 %v2681_v26, %v6129_v40  ;;  %v2683_v12 = vpop.f32.mrb[103].mxu0  ;;  %v2876_v59 = vpop.f32.mrb[103].mxu1 }
 0x512   : > { %v2875_v57 = vadd.f32 %v2874_v0, %v6131_v53  ;;  %3040 = vst [vmem:[%s5756_s12 + $0xa8] sm:$0xff] %v2680_v31  ;;  %v3886_v60 = vmax.f32 %v3885_v29, %v2680_v31  ;;  %3042 = vst [vmem:[%s5756_s12 + $0xb8] sm:$0xff] %v2873_v27  ;;  %v3960_v63 = vmax.f32 %v3959_v41, %v2873_v27 }
 0x513   : > { %v2684_v3 = vadd.f32 %v2683_v12, %v6135_v13  ;;  %v2877_v4 = vadd.f32 %v2876_v59, %v6137_v23  ;;  %3047 = vst [vmem:[%s5756_s12 + $0xe0] sm:$0xff] %v2682_v51  ;;  %v3850_v24 = vmax.f32 %v3849_v10, %v2682_v51 }
 0x514   : > { %3049 = vst [vmem:[%s5756_s12 + $0xf0] sm:$0xff] %v2875_v57  ;;  %v3924_v2 = vmax.f32 %v3923_v55, %v2875_v57 }
 0x515   : > { %3048 = vst [vmem:[%s5756_s12 + $0xe8] sm:$0xff] %v2684_v3  ;;  %v3887_v14 = vmax.f32 %v3886_v60, %v2684_v3  ;;  %3050 = vst [vmem:[%s5756_s12 + $0xf8] sm:$0xff] %v2877_v4  ;;  %v3961_v61 = vmax.f32 %v3960_v63, %v2877_v4 }
 0x516   : > { %v2687_v25 = vpop.f32.mrb[104].mxu0  ;;  %v2880_v37 = vpop.f32.mrb[104].mxu1 }
 0x517   : > { %v2688_v32 = vadd.f32 %v2687_v25, %v6129_v40  ;;  %v2881_v6 = vadd.f32 %v2880_v37, %v6131_v53  ;;  %v2689_v8 = vpop.f32.mrb[105].mxu0  ;;  %v2882_v9 = vpop.f32.mrb[105].mxu1 }
 0x518   : > { %v2690_v22 = vadd.f32 %v2689_v8, %v6135_v13  ;;  %v2883_v5 = vadd.f32 %v2882_v9, %v6137_v23  ;;  %v2691_v30 = vpop.f32.mrb[106].mxu0  ;;  %v2884_v20 = vpop.f32.mrb[106].mxu1 }
 0x519   : > { %3055 = vst [vmem:[%s5756_s12 + $0x120] sm:$0xff] %v2688_v32  ;;  %v3851_v50 = vmax.f32 %v3850_v24, %v2688_v32  ;;  %3057 = vst [vmem:[%s5756_s12 + $0x130] sm:$0xff] %v2881_v6  ;;  %v3925_v46 = vmax.f32 %v3924_v2, %v2881_v6  ;;  %v2692_v28 = vadd.f32 %v2691_v30, %v6129_v40  ;;  %v2693_v52 = vpop.f32.mrb[107].mxu0  ;;  %v2886_v58 = vpop.f32.mrb[107].mxu1 }
 0x51a   : > { %v2885_v33 = vadd.f32 %v2884_v20, %v6131_v53  ;;  %3056 = vst [vmem:[%s5756_s12 + $0x128] sm:$0xff] %v2690_v22  ;;  %v3888_v39 = vmax.f32 %v3887_v14, %v2690_v22  ;;  %3058 = vst [vmem:[%s5756_s12 + $0x138] sm:$0xff] %v2883_v5  ;;  %v3962_v15 = vmax.f32 %v3961_v61, %v2883_v5 }
 0x51b   : > { %v2694_v16 = vadd.f32 %v2693_v52, %v6135_v13  ;;  %v2887_v17 = vadd.f32 %v2886_v58, %v6137_v23  ;;  %3063 = vst [vmem:[%s5756_s12 + $0x160] sm:$0xff] %v2692_v28  ;;  %v3852_v48 = vmax.f32 %v3851_v50, %v2692_v28 }
 0x51c   : > { %3065 = vst [vmem:[%s5756_s12 + $0x170] sm:$0xff] %v2885_v33  ;;  %v3926_v7 = vmax.f32 %v3925_v46, %v2885_v33 }
 0x51d   : > { %3064 = vst [vmem:[%s5756_s12 + $0x168] sm:$0xff] %v2694_v16  ;;  %v3889_v18 = vmax.f32 %v3888_v39, %v2694_v16  ;;  %3066 = vst [vmem:[%s5756_s12 + $0x178] sm:$0xff] %v2887_v17  ;;  %v3963_v19 = vmax.f32 %v3962_v15, %v2887_v17 }
 0x51e   : > { %v2697_v54 = vpop.f32.mrb[108].mxu0  ;;  %v2890_v21 = vpop.f32.mrb[108].mxu1 }
 0x51f   : > { %v2698_v47 = vadd.f32 %v2697_v54, %v6129_v40  ;;  %v2891_v56 = vadd.f32 %v2890_v21, %v6131_v53  ;;  %v2699_v36 = vpop.f32.mrb[109].mxu0  ;;  %v2892_v43 = vpop.f32.mrb[109].mxu1 }
 0x520   : > { %v2700_v29 = vadd.f32 %v2699_v36, %v6135_v13  ;;  %v2893_v41 = vadd.f32 %v2892_v43, %v6137_v23  ;;  %v2701_v38 = vpop.f32.mrb[110].mxu0  ;;  %v2894_v35 = vpop.f32.mrb[110].mxu1 }
 0x521   : > { %3071 = vst [vmem:[%s5756_s12 + $0x1a0] sm:$0xff] %v2698_v47  ;;  %v3853_v45 = vmax.f32 %v3852_v48, %v2698_v47  ;;  %3073 = vst [vmem:[%s5756_s12 + $0x1b0] sm:$0xff] %v2891_v56  ;;  %v3927_v42 = vmax.f32 %v3926_v7, %v2891_v56  ;;  %v2702_v62 = vadd.f32 %v2701_v38, %v6129_v40  ;;  %v2703_v31 = vpop.f32.mrb[111].mxu0  ;;  %v2896_v27 = vpop.f32.mrb[111].mxu1 }
 0x522   : > { %v2895_v44 = vadd.f32 %v2894_v35, %v6131_v53  ;;  %3072 = vst [vmem:[%s5756_s12 + $0x1a8] sm:$0xff] %v2700_v29  ;;  %v3890_v26 = vmax.f32 %v3889_v18, %v2700_v29  ;;  %3074 = vst [vmem:[%s5756_s12 + $0x1b8] sm:$0xff] %v2893_v41  ;;  %v3964_v0 = vmax.f32 %v3963_v19, %v2893_v41 }
 0x523   : > { %v2704_v10 = vadd.f32 %v2703_v31, %v6135_v13  ;;  %v2897_v55 = vadd.f32 %v2896_v27, %v6137_v23  ;;  %3079 = vst [vmem:[%s5756_s12 + $0x1e0] sm:$0xff] %v2702_v62  ;;  %v3854_v51 = vmax.f32 %v3853_v45, %v2702_v62 }
 0x524   : > { %3081 = vst [vmem:[%s5756_s12 + $0x1f0] sm:$0xff] %v2895_v44  ;;  %v3928_v57 = vmax.f32 %v3927_v42, %v2895_v44 }
 0x525   : > { %3080 = vst [vmem:[%s5756_s12 + $0x1e8] sm:$0xff] %v2704_v10  ;;  %v3891_v12 = vmax.f32 %v3890_v26, %v2704_v10  ;;  %3082 = vst [vmem:[%s5756_s12 + $0x1f8] sm:$0xff] %v2897_v55  ;;  %v3965_v59 = vmax.f32 %v3964_v0, %v2897_v55 }
 0x526   : > { %v2707_v60 = vpop.f32.mrb[112].mxu0  ;;  %v2900_v63 = vpop.f32.mrb[112].mxu1 }
 0x527   : > { %v2708_v3 = vadd.f32 %v2707_v60, %v6129_v40  ;;  %v2901_v4 = vadd.f32 %v2900_v63, %v6131_v53  ;;  %v2709_v24 = vpop.f32.mrb[113].mxu0  ;;  %v2902_v2 = vpop.f32.mrb[113].mxu1 }
 0x528   : > { %v2710_v14 = vadd.f32 %v2709_v24, %v6135_v13  ;;  %v2903_v61 = vadd.f32 %v2902_v2, %v6137_v23  ;;  %v2711_v25 = vpop.f32.mrb[114].mxu0  ;;  %v2904_v37 = vpop.f32.mrb[114].mxu1 }
 0x529   : > { %3087 = vst [vmem:[%s5756_s12 + $0x220] sm:$0xff] %v2708_v3  ;;  %v3855_v32 = vmax.f32 %v3854_v51, %v2708_v3  ;;  %3089 = vst [vmem:[%s5756_s12 + $0x230] sm:$0xff] %v2901_v4  ;;  %v3929_v6 = vmax.f32 %v3928_v57, %v2901_v4  ;;  %v2712_v8 = vadd.f32 %v2711_v25, %v6129_v40  ;;  %v2713_v22 = vpop.f32.mrb[115].mxu0  ;;  %v2906_v5 = vpop.f32.mrb[115].mxu1 }
 0x52a   : > { %v2905_v9 = vadd.f32 %v2904_v37, %v6131_v53  ;;  %3088 = vst [vmem:[%s5756_s12 + $0x228] sm:$0xff] %v2710_v14  ;;  %v3892_v30 = vmax.f32 %v3891_v12, %v2710_v14  ;;  %3090 = vst [vmem:[%s5756_s12 + $0x238] sm:$0xff] %v2903_v61  ;;  %v3966_v20 = vmax.f32 %v3965_v59, %v2903_v61 }
 0x52b   : > { %v2714_v50 = vadd.f32 %v2713_v22, %v6135_v13  ;;  %v2907_v46 = vadd.f32 %v2906_v5, %v6137_v23  ;;  %3095 = vst [vmem:[%s5756_s12 + $0x260] sm:$0xff] %v2712_v8  ;;  %v3856_v28 = vmax.f32 %v3855_v32, %v2712_v8 }
 0x52c   : > { %3097 = vst [vmem:[%s5756_s12 + $0x270] sm:$0xff] %v2905_v9  ;;  %v3930_v33 = vmax.f32 %v3929_v6, %v2905_v9 }
 0x52d   : > { %3096 = vst [vmem:[%s5756_s12 + $0x268] sm:$0xff] %v2714_v50  ;;  %v3893_v52 = vmax.f32 %v3892_v30, %v2714_v50  ;;  %3098 = vst [vmem:[%s5756_s12 + $0x278] sm:$0xff] %v2907_v46  ;;  %v3967_v58 = vmax.f32 %v3966_v20, %v2907_v46 }
 0x52e   : > { %v2717_v39 = vpop.f32.mrb[116].mxu0  ;;  %v2910_v15 = vpop.f32.mrb[116].mxu1 }
 0x52f   : > { %v2718_v16 = vadd.f32 %v2717_v39, %v6129_v40  ;;  %v2911_v17 = vadd.f32 %v2910_v15, %v6131_v53  ;;  %v2719_v48 = vpop.f32.mrb[117].mxu0  ;;  %v2912_v7 = vpop.f32.mrb[117].mxu1 }
 0x530   : > { %v2720_v18 = vadd.f32 %v2719_v48, %v6135_v13  ;;  %v2913_v19 = vadd.f32 %v2912_v7, %v6137_v23  ;;  %v2721_v54 = vpop.f32.mrb[118].mxu0  ;;  %v2914_v21 = vpop.f32.mrb[118].mxu1 }
 0x531   : > { %3103 = vst [vmem:[%s5756_s12 + $0x2a0] sm:$0xff] %v2718_v16  ;;  %v3857_v47 = vmax.f32 %v3856_v28, %v2718_v16  ;;  %3105 = vst [vmem:[%s5756_s12 + $0x2b0] sm:$0xff] %v2911_v17  ;;  %v3931_v56 = vmax.f32 %v3930_v33, %v2911_v17  ;;  %v2722_v36 = vadd.f32 %v2721_v54, %v6129_v40  ;;  %v2723_v29 = vpop.f32.mrb[119].mxu0  ;;  %v2916_v41 = vpop.f32.mrb[119].mxu1 }
 0x532   : > { %v2915_v43 = vadd.f32 %v2914_v21, %v6131_v53  ;;  %3104 = vst [vmem:[%s5756_s12 + $0x2a8] sm:$0xff] %v2720_v18  ;;  %v3894_v38 = vmax.f32 %v3893_v52, %v2720_v18  ;;  %3106 = vst [vmem:[%s5756_s12 + $0x2b8] sm:$0xff] %v2913_v19  ;;  %v3968_v35 = vmax.f32 %v3967_v58, %v2913_v19 }
 0x533   : > { %v2724_v45 = vadd.f32 %v2723_v29, %v6135_v13  ;;  %v2917_v42 = vadd.f32 %v2916_v41, %v6137_v23  ;;  %3111 = vst [vmem:[%s5756_s12 + $0x2e0] sm:$0xff] %v2722_v36  ;;  %v3858_v62 = vmax.f32 %v3857_v47, %v2722_v36 }
 0x534   : > { %3113 = vst [vmem:[%s5756_s12 + $0x2f0] sm:$0xff] %v2915_v43  ;;  %v3932_v44 = vmax.f32 %v3931_v56, %v2915_v43 }
 0x535   : > { %3112 = vst [vmem:[%s5756_s12 + $0x2e8] sm:$0xff] %v2724_v45  ;;  %v3895_v31 = vmax.f32 %v3894_v38, %v2724_v45  ;;  %3114 = vst [vmem:[%s5756_s12 + $0x2f8] sm:$0xff] %v2917_v42  ;;  %v3969_v27 = vmax.f32 %v3968_v35, %v2917_v42 }
 0x536   : > { %v2727_v26 = vpop.f32.mrb[120].mxu0  ;;  %v2920_v0 = vpop.f32.mrb[120].mxu1 }
 0x537   : > { %v2728_v10 = vadd.f32 %v2727_v26, %v6129_v40  ;;  %v2921_v55 = vadd.f32 %v2920_v0, %v6131_v53  ;;  %v2729_v51 = vpop.f32.mrb[121].mxu0  ;;  %v2922_v57 = vpop.f32.mrb[121].mxu1 }
 0x538   : > { %v2730_v12 = vadd.f32 %v2729_v51, %v6135_v13  ;;  %v2923_v59 = vadd.f32 %v2922_v57, %v6137_v23  ;;  %v2731_v60 = vpop.f32.mrb[122].mxu0  ;;  %v2924_v63 = vpop.f32.mrb[122].mxu1 }
 0x539   : > { %3119 = vst [vmem:[%s5756_s12 + $0x320] sm:$0xff] %v2728_v10  ;;  %v3859_v3 = vmax.f32 %v3858_v62, %v2728_v10  ;;  %3121 = vst [vmem:[%s5756_s12 + $0x330] sm:$0xff] %v2921_v55  ;;  %v3933_v4 = vmax.f32 %v3932_v44, %v2921_v55  ;;  %v2732_v24 = vadd.f32 %v2731_v60, %v6129_v40  ;;  %v2733_v14 = vpop.f32.mrb[123].mxu0  ;;  %v2926_v61 = vpop.f32.mrb[123].mxu1 }
 0x53a   : > { %v2925_v2 = vadd.f32 %v2924_v63, %v6131_v53  ;;  %3120 = vst [vmem:[%s5756_s12 + $0x328] sm:$0xff] %v2730_v12  ;;  %v3896_v25 = vmax.f32 %v3895_v31, %v2730_v12  ;;  %3122 = vst [vmem:[%s5756_s12 + $0x338] sm:$0xff] %v2923_v59  ;;  %v3970_v37 = vmax.f32 %v3969_v27, %v2923_v59 }
 0x53b   : > { %v2734_v32 = vadd.f32 %v2733_v14, %v6135_v13  ;;  %v2927_v6 = vadd.f32 %v2926_v61, %v6137_v23  ;;  %3127 = vst [vmem:[%s5756_s12 + $0x360] sm:$0xff] %v2732_v24  ;;  %v3860_v8 = vmax.f32 %v3859_v3, %v2732_v24 }
 0x53c   : > { %3129 = vst [vmem:[%s5756_s12 + $0x370] sm:$0xff] %v2925_v2  ;;  %v3934_v9 = vmax.f32 %v3933_v4, %v2925_v2 }
 0x53d   : > { %3128 = vst [vmem:[%s5756_s12 + $0x368] sm:$0xff] %v2734_v32  ;;  %v3897_v22 = vmax.f32 %v3896_v25, %v2734_v32  ;;  %3130 = vst [vmem:[%s5756_s12 + $0x378] sm:$0xff] %v2927_v6  ;;  %v3971_v5 = vmax.f32 %v3970_v37, %v2927_v6 }
 0x53e   : > { %v2737_v30 = vpop.f32.mrb[124].mxu0  ;;  %v2930_v20 = vpop.f32.mrb[124].mxu1 }
 0x53f   : > { %v2738_v50 = vadd.f32 %v2737_v30, %v6129_v40  ;;  %v2931_v46 = vadd.f32 %v2930_v20, %v6131_v53  ;;  %v2739_v28 = vpop.f32.mrb[125].mxu0  ;;  %v2932_v33 = vpop.f32.mrb[125].mxu1 }
 0x540   : > { %v2740_v52 = vadd.f32 %v2739_v28, %v6135_v13  ;;  %v2933_v58 = vadd.f32 %v2932_v33, %v6137_v23  ;;  %v2741_v39 = vpop.f32.mrb[126].mxu0  ;;  %v2934_v15 = vpop.f32.mrb[126].mxu1 }
 0x541   : > { %3135 = vst [vmem:[%s5756_s12 + $0x3a0] sm:$0xff] %v2738_v50  ;;  %v3861_v16 = vmax.f32 %v3860_v8, %v2738_v50  ;;  %3137 = vst [vmem:[%s5756_s12 + $0x3b0] sm:$0xff] %v2931_v46  ;;  %v3935_v17 = vmax.f32 %v3934_v9, %v2931_v46  ;;  %v2742_v48 = vadd.f32 %v2741_v39, %v6129_v40  ;;  %v2743_v18 = vpop.f32.mrb[127].mxu0  ;;  %v2936_v19 = vpop.f32.mrb[127].mxu1 }
 0x542   : > { %v2935_v7 = vadd.f32 %v2934_v15, %v6131_v53  ;;  %3136 = vst [vmem:[%s5756_s12 + $0x3a8] sm:$0xff] %v2740_v52  ;;  %v3898_v54 = vmax.f32 %v3897_v22, %v2740_v52  ;;  %3138 = vst [vmem:[%s5756_s12 + $0x3b8] sm:$0xff] %v2933_v58  ;;  %v3972_v21 = vmax.f32 %v3971_v5, %v2933_v58 }
 0x543   : > { %v2744_v47 = vadd.f32 %v2743_v18, %v6135_v13  ;;  %v2937_v56 = vadd.f32 %v2936_v19, %v6137_v23  ;;  %3143 = vst [vmem:[%s5756_s12 + $0x3e0] sm:$0xff] %v2742_v48  ;;  %v3862_v36 = vmax.f32 %v3861_v16, %v2742_v48 }
 0x544   : > { %3145 = vst [vmem:[%s5756_s12 + $0x3f0] sm:$0xff] %v2935_v7  ;;  %v3936_v43 = vmax.f32 %v3935_v17, %v2935_v7 }
 0x545   : > { %3144 = vst [vmem:[%s5756_s12 + $0x3e8] sm:$0xff] %v2744_v47  ;;  %v3899_v29 = vmax.f32 %v3898_v54, %v2744_v47  ;;  %3146 = vst [vmem:[%s5756_s12 + $0x3f8] sm:$0xff] %v2937_v56  ;;  %v3973_v41 = vmax.f32 %v3972_v21, %v2937_v56 }
 0x546   : > { %v2747_v38 = vpop.f32.mrb[128].mxu0  ;;  %v2940_v35 = vpop.f32.mrb[128].mxu1 }
 0x547   : > { %v2748_v45 = vadd.f32 %v2747_v38, %v6129_v40  ;;  %v2941_v42 = vadd.f32 %v2940_v35, %v6131_v53  ;;  %v2749_v62 = vpop.f32.mrb[129].mxu0  ;;  %v2942_v44 = vpop.f32.mrb[129].mxu1 }
 0x548   : > { %v2750_v31 = vadd.f32 %v2749_v62, %v6135_v13  ;;  %v2943_v27 = vadd.f32 %v2942_v44, %v6137_v23  ;;  %v2751_v26 = vpop.f32.mrb[130].mxu0  ;;  %v2944_v0 = vpop.f32.mrb[130].mxu1 }
 0x549   : > { %3151 = vst [vmem:[%s5756_s12 + $0x420] sm:$0xff] %v2748_v45  ;;  %v3863_v10 = vmax.f32 %v3862_v36, %v2748_v45  ;;  %3153 = vst [vmem:[%s5756_s12 + $0x430] sm:$0xff] %v2941_v42  ;;  %v3937_v55 = vmax.f32 %v3936_v43, %v2941_v42  ;;  %v2752_v51 = vadd.f32 %v2751_v26, %v6129_v40  ;;  %v2753_v12 = vpop.f32.mrb[131].mxu0  ;;  %v2946_v59 = vpop.f32.mrb[131].mxu1 }
 0x54a   : > { %v2945_v57 = vadd.f32 %v2944_v0, %v6131_v53  ;;  %3152 = vst [vmem:[%s5756_s12 + $0x428] sm:$0xff] %v2750_v31  ;;  %v3900_v60 = vmax.f32 %v3899_v29, %v2750_v31  ;;  %3154 = vst [vmem:[%s5756_s12 + $0x438] sm:$0xff] %v2943_v27  ;;  %v3974_v63 = vmax.f32 %v3973_v41, %v2943_v27 }
 0x54b   : > { %v2754_v3 = vadd.f32 %v2753_v12, %v6135_v13  ;;  %v2947_v4 = vadd.f32 %v2946_v59, %v6137_v23  ;;  %3159 = vst [vmem:[%s5756_s12 + $0x460] sm:$0xff] %v2752_v51  ;;  %v3864_v24 = vmax.f32 %v3863_v10, %v2752_v51 }
 0x54c   : > { %3161 = vst [vmem:[%s5756_s12 + $0x470] sm:$0xff] %v2945_v57  ;;  %v3938_v2 = vmax.f32 %v3937_v55, %v2945_v57 }
 0x54d   : > { %3160 = vst [vmem:[%s5756_s12 + $0x468] sm:$0xff] %v2754_v3  ;;  %v3901_v14 = vmax.f32 %v3900_v60, %v2754_v3  ;;  %3162 = vst [vmem:[%s5756_s12 + $0x478] sm:$0xff] %v2947_v4  ;;  %v3975_v61 = vmax.f32 %v3974_v63, %v2947_v4 }
 0x54e   : > { %v2757_v25 = vpop.f32.mrb[132].mxu0  ;;  %v2950_v37 = vpop.f32.mrb[132].mxu1 }
 0x54f   : > { %v2758_v32 = vadd.f32 %v2757_v25, %v6129_v40  ;;  %v2951_v6 = vadd.f32 %v2950_v37, %v6131_v53  ;;  %v2759_v8 = vpop.f32.mrb[133].mxu0  ;;  %v2952_v9 = vpop.f32.mrb[133].mxu1 }
 0x550   : > { %v2760_v22 = vadd.f32 %v2759_v8, %v6135_v13  ;;  %v2953_v5 = vadd.f32 %v2952_v9, %v6137_v23  ;;  %v2761_v30 = vpop.f32.mrb[134].mxu0  ;;  %v2954_v20 = vpop.f32.mrb[134].mxu1 }
 0x551   : > { %3167 = vst [vmem:[%s5756_s12 + $0x4a0] sm:$0xff] %v2758_v32  ;;  %v3865_v50 = vmax.f32 %v3864_v24, %v2758_v32  ;;  %3169 = vst [vmem:[%s5756_s12 + $0x4b0] sm:$0xff] %v2951_v6  ;;  %v3939_v46 = vmax.f32 %v3938_v2, %v2951_v6  ;;  %v2762_v28 = vadd.f32 %v2761_v30, %v6129_v40  ;;  %v2763_v52 = vpop.f32.mrb[135].mxu0  ;;  %v2956_v58 = vpop.f32.mrb[135].mxu1 }
 0x552   : > { %v2955_v33 = vadd.f32 %v2954_v20, %v6131_v53  ;;  %3168 = vst [vmem:[%s5756_s12 + $0x4a8] sm:$0xff] %v2760_v22  ;;  %v3902_v39 = vmax.f32 %v3901_v14, %v2760_v22  ;;  %3170 = vst [vmem:[%s5756_s12 + $0x4b8] sm:$0xff] %v2953_v5  ;;  %v3976_v15 = vmax.f32 %v3975_v61, %v2953_v5 }
 0x553   : > { %v2764_v16 = vadd.f32 %v2763_v52, %v6135_v13  ;;  %v2957_v17 = vadd.f32 %v2956_v58, %v6137_v23  ;;  %3175 = vst [vmem:[%s5756_s12 + $0x4e0] sm:$0xff] %v2762_v28  ;;  %v3866_v48 = vmax.f32 %v3865_v50, %v2762_v28 }
 0x554   : > { %3177 = vst [vmem:[%s5756_s12 + $0x4f0] sm:$0xff] %v2955_v33  ;;  %v3940_v7 = vmax.f32 %v3939_v46, %v2955_v33 }
 0x555   : > { %3176 = vst [vmem:[%s5756_s12 + $0x4e8] sm:$0xff] %v2764_v16  ;;  %v3903_v18 = vmax.f32 %v3902_v39, %v2764_v16  ;;  %3178 = vst [vmem:[%s5756_s12 + $0x4f8] sm:$0xff] %v2957_v17  ;;  %v3977_v19 = vmax.f32 %v3976_v15, %v2957_v17 }
 0x556   : > { %v2767_v54 = vpop.f32.mrb[136].mxu0  ;;  %v2960_v21 = vpop.f32.mrb[136].mxu1 }
 0x557   : > { %v2768_v47 = vadd.f32 %v2767_v54, %v6129_v40  ;;  %v2961_v56 = vadd.f32 %v2960_v21, %v6131_v53  ;;  %v2769_v36 = vpop.f32.mrb[137].mxu0  ;;  %v2962_v43 = vpop.f32.mrb[137].mxu1 }
 0x558   : > { %v2770_v29 = vadd.f32 %v2769_v36, %v6135_v13  ;;  %v2963_v41 = vadd.f32 %v2962_v43, %v6137_v23  ;;  %v2771_v38 = vpop.f32.mrb[138].mxu0  ;;  %v2964_v35 = vpop.f32.mrb[138].mxu1 }
 0x559   : > { %3183 = vst [vmem:[%s5756_s12 + $0x520] sm:$0xff] %v2768_v47  ;;  %v3867_v45 = vmax.f32 %v3866_v48, %v2768_v47  ;;  %3185 = vst [vmem:[%s5756_s12 + $0x530] sm:$0xff] %v2961_v56  ;;  %v3941_v42 = vmax.f32 %v3940_v7, %v2961_v56  ;;  %v2772_v62 = vadd.f32 %v2771_v38, %v6129_v40  ;;  %v2773_v31 = vpop.f32.mrb[139].mxu0  ;;  %v2966_v27 = vpop.f32.mrb[139].mxu1 }
 0x55a   : > { %v2965_v44 = vadd.f32 %v2964_v35, %v6131_v53  ;;  %3184 = vst [vmem:[%s5756_s12 + $0x528] sm:$0xff] %v2770_v29  ;;  %v3904_v26 = vmax.f32 %v3903_v18, %v2770_v29  ;;  %3186 = vst [vmem:[%s5756_s12 + $0x538] sm:$0xff] %v2963_v41  ;;  %v3978_v0 = vmax.f32 %v3977_v19, %v2963_v41 }
 0x55b   : > { %v2774_v10 = vadd.f32 %v2773_v31, %v6135_v13  ;;  %v2967_v55 = vadd.f32 %v2966_v27, %v6137_v23  ;;  %3191 = vst [vmem:[%s5756_s12 + $0x560] sm:$0xff] %v2772_v62  ;;  %v3868_v51 = vmax.f32 %v3867_v45, %v2772_v62 }
 0x55c   : > { %3193 = vst [vmem:[%s5756_s12 + $0x570] sm:$0xff] %v2965_v44  ;;  %v3942_v57 = vmax.f32 %v3941_v42, %v2965_v44 }
 0x55d   : > { %3192 = vst [vmem:[%s5756_s12 + $0x568] sm:$0xff] %v2774_v10  ;;  %v3905_v12 = vmax.f32 %v3904_v26, %v2774_v10  ;;  %3194 = vst [vmem:[%s5756_s12 + $0x578] sm:$0xff] %v2967_v55  ;;  %v3979_v59 = vmax.f32 %v3978_v0, %v2967_v55 }
 0x55e   : > { %v2777_v60 = vpop.f32.mrb[140].mxu0  ;;  %v2970_v63 = vpop.f32.mrb[140].mxu1 }
 0x55f   : > { %v2778_v3 = vadd.f32 %v2777_v60, %v6129_v40  ;;  %v2971_v4 = vadd.f32 %v2970_v63, %v6131_v53  ;;  %v2779_v24 = vpop.f32.mrb[141].mxu0  ;;  %v2972_v2 = vpop.f32.mrb[141].mxu1 }
 0x560   : > { %v2780_v14 = vadd.f32 %v2779_v24, %v6135_v13  ;;  %v2973_v61 = vadd.f32 %v2972_v2, %v6137_v23  ;;  %v2781_v25 = vpop.f32.mrb[142].mxu0  ;;  %v2974_v37 = vpop.f32.mrb[142].mxu1 }
 0x561   : > { %3199 = vst [vmem:[%s5756_s12 + $0x5a0] sm:$0xff] %v2778_v3  ;;  %v3869_v32 = vmax.f32 %v3868_v51, %v2778_v3  ;;  %3201 = vst [vmem:[%s5756_s12 + $0x5b0] sm:$0xff] %v2971_v4  ;;  %v3943_v6 = vmax.f32 %v3942_v57, %v2971_v4  ;;  %v2782_v8 = vadd.f32 %v2781_v25, %v6129_v40  ;;  %v2783_v22 = vpop.f32.mrb[143].mxu0  ;;  %v2976_v5 = vpop.f32.mrb[143].mxu1 }
 0x562   : > { %v2975_v9 = vadd.f32 %v2974_v37, %v6131_v53  ;;  %3200 = vst [vmem:[%s5756_s12 + $0x5a8] sm:$0xff] %v2780_v14  ;;  %v3906_v30 = vmax.f32 %v3905_v12, %v2780_v14  ;;  %3202 = vst [vmem:[%s5756_s12 + $0x5b8] sm:$0xff] %v2973_v61  ;;  %v3980_v20 = vmax.f32 %v3979_v59, %v2973_v61 }
 0x563   : > { %v2784_v50 = vadd.f32 %v2783_v22, %v6135_v13  ;;  %v2977_v46 = vadd.f32 %v2976_v5, %v6137_v23  ;;  %3207 = vst [vmem:[%s5756_s12 + $0x5e0] sm:$0xff] %v2782_v8  ;;  %v3870_v28 = vmax.f32 %v3869_v32, %v2782_v8 }
 0x564   : > { %3209 = vst [vmem:[%s5756_s12 + $0x5f0] sm:$0xff] %v2975_v9  ;;  %v3944_v33 = vmax.f32 %v3943_v6, %v2975_v9 }
 0x565   : > { %3208 = vst [vmem:[%s5756_s12 + $0x5e8] sm:$0xff] %v2784_v50  ;;  %v3907_v52 = vmax.f32 %v3906_v30, %v2784_v50  ;;  %3210 = vst [vmem:[%s5756_s12 + $0x5f8] sm:$0xff] %v2977_v46  ;;  %v3981_v58 = vmax.f32 %v3980_v20, %v2977_v46 }
 0x566   : > { %v2787_v39 = vpop.f32.mrb[144].mxu0  ;;  %v2980_v15 = vpop.f32.mrb[144].mxu1 }
 0x567   : > { %v2788_v16 = vadd.f32 %v2787_v39, %v6129_v40  ;;  %v2981_v17 = vadd.f32 %v2980_v15, %v6131_v53  ;;  %v2789_v48 = vpop.f32.mrb[145].mxu0  ;;  %v2982_v7 = vpop.f32.mrb[145].mxu1 }
 0x568   : > { %v2790_v18 = vadd.f32 %v2789_v48, %v6135_v13  ;;  %v2983_v19 = vadd.f32 %v2982_v7, %v6137_v23  ;;  %v2791_v54 = vpop.f32.mrb[146].mxu0  ;;  %v2984_v21 = vpop.f32.mrb[146].mxu1 }
 0x569   : > { %3215 = vst [vmem:[%s5756_s12 + $0x620] sm:$0xff] %v2788_v16  ;;  %v3871_v47 = vmax.f32 %v3870_v28, %v2788_v16  ;;  %3217 = vst [vmem:[%s5756_s12 + $0x630] sm:$0xff] %v2981_v17  ;;  %v3945_v56 = vmax.f32 %v3944_v33, %v2981_v17  ;;  %v2792_v36 = vadd.f32 %v2791_v54, %v6129_v40  ;;  %v2793_v29 = vpop.f32.mrb[147].mxu0  ;;  %v2986_v41 = vpop.f32.mrb[147].mxu1 }
 0x56a   : > { %v2985_v43 = vadd.f32 %v2984_v21, %v6131_v53  ;;  %3216 = vst [vmem:[%s5756_s12 + $0x628] sm:$0xff] %v2790_v18  ;;  %v3908_v38 = vmax.f32 %v3907_v52, %v2790_v18  ;;  %3218 = vst [vmem:[%s5756_s12 + $0x638] sm:$0xff] %v2983_v19  ;;  %v3982_v35 = vmax.f32 %v3981_v58, %v2983_v19 }
 0x56b   : > { %v2794_v45 = vadd.f32 %v2793_v29, %v6135_v13  ;;  %v2987_v42 = vadd.f32 %v2986_v41, %v6137_v23  ;;  %v3879_v62 = vrot.slane %v3871_v47, 4  ;;  %v3953_v44 = vrot.slane %v3945_v56, 4  ;;  %3223 = vst [vmem:[%s5756_s12 + $0x660] sm:$0xff] %v2792_v36 }
 0x56c   : > { %3225 = vst [vmem:[%s5756_s12 + $0x670] sm:$0xff] %v2985_v43  ;;  %v3916_v31 = vrot.slane %v3908_v38, 4  ;;  %v3990_v27 = vrot.slane %v3982_v35, 4 }
 0x56d   : > { %3224 = vst [vmem:[%s5756_s12 + $0x668] sm:$0xff] %v2794_v45  ;;  %3226 = vst [vmem:[%s5756_s12 + $0x678] sm:$0xff] %v2987_v42  ;;  %v3880_v26 = vmax.f32 %v3871_v47, %v3879_v62  ;;  %v3954_v0 = vmax.f32 %v3945_v56, %v3953_v44 }
 0x56e   : > { %v3917_v10 = vmax.f32 %v3908_v38, %v3916_v31  ;;  %v3991_v55 = vmax.f32 %v3982_v35, %v3990_v27  ;;  %v2797_v51 = vpop.f32.mrb[148].mxu0  ;;  %v2990_v57 = vpop.f32.mrb[148].mxu1 }
 0x56f   : > { %v3881_v12 = vrot.slane %v3880_v26, 2  ;;  %v3955_v59 = vrot.slane %v3954_v0, 2  ;;  %v2798_v60 = vadd.f32 %v2797_v51, %v6129_v40  ;;  %v2991_v63 = vadd.f32 %v2990_v57, %v6131_v53  ;;  %v2799_v3 = vpop.f32.mrb[149].mxu0  ;;  %v2992_v4 = vpop.f32.mrb[149].mxu1 }
 0x570   : > { %v3918_v24 = vrot.slane %v3917_v10, 2  ;;  %v3992_v2 = vrot.slane %v3991_v55, 2  ;;  %v2800_v14 = vadd.f32 %v2799_v3, %v6135_v13  ;;  %v2993_v61 = vadd.f32 %v2992_v4, %v6137_v23  ;;  %v2801_v25 = vpop.f32.mrb[150].mxu0  ;;  %v2994_v37 = vpop.f32.mrb[150].mxu1 }
 0x571   : > { %v3882_v32 = vmax.f32 %v3880_v26, %v3881_v12  ;;  %v3956_v6 = vmax.f32 %v3954_v0, %v3955_v59  ;;  %3231 = vst [vmem:[%s5756_s12 + $0x6a0] sm:$0xff] %v2798_v60  ;;  %3233 = vst [vmem:[%s5756_s12 + $0x6b0] sm:$0xff] %v2991_v63  ;;  %v2802_v8 = vadd.f32 %v2801_v25, %v6129_v40  ;;  %v2803_v22 = vpop.f32.mrb[151].mxu0  ;;  %v2996_v5 = vpop.f32.mrb[151].mxu1 }
 0x572   : > { %v2995_v9 = vadd.f32 %v2994_v37, %v6131_v53  ;;  %v3919_v30 = vmax.f32 %v3917_v10, %v3918_v24  ;;  %v3993_v20 = vmax.f32 %v3991_v55, %v3992_v2  ;;  %3232 = vst [vmem:[%s5756_s12 + $0x6a8] sm:$0xff] %v2800_v14  ;;  %3234 = vst [vmem:[%s5756_s12 + $0x6b8] sm:$0xff] %v2993_v61 }
 0x573   : > { %v2804_v50 = vadd.f32 %v2803_v22, %v6135_v13  ;;  %v2997_v46 = vadd.f32 %v2996_v5, %v6137_v23  ;;  %v3883_v28 = vrot.slane %v3882_v32, 1  ;;  %v3957_v33 = vrot.slane %v3956_v6, 1  ;;  %3239 = vst [vmem:[%s5756_s12 + $0x6e0] sm:$0xff] %v2802_v8 }
 0x574   : > { %3241 = vst [vmem:[%s5756_s12 + $0x6f0] sm:$0xff] %v2995_v9  ;;  %v3920_v52 = vrot.slane %v3919_v30, 1  ;;  %v3994_v58 = vrot.slane %v3993_v20, 1  ;;  %v4044_v0 = vrot.slane %v4036_v11, %v6085_v34 }
 0x575   : > { %3240 = vst [vmem:[%s5756_s12 + $0x6e8] sm:$0xff] %v2804_v50  ;;  %3242 = vst [vmem:[%s5756_s12 + $0x6f8] sm:$0xff] %v2997_v46  ;;  %v3884_v39 = vmax.f32 %v3882_v32, %v3883_v28  ;;  %v3958_v15 = vmax.f32 %v3956_v6, %v3957_v33 }
 0x576   : > { %v3921_v16 = vmax.f32 %v3919_v30, %v3920_v52  ;;  %v3995_v17 = vmax.f32 %v3993_v20, %v3994_v58  ;;  %v2807_v48 = vpop.f32.mrb[152].mxu0  ;;  %v3000_v7 = vpop.f32.mrb[152].mxu1 }
 0x577   : > { %v2808_v18 = vadd.f32 %v2807_v48, %v6129_v40  ;;  %v3001_v19 = vadd.f32 %v3000_v7, %v6131_v53  ;;  %v2809_v54 = vpop.f32.mrb[153].mxu0  ;;  %v3002_v21 = vpop.f32.mrb[153].mxu1 }
 0x578   : > { %v4006_v47 = vcombine.low %v3884_v39, %v3921_v16  ;;  %v4007_v56 = vcombine.low %v3958_v15, %v3995_v17  ;;  %v2810_v36 = vadd.f32 %v2809_v54, %v6135_v13  ;;  %v3003_v43 = vadd.f32 %v3002_v21, %v6137_v23  ;;  %v2811_v29 = vpop.f32.mrb[154].mxu0  ;;  %v3004_v41 = vpop.f32.mrb[154].mxu1 }
 0x579   : > { %3247 = vst [vmem:[%s5756_s12 + $0x720] sm:$0xff] %v2808_v18  ;;  %3249 = vst [vmem:[%s5756_s12 + $0x730] sm:$0xff] %v3001_v19  ;;  %v2812_v38 = vadd.f32 %v2811_v29, %v6129_v40  ;;  %v3005_v35 = vadd.f32 %v3004_v41, %v6131_v53  ;;  %v2813_v45 = vpop.f32.mrb[155].mxu0  ;;  %v3006_v42 = vpop.f32.mrb[155].mxu1 }
 0x57a   : > { %v4028_v62 = vrot.slane %v4006_v47, %v6085_v34  ;;  %v4035_v44 = vrot.slane %v4007_v56, %v6085_v34  ;;  %3248 = vst [vmem:[%s5756_s12 + $0x728] sm:$0xff] %v2810_v36  ;;  %3250 = vst [vmem:[%s5756_s12 + $0x738] sm:$0xff] %v3003_v43  ;;  %v2814_v31 = vadd.f32 %v2813_v45, %v6135_v13 }
 0x57b   : > { %v3007_v27 = vadd.f32 %v3006_v42, %v6137_v23  ;;  %3255 = vst [vmem:[%s5756_s12 + $0x760] sm:$0xff] %v2812_v38  ;;  %3257 = vst [vmem:[%s5756_s12 + $0x770] sm:$0xff] %v3005_v35 }
 0x57c   : > { %v4037_v26 = vcombine.low %v4028_v62, %v4035_v44  ;;  %3256 = vst [vmem:[%s5756_s12 + $0x768] sm:$0xff] %v2814_v31 }
 0x57d   : > { %3258 = vst [vmem:[%s5756_s12 + $0x778] sm:$0xff] %v3007_v27 }
 0x57e   : > { %v4051_v10 = vrot.slane %v4037_v26, %v6085_v34  ;;  %v2817_v55 = vpop.f32.mrb[156].mxu0  ;;  %v3010_v51 = vpop.f32.mrb[156].mxu1 }
 0x57f   : > { %v2818_v57 = vadd.f32 %v2817_v55, %v6129_v40  ;;  %v3011_v12 = vadd.f32 %v3010_v51, %v6131_v53  ;;  %v2819_v59 = vpop.f32.mrb[157].mxu0  ;;  %v3012_v60 = vpop.f32.mrb[157].mxu1 }
 0x580   : > { %v4052_v63 = vcombine.low %v4044_v0, %v4051_v10  ;;  %v2820_v1 = vadd.f32 %v2819_v59, %v6135_v13  ;;  %v3013_v49 = vadd.f32 %v3012_v60, %v6137_v23  ;;  %v2821_v11 = vpop.f32.mrb[158].mxu0  ;;  %v3014_v34 = vpop.f32.mrb[158].mxu1 }
 0x581   : > { %3263 = vst [vmem:[%s5756_s12 + $0x7a0] sm:$0xff] %v2818_v57  ;;  %3265 = vst [vmem:[%s5756_s12 + $0x7b0] sm:$0xff] %v3011_v12  ;;  %v2822_v3 = vadd.f32 %v2821_v11, %v6129_v40  ;;  %v3015_v4 = vadd.f32 %v3014_v34, %v6131_v53  ;;  %v2823_v24 = vpop.f32.mrb[159].mxu0  ;;  %v3016_v2 = vpop.f32.mrb[159].mxu1 }
 0x582   : > { %3264 = vst [vmem:[%s5756_s12 + $0x7a8] sm:$0xff] %v2820_v1  ;;  %3266 = vst [vmem:[%s5756_s12 + $0x7b8] sm:$0xff] %v3013_v49  ;;  %v2824_v14 = vadd.f32 %v2823_v24, %v6135_v13  ;;  %v3017_v61 = vadd.f32 %v3016_v2, %v6137_v23 }
 0x583   : > { %3271 = vst [vmem:[%s5756_s12 + $0x7e0] sm:$0xff] %v2822_v3  ;;  %3273 = vst [vmem:[%s5756_s12 + $0x7f0] sm:$0xff] %v3015_v4 }
 0x584   : > { %4055 = vst [vmem:[%s518_s17] sm:$0xff] %v4052_v63  ;;  %3272 = vst [vmem:[%s5756_s12 + $0x7e8] sm:$0xff] %v2824_v14 }
 0x585   : > { %3274 = vst [vmem:[%s5756_s12 + $0x7f8] sm:$0xff] %v3017_v61 }
 0x586 PF: > { %s26_s15 = sadd.s32 1, %s4938_s15   ;;  %s6439_s13 = smov %s4934_s14 }
 0x587   : > { %p23_p7 = scmp.ge.s32.totalorder %s26_s15, 4   ;;  %s6440_s14 = smov %s6442_s26 }
 0x589   :  { %25 = sbr.rel (!%p23_p7) target bundleno = 9 (0x9), region = 135 }
 0x590   :  { %4102 = vsyncpa [#allocation3], 1 }
 0x591   :  { %4104 = vsyncpa [#allocation3 + $0x1], 1 }
 0x592   :  { %4105 = vsyncpa [#allocation5], 1 }
 0x593   :  { %4106 = vsyncpa [#allocation8], 1 }
 0x594   :  { %4107 = vsyncpa [#allocation11], 1 }
 0x595   :  { %4108 = vsyncpa [#allocation14], 1 }

</bundles_post_ra>
